<compile_context>
chip_gen: v6e
topology: v6e:2x2x1
jax: 0.10.0
libtpu: 0.0.40
codegen_flags: <defaults>
</compile_context>

<pallas_src>
import math
import jax
import jax.numpy as jnp
from jax.experimental import pallas as pl
from jax.experimental.pallas import tpu as pltpu

EPS = 1e-5
NUM_GROUPS = 16
SKIP_SCALE = 0.5 ** 0.5


# ----------------------------------------------------------------------------
# Kernel (specialised per (has_skip, compute_dtype) via closure)
# ----------------------------------------------------------------------------
def _make_fblock_kernel(has_skip: bool, compute_dtype):
    def group_norm(v, ind, expg, beta):
        # Per-group mean / E[v^2] via two skinny (C, 16) dots sharing the RHS
        # (no (2*tn, C) concatenate).  All stats in f32.
        m_g = jnp.dot(v, ind, preferred_element_type=jnp.float32)          # (tn, 16)
        m2_g = jnp.dot(v * v, ind, preferred_element_type=jnp.float32)     # (tn, 16)
        var_g = jnp.maximum(m2_g - m_g * m_g, 0.0)                         # clamp cancellation
        rstd_g = jax.lax.rsqrt(var_g + EPS)
        # Broadcast per-group scale/shift back to channels with the one-hot
        # expansion; gamma is pre-folded into expg, beta added afterwards.
        scale = jnp.dot(rstd_g, expg, preferred_element_type=jnp.float32)          # (tn, C)
        shift = jnp.dot(-(m_g * rstd_g), expg, preferred_element_type=jnp.float32)  # (tn, C)
        return v * scale + shift + beta

    def kernel(x_ref, emb_ref,
               ind0_ref, expg0_ref, be0_ref,        # GroupNorm0 helpers
               w0_ref, b0a_ref, wa_ref,             # conv0 weight, fused bias (b0+ba), affine weight
               ind1_ref, expg1_ref, be1_ref,        # GroupNorm1 helpers
               w1_ref, b1_ref,                      # conv1
               *rest):                              # [ws, bs,] out
        if has_skip:
            ws_ref, bs_ref, o_ref = rest
        else:
            (o_ref,) = rest

        x = x_ref[...].astype(jnp.float32)

        # ---- GroupNorm0 + SiLU (f32) ----
        h = group_norm(x, ind0_ref[...], expg0_ref[...], be0_ref[...])
        h = h * jax.nn.sigmoid(h)

        # ---- conv0 + affine(emb); biases pre-fused into b0a ----
        h = (jnp.dot(h.astype(compute_dtype), w0_ref[...],
                     preferred_element_type=jnp.float32)
             + jnp.dot(emb_ref[...].astype(compute_dtype), wa_ref[...],
                       preferred_element_type=jnp.float32)
             + b0a_ref[...])

        # ---- GroupNorm1 + SiLU (f32) ----
        h = group_norm(h, ind1_ref[...], expg1_ref[...], be1_ref[...])
        h = h * jax.nn.sigmoid(h)

        # ---- dropout(p=0 / eval => identity) + conv1 ----
        # TODO(synk): training-mode dropout with p>0 would need pltpu.prng_* masking.
        h = jnp.dot(h.astype(compute_dtype), w1_ref[...],
                    preferred_element_type=jnp.float32) + b1_ref[...]

        # ---- skip path + scale ----
        if has_skip:
            s = jnp.dot(x.astype(compute_dtype), ws_ref[...],
                        preferred_element_type=jnp.float32) + bs_ref[...]
        else:
            s = x                                       # identity skip, no matmul
        o_ref[...] = ((h + s) * SKIP_SCALE).astype(o_ref.dtype)

    return kernel


# ----------------------------------------------------------------------------
# Parameter preparation (done ONCE, outside the hot path)
# ----------------------------------------------------------------------------
def _group_matrices(channels, num_groups=NUM_GROUPS):
    """ind: (C, G) with 1/group_size entries -> x @ ind gives per-group means.
    exp: (G, C) one-hot -> group values @ exp broadcasts back to channels."""
    assert channels % num_groups == 0, "GroupNorm(16, C) needs C % 16 == 0"
    gsize = channels // num_groups
    gid = jnp.arange(channels) // gsize
    onehot = (gid[:, None] == jnp.arange(num_groups)[None, :]).astype(jnp.float32)
    return onehot / float(gsize), onehot.T


def prepare_params(params, *, compute_dtype=jnp.bfloat16):
    """Build kernel-ready arrays: group indicator/expansion matrices (gamma
    folded into the expansion), fused biases, and matmul weights cast once to
    compute_dtype (bf16 by default for v6e/v7x; pass float32 for validation)."""
    Cin = params["g0"].shape[0]
    Cout = params["g1"].shape[0]
    cd = jnp.dtype(compute_dtype)

    def row(v):
        return jnp.asarray(v, jnp.float32).reshape(1, -1)

    ind_in, exp_in = _group_matrices(Cin)
    ind_out, exp_out = _group_matrices(Cout)

    prep = {
        "ind0": ind_in,
        "expg0": exp_in * row(params["g0"]),          # gamma0 folded in
        "be0": row(params["be0"]),
        "w0": params["w0"].astype(cd),
        "b0a": row(params["b0"]) + row(params["ba"]), # conv0 bias + affine bias fused
        "wa": params["wa"].astype(cd),
        "ind1": ind_out,
        "expg1": exp_out * row(params["g1"]),         # gamma1 folded in
        "be1": row(params["be1"]),
        "w1": params["w1"].astype(cd),
        "b1": row(params["b1"]),
        "compute_dtype": cd,
    }
    if params["ws"] is not None:
        prep["ws"] = params["ws"].astype(cd)
        prep["bs"] = row(params["bs"])
    else:
        prep["ws"] = None
        prep["bs"] = None
    return prep


# ----------------------------------------------------------------------------
# Tiling / VMEM sizing helpers
# ----------------------------------------------------------------------------
def _choose_tile_n(n_rows, requested):
    """Large row tiles (default 512), but keep >=4 tiles (>=2 per v7x TC) when
    tiles can stay >=128 rows, and prefer an even tile count for megacore."""
    t = min(requested, n_rows)
    if t < n_rows:
        t = max(8, (t // 8) * 8)
    while (n_rows + t - 1) // t < 4 and t > 128:
        t = max(128, ((t // 2) // 8) * 8)
    nt = (n_rows + t - 1) // t
    if nt > 1 and nt % 2 == 1:
        t2 = ((-(-n_rows // (nt + 1)) + 7) // 8) * 8
        if 8 <= t2 < n_rows and ((n_rows + t2 - 1) // t2) % 2 == 0:
            t = t2
    return t


def _default_vmem_limit(tile_n, Cin, Cout, Cemb, has_skip, cd_bytes):
    """Footprint-derived scoped-VMEM request: single-buffered constants +
    double-buffered activation tiles + working-set headroom.  Capped at 48 MiB
    so it always fits v7x's 64 MiB per-TensorCore VMEM."""
    f32 = 4
    const_bytes = 2 * (Cin + Cout) * NUM_GROUPS * f32            # ind/exp matrices
    const_bytes += 8 * (Cin + 4 * Cout) * f32                     # (1,C) rows, sublane-padded
    const_bytes += (Cin * Cout + Cemb * Cout + Cout * Cout) * cd_bytes
    if has_skip:
        const_bytes += Cin * Cout * cd_bytes + 8 * Cout * f32
    act_bytes = 2 * tile_n * (Cin + Cemb + Cout) * f32             # double-buffered x/emb/out
    temp_bytes = 8 * tile_n * max(Cin, Cout, Cemb) * f32           # in-kernel working set
    total = const_bytes + act_bytes + temp_bytes
    return min(max(int(total * 1.25), 16 << 20), 48 << 20)


# ----------------------------------------------------------------------------
# Forward wrapper
# ----------------------------------------------------------------------------
def fblock_forward(x, emb, prep, *, tile_n=512, vmem_limit_bytes=None):
    N, Cin = x.shape
    Cemb = emb.shape[1]
    Cout = prep["w0"].shape[1]
    has_skip = prep["ws"] is not None
    if not has_skip:
        assert Cin == Cout, "identity skip requires in_channels == out_channels"
    cd = prep["compute_dtype"]

    tile_n = _choose_tile_n(N, tile_n)
    grid = (pl.cdiv(N, tile_n),)

    if vmem_limit_bytes is None:
        vmem_limit_bytes = _default_vmem_limit(
            tile_n, Cin, Cout, Cemb, has_skip, jnp.dtype(cd).itemsize)

    def const(shape):
        # Constant block index across the grid -> single-buffer (no 2x VMEM).
        return pl.BlockSpec(shape, lambda i: (0, 0), pipeline_mode=pl.Buffered(1))

    in_specs = [
        pl.BlockSpec((tile_n, Cin), lambda i: (i, 0)),    # x
        pl.BlockSpec((tile_n, Cemb), lambda i: (i, 0)),   # emb
        const((Cin, NUM_GROUPS)),    # ind0
        const((NUM_GROUPS, Cin)),    # expg0 (gamma0 folded)
        const((1, Cin)),             # beta0
        const((Cin, Cout)),          # w0
        const((1, Cout)),            # b0 + ba fused
        const((Cemb, Cout)),         # wa
        const((Cout, NUM_GROUPS)),   # ind1
        const((NUM_GROUPS, Cout)),   # expg1 (gamma1 folded)
        const((1, Cout)),            # beta1
        const((Cout, Cout)),         # w1
        const((1, Cout)),            # b1
    ]
    args = [x, emb,
            prep["ind0"], prep["expg0"], prep["be0"],
            prep["w0"], prep["b0a"], prep["wa"],
            prep["ind1"], prep["expg1"], prep["be1"],
            prep["w1"], prep["b1"]]
    if has_skip:
        in_specs += [const((Cin, Cout)), const((1, Cout))]   # ws, bs
        args += [prep["ws"], prep["bs"]]

    kernel = _make_fblock_kernel(has_skip, cd)

    return pl.pallas_call(
        kernel,
        out_shape=jax.ShapeDtypeStruct((N, Cout), x.dtype),
        grid_spec=pltpu.PrefetchScalarGridSpec(
            num_scalar_prefetch=0,
            grid=grid,
            in_specs=in_specs,
            out_specs=pl.BlockSpec((tile_n, Cout), lambda i: (i, 0)),
        ),
        compiler_params=pltpu.CompilerParams(
            dimension_semantics=("parallel",),
            vmem_limit_bytes=int(vmem_limit_bytes),
        ),
    )(*args)


# ----------------------------------------------------------------------------
# Init + pure-JAX reference (for validation)
# ----------------------------------------------------------------------------
def init_params(key, in_channels, out_channels, emb_channels):
    """Mirrors nn.Linear (uniform +-1/sqrt(fan_in)) and GroupNorm (w=1, b=0).
    Linear weights stored as (fan_in, fan_out)."""
    ks = jax.random.split(key, 8)

    def linear(kw, kb, fin, fout):
        bound = 1.0 / math.sqrt(fin)
        w = jax.random.uniform(kw, (fin, fout), jnp.float32, -bound, bound)
        b = jax.random.uniform(kb, (fout,), jnp.float32, -bound, bound)
        return w, b

    w0, b0 = linear(ks[0], ks[1], in_channels, out_channels)
    wa, ba = linear(ks[2], ks[3], emb_channels, out_channels)
    w1, b1 = linear(ks[4], ks[5], out_channels, out_channels)
    if out_channels != in_channels:
        ws, bs = linear(ks[6], ks[7], in_channels, out_channels)
    else:
        ws, bs = None, None
    return {
        "g0": jnp.ones((in_channels,), jnp.float32),
        "be0": jnp.zeros((in_channels,), jnp.float32),
        "w0": w0, "b0": b0,
        "wa": wa, "ba": ba,
        "g1": jnp.ones((out_channels,), jnp.float32),
        "be1": jnp.zeros((out_channels,), jnp.float32),
        "w1": w1, "b1": b1,
        "ws": ws, "bs": bs,
    }


def fblock_reference(x, emb, params):
    def gn(v, gamma, beta):
        n, c = v.shape
        g = v.reshape(n, NUM_GROUPS, c // NUM_GROUPS)
        m = g.mean(-1, keepdims=True)
        var = ((g - m) ** 2).mean(-1, keepdims=True)
        out = ((g - m) / jnp.sqrt(var + EPS)).reshape(n, c)
        return out * gamma + beta

    silu = jax.nn.silu
    orig = x
    h = silu(gn(x, params["g0"], params["be0"])) @ params["w0"] + params["b0"]
    h = h + (emb @ params["wa"] + params["ba"])
    h = silu(gn(h, params["g1"], params["be1"]))
    h = h @ params["w1"] + params["b1"]
    skip = orig @ params["ws"] + params["bs"] if params["ws"] is not None else orig
    return (h + skip) * SKIP_SCALE


# ----------------------------------------------------------------------------
if __name__ == "__main__":
    key = jax.random.PRNGKey(0)
    kx, ke, kp, kp2 = jax.random.split(key, 4)

    # Case A: in_channels != out_channels -> skip Linear present.
    # Lane-dense channels (multiples of 128); N gives an even number of tiles.
    N, Cin, Cout, Cemb = 256, 128, 256, 128
    x = jax.random.normal(kx, (N, Cin), jnp.float32)
    emb = jax.random.normal(ke, (N, Cemb), jnp.float32)
    params = init_params(kp, Cin, Cout, Cemb)
    ref = fblock_reference(x, emb, params)

    # f32 matmul path: tight check.
    prep_f32 = prepare_params(params, compute_dtype=jnp.float32)
    out_f32 = jax.block_until_ready(fblock_forward(x, emb, prep_f32))
    assert out_f32.shape == (N, Cout)
    assert jnp.allclose(out_f32, ref, atol=1e-4, rtol=1e-4), "f32 mismatch vs reference"

    # Default bf16 matmul operands (f32 accumulation, f32 GN stats): loose check.
    prep_bf16 = prepare_params(params)   # compute_dtype defaults to bfloat16
    out_bf16 = jax.block_until_ready(fblock_forward(x, emb, prep_bf16))
    assert jnp.allclose(out_bf16, ref, atol=5e-2, rtol=5e-2), "bf16 mismatch vs reference"

    # Case B: in_channels == out_channels -> identity skip (no skip matmul),
    # and a ragged last row-tile (N2 % tile_n != 0).
    N2, C2 = 192, 128
    x2 = jax.random.normal(kx, (N2, C2), jnp.float32)
    emb2 = jax.random.normal(ke, (N2, Cemb), jnp.float32)
    params2 = init_params(kp2, C2, C2, Cemb)
    prep2 = prepare_params(params2, compute_dtype=jnp.float32)
    out2 = jax.block_until_ready(fblock_forward(x2, emb2, prep2))
    ref2 = fblock_reference(x2, emb2, params2)
    assert out2.shape == (N2, C2)
    assert jnp.allclose(out2, ref2, atol=1e-4, rtol=1e-4), "identity-skip mismatch"

    print("KERNEL_OK")
</pallas_src>

<mosaic_0001>
module attributes {stable_mosaic.version = 11 : i64} {
  func.func @kernel(%arg0: i32, %arg1: memref<128x128xf32, #tpu.memory_space<vmem>>, %arg2: memref<128x128xf32, #tpu.memory_space<vmem>>, %arg3: memref<128x16xf32, #tpu.memory_space<vmem>>, %arg4: memref<16x128xf32, #tpu.memory_space<vmem>>, %arg5: memref<1x128xf32, #tpu.memory_space<vmem>>, %arg6: memref<128x256xf32, #tpu.memory_space<vmem>>, %arg7: memref<1x256xf32, #tpu.memory_space<vmem>>, %arg8: memref<128x256xf32, #tpu.memory_space<vmem>>, %arg9: memref<256x16xf32, #tpu.memory_space<vmem>>, %arg10: memref<16x256xf32, #tpu.memory_space<vmem>>, %arg11: memref<1x256xf32, #tpu.memory_space<vmem>>, %arg12: memref<256x256xf32, #tpu.memory_space<vmem>>, %arg13: memref<1x256xf32, #tpu.memory_space<vmem>>, %arg14: memref<128x256xf32, #tpu.memory_space<vmem>>, %arg15: memref<1x256xf32, #tpu.memory_space<vmem>>, %arg16: memref<128x256xf32, #tpu.memory_space<vmem>>) attributes {dimension_semantics = [#tpu.dimension_semantics<parallel>], iteration_bounds = array<i64: 2>, scalar_prefetch = 0 : i64, scratch_operands = 0 : i64, tpu.core_type = #tpu.core_type<tc>, window_params = [{transform_indices = @transform_0, window_bounds = array<i64: 128, 128>}, {transform_indices = @transform_1, window_bounds = array<i64: 128, 128>}, {pipeline_mode = #tpu.pipeline_mode<synchronous>, transform_indices = @transform_2, window_bounds = array<i64: 128, 16>}, {pipeline_mode = #tpu.pipeline_mode<synchronous>, transform_indices = @transform_3, window_bounds = array<i64: 16, 128>}, {pipeline_mode = #tpu.pipeline_mode<synchronous>, transform_indices = @transform_4, window_bounds = array<i64: 1, 128>}, {pipeline_mode = #tpu.pipeline_mode<synchronous>, transform_indices = @transform_5, window_bounds = array<i64: 128, 256>}, {pipeline_mode = #tpu.pipeline_mode<synchronous>, transform_indices = @transform_6, window_bounds = array<i64: 1, 256>}, {pipeline_mode = #tpu.pipeline_mode<synchronous>, transform_indices = @transform_7, window_bounds = array<i64: 128, 256>}, {pipeline_mode = #tpu.pipeline_mode<synchronous>, transform_indices = @transform_8, window_bounds = array<i64: 256, 16>}, {pipeline_mode = #tpu.pipeline_mode<synchronous>, transform_indices = @transform_9, window_bounds = array<i64: 16, 256>}, {pipeline_mode = #tpu.pipeline_mode<synchronous>, transform_indices = @transform_10, window_bounds = array<i64: 1, 256>}, {pipeline_mode = #tpu.pipeline_mode<synchronous>, transform_indices = @transform_11, window_bounds = array<i64: 256, 256>}, {pipeline_mode = #tpu.pipeline_mode<synchronous>, transform_indices = @transform_12, window_bounds = array<i64: 1, 256>}, {pipeline_mode = #tpu.pipeline_mode<synchronous>, transform_indices = @transform_13, window_bounds = array<i64: 128, 256>}, {pipeline_mode = #tpu.pipeline_mode<synchronous>, transform_indices = @transform_14, window_bounds = array<i64: 1, 256>}, {transform_indices = @transform_15, window_bounds = array<i64: 128, 256>}]} {
    %c0 = arith.constant 0 : index
    %c0_0 = arith.constant 0 : index
    %0 = vector.load %arg1[%c0, %c0_0] : memref<128x128xf32, #tpu.memory_space<vmem>>, vector<128x128xf32>
    %c0_1 = arith.constant 0 : index
    %c0_2 = arith.constant 0 : index
    %1 = vector.load %arg3[%c0_1, %c0_2] : memref<128x16xf32, #tpu.memory_space<vmem>>, vector<128x16xf32>
    %c0_3 = arith.constant 0 : index
    %c0_4 = arith.constant 0 : index
    %2 = vector.load %arg4[%c0_3, %c0_4] : memref<16x128xf32, #tpu.memory_space<vmem>>, vector<16x128xf32>
    %c0_5 = arith.constant 0 : index
    %c0_6 = arith.constant 0 : index
    %3 = vector.load %arg5[%c0_5, %c0_6] : memref<1x128xf32, #tpu.memory_space<vmem>>, vector<1x128xf32>
    %cst = arith.constant dense<0.000000e+00> : vector<128x16xf32>
    %4 = tpu.matmul %0, %1, %cst {dimension_numbers = #tpu.dot_dimension_numbers<[1], [0], [0], [1], [0, 0, 1, 1], [], []>} : vector<128x128xf32>, vector<128x16xf32>, vector<128x16xf32> -> vector<128x16xf32>
    %5 = arith.mulf %0, %0 : vector<128x128xf32>
    %cst_7 = arith.constant dense<0.000000e+00> : vector<128x16xf32>
    %6 = tpu.matmul %5, %1, %cst_7 {dimension_numbers = #tpu.dot_dimension_numbers<[1], [0], [0], [1], [0, 0, 1, 1], [], []>} : vector<128x128xf32>, vector<128x16xf32>, vector<128x16xf32> -> vector<128x16xf32>
    %7 = arith.mulf %4, %4 : vector<128x16xf32>
    %8 = arith.subf %6, %7 : vector<128x16xf32>
    %cst_8 = arith.constant 0.000000e+00 : f32
    %9 = vector.broadcast %cst_8 : f32 to vector<128x16xf32>
    %10 = arith.maximumf %8, %9 : vector<128x16xf32>
    %cst_9 = arith.constant 9.99999974E-6 : f32
    %11 = vector.broadcast %cst_9 : f32 to vector<128x16xf32>
    %12 = arith.addf %10, %11 : vector<128x16xf32>
    %13 = math.rsqrt %12 : vector<128x16xf32>
    %cst_10 = arith.constant dense<0.000000e+00> : vector<128x128xf32>
    %14 = tpu.matmul %13, %2, %cst_10 {dimension_numbers = #tpu.dot_dimension_numbers<[1], [0], [0], [1], [0, 0, 1, 1], [], []>} : vector<128x16xf32>, vector<16x128xf32>, vector<128x128xf32> -> vector<128x128xf32>
    %15 = arith.mulf %4, %13 : vector<128x16xf32>
    %cst_11 = arith.constant 0.000000e+00 : f32
    %16 = vector.broadcast %cst_11 : f32 to vector<128x16xf32>
    %17 = arith.subf %16, %15 : vector<128x16xf32>
    %cst_12 = arith.constant dense<0.000000e+00> : vector<128x128xf32>
    %18 = tpu.matmul %17, %2, %cst_12 {dimension_numbers = #tpu.dot_dimension_numbers<[1], [0], [0], [1], [0, 0, 1, 1], [], []>} : vector<128x16xf32>, vector<16x128xf32>, vector<128x128xf32> -> vector<128x128xf32>
    %19 = arith.mulf %0, %14 : vector<128x128xf32>
    %20 = arith.addf %19, %18 : vector<128x128xf32>
    %21 = vector.broadcast %3 : vector<1x128xf32> to vector<128x128xf32>
    %22 = arith.addf %20, %21 : vector<128x128xf32>
    %23 = arith.negf %22 : vector<128x128xf32>
    %24 = math.exp %23 : vector<128x128xf32>
    %cst_13 = arith.constant 1.000000e+00 : f32
    %25 = vector.broadcast %cst_13 : f32 to vector<128x128xf32>
    %26 = arith.addf %25, %24 : vector<128x128xf32>
    %27 = arith.divf %25, %26 : vector<128x128xf32>
    %28 = arith.mulf %22, %27 : vector<128x128xf32>
    %c0_14 = arith.constant 0 : index
    %c0_15 = arith.constant 0 : index
    %29 = vector.load %arg6[%c0_14, %c0_15] : memref<128x256xf32, #tpu.memory_space<vmem>>, vector<128x256xf32>
    %cst_16 = arith.constant dense<0.000000e+00> : vector<128x256xf32>
    %30 = tpu.matmul %28, %29, %cst_16 {dimension_numbers = #tpu.dot_dimension_numbers<[1], [0], [0], [1], [0, 0, 1, 1], [], []>} : vector<128x128xf32>, vector<128x256xf32>, vector<128x256xf32> -> vector<128x256xf32>
    %c0_17 = arith.constant 0 : index
    %c0_18 = arith.constant 0 : index
    %31 = vector.load %arg2[%c0_17, %c0_18] : memref<128x128xf32, #tpu.memory_space<vmem>>, vector<128x128xf32>
    %c0_19 = arith.constant 0 : index
    %c0_20 = arith.constant 0 : index
    %32 = vector.load %arg8[%c0_19, %c0_20] : memref<128x256xf32, #tpu.memory_space<vmem>>, vector<128x256xf32>
    %cst_21 = arith.constant dense<0.000000e+00> : vector<128x256xf32>
    %33 = tpu.matmul %31, %32, %cst_21 {dimension_numbers = #tpu.dot_dimension_numbers<[1], [0], [0], [1], [0, 0, 1, 1], [], []>} : vector<128x128xf32>, vector<128x256xf32>, vector<128x256xf32> -> vector<128x256xf32>
    %34 = arith.addf %30, %33 : vector<128x256xf32>
    %c0_22 = arith.constant 0 : index
    %c0_23 = arith.constant 0 : index
    %35 = vector.load %arg7[%c0_22, %c0_23] : memref<1x256xf32, #tpu.memory_space<vmem>>, vector<1x256xf32>
    %36 = vector.broadcast %35 : vector<1x256xf32> to vector<128x256xf32>
    %37 = arith.addf %34, %36 : vector<128x256xf32>
    %c0_24 = arith.constant 0 : index
    %c0_25 = arith.constant 0 : index
    %38 = vector.load %arg9[%c0_24, %c0_25] : memref<256x16xf32, #tpu.memory_space<vmem>>, vector<256x16xf32>
    %c0_26 = arith.constant 0 : index
    %c0_27 = arith.constant 0 : index
    %39 = vector.load %arg10[%c0_26, %c0_27] : memref<16x256xf32, #tpu.memory_space<vmem>>, vector<16x256xf32>
    %c0_28 = arith.constant 0 : index
    %c0_29 = arith.constant 0 : index
    %40 = vector.load %arg11[%c0_28, %c0_29] : memref<1x256xf32, #tpu.memory_space<vmem>>, vector<1x256xf32>
    %cst_30 = arith.constant dense<0.000000e+00> : vector<128x16xf32>
    %41 = tpu.matmul %37, %38, %cst_30 {dimension_numbers = #tpu.dot_dimension_numbers<[1], [0], [0], [1], [0, 0, 1, 1], [], []>} : vector<128x256xf32>, vector<256x16xf32>, vector<128x16xf32> -> vector<128x16xf32>
    %42 = arith.mulf %37, %37 : vector<128x256xf32>
    %cst_31 = arith.constant dense<0.000000e+00> : vector<128x16xf32>
    %43 = tpu.matmul %42, %38, %cst_31 {dimension_numbers = #tpu.dot_dimension_numbers<[1], [0], [0], [1], [0, 0, 1, 1], [], []>} : vector<128x256xf32>, vector<256x16xf32>, vector<128x16xf32> -> vector<128x16xf32>
    %44 = arith.mulf %41, %41 : vector<128x16xf32>
    %45 = arith.subf %43, %44 : vector<128x16xf32>
    %cst_32 = arith.constant 0.000000e+00 : f32
    %46 = vector.broadcast %cst_32 : f32 to vector<128x16xf32>
    %47 = arith.maximumf %45, %46 : vector<128x16xf32>
    %cst_33 = arith.constant 9.99999974E-6 : f32
    %48 = vector.broadcast %cst_33 : f32 to vector<128x16xf32>
    %49 = arith.addf %47, %48 : vector<128x16xf32>
    %50 = math.rsqrt %49 : vector<128x16xf32>
    %cst_34 = arith.constant dense<0.000000e+00> : vector<128x256xf32>
    %51 = tpu.matmul %50, %39, %cst_34 {dimension_numbers = #tpu.dot_dimension_numbers<[1], [0], [0], [1], [0, 0, 1, 1], [], []>} : vector<128x16xf32>, vector<16x256xf32>, vector<128x256xf32> -> vector<128x256xf32>
    %52 = arith.mulf %41, %50 : vector<128x16xf32>
    %cst_35 = arith.constant 0.000000e+00 : f32
    %53 = vector.broadcast %cst_35 : f32 to vector<128x16xf32>
    %54 = arith.subf %53, %52 : vector<128x16xf32>
    %cst_36 = arith.constant dense<0.000000e+00> : vector<128x256xf32>
    %55 = tpu.matmul %54, %39, %cst_36 {dimension_numbers = #tpu.dot_dimension_numbers<[1], [0], [0], [1], [0, 0, 1, 1], [], []>} : vector<128x16xf32>, vector<16x256xf32>, vector<128x256xf32> -> vector<128x256xf32>
    %56 = arith.mulf %37, %51 : vector<128x256xf32>
    %57 = arith.addf %56, %55 : vector<128x256xf32>
    %58 = vector.broadcast %40 : vector<1x256xf32> to vector<128x256xf32>
    %59 = arith.addf %57, %58 : vector<128x256xf32>
    %60 = arith.negf %59 : vector<128x256xf32>
    %61 = math.exp %60 : vector<128x256xf32>
    %cst_37 = arith.constant 1.000000e+00 : f32
    %62 = vector.broadcast %cst_37 : f32 to vector<128x256xf32>
    %63 = arith.addf %62, %61 : vector<128x256xf32>
    %64 = arith.divf %62, %63 : vector<128x256xf32>
    %65 = arith.mulf %59, %64 : vector<128x256xf32>
    %c0_38 = arith.constant 0 : index
    %c0_39 = arith.constant 0 : index
    %66 = vector.load %arg12[%c0_38, %c0_39] : memref<256x256xf32, #tpu.memory_space<vmem>>, vector<256x256xf32>
    %cst_40 = arith.constant dense<0.000000e+00> : vector<128x256xf32>
    %67 = tpu.matmul %65, %66, %cst_40 {dimension_numbers = #tpu.dot_dimension_numbers<[1], [0], [0], [1], [0, 0, 1, 1], [], []>} : vector<128x256xf32>, vector<256x256xf32>, vector<128x256xf32> -> vector<128x256xf32>
    %c0_41 = arith.constant 0 : index
    %c0_42 = arith.constant 0 : index
    %68 = vector.load %arg13[%c0_41, %c0_42] : memref<1x256xf32, #tpu.memory_space<vmem>>, vector<1x256xf32>
    %69 = vector.broadcast %68 : vector<1x256xf32> to vector<128x256xf32>
    %70 = arith.addf %67, %69 : vector<128x256xf32>
    %c0_43 = arith.constant 0 : index
    %c0_44 = arith.constant 0 : index
    %71 = vector.load %arg14[%c0_43, %c0_44] : memref<128x256xf32, #tpu.memory_space<vmem>>, vector<128x256xf32>
    %cst_45 = arith.constant dense<0.000000e+00> : vector<128x256xf32>
    %72 = tpu.matmul %0, %71, %cst_45 {dimension_numbers = #tpu.dot_dimension_numbers<[1], [0], [0], [1], [0, 0, 1, 1], [], []>} : vector<128x128xf32>, vector<128x256xf32>, vector<128x256xf32> -> vector<128x256xf32>
    %c0_46 = arith.constant 0 : index
    %c0_47 = arith.constant 0 : index
    %73 = vector.load %arg15[%c0_46, %c0_47] : memref<1x256xf32, #tpu.memory_space<vmem>>, vector<1x256xf32>
    %74 = vector.broadcast %73 : vector<1x256xf32> to vector<128x256xf32>
    %75 = arith.addf %72, %74 : vector<128x256xf32>
    %76 = arith.addf %70, %75 : vector<128x256xf32>
    %cst_48 = arith.constant 0.707106769 : f32
    %77 = vector.broadcast %cst_48 : f32 to vector<128x256xf32>
    %78 = arith.mulf %76, %77 : vector<128x256xf32>
    %c0_49 = arith.constant 0 : index
    %c0_50 = arith.constant 0 : index
    %79 = vector.load %arg16[%c0_49, %c0_50] : memref<128x256xf32, #tpu.memory_space<vmem>>, vector<128x256xf32>
    tpu.vector_store %arg16[%c0_49, %c0_50], %78 {strides = array<i32>} : memref<128x256xf32, #tpu.memory_space<vmem>>, vector<128x256xf32>,
    return
  }
  func.func @transform_0(%arg0: i32) -> (i32, i32) {
    %c0_i32 = arith.constant 0 : i32
    %c0_i32_0 = arith.constant 0 : i32
    return %arg0, %c0_i32 : i32, i32
  }
  func.func @transform_1(%arg0: i32) -> (i32, i32) {
    %c0_i32 = arith.constant 0 : i32
    %c0_i32_0 = arith.constant 0 : i32
    return %arg0, %c0_i32 : i32, i32
  }
  func.func @transform_2(%arg0: i32) -> (i32, i32) {
    %c0_i32 = arith.constant 0 : i32
    %c0_i32_0 = arith.constant 0 : i32
    %c0_i32_1 = arith.constant 0 : i32
    return %c0_i32, %c0_i32_0 : i32, i32
  }
  func.func @transform_3(%arg0: i32) -> (i32, i32) {
    %c0_i32 = arith.constant 0 : i32
    %c0_i32_0 = arith.constant 0 : i32
    %c0_i32_1 = arith.constant 0 : i32
    return %c0_i32, %c0_i32_0 : i32, i32
  }
  func.func @transform_4(%arg0: i32) -> (i32, i32) {
    %c0_i32 = arith.constant 0 : i32
    %c0_i32_0 = arith.constant 0 : i32
    %c0_i32_1 = arith.constant 0 : i32
    return %c0_i32, %c0_i32_0 : i32, i32
  }
  func.func @transform_5(%arg0: i32) -> (i32, i32) {
    %c0_i32 = arith.constant 0 : i32
    %c0_i32_0 = arith.constant 0 : i32
    %c0_i32_1 = arith.constant 0 : i32
    return %c0_i32, %c0_i32_0 : i32, i32
  }
  func.func @transform_6(%arg0: i32) -> (i32, i32) {
    %c0_i32 = arith.constant 0 : i32
    %c0_i32_0 = arith.constant 0 : i32
    %c0_i32_1 = arith.constant 0 : i32
    return %c0_i32, %c0_i32_0 : i32, i32
  }
  func.func @transform_7(%arg0: i32) -> (i32, i32) {
    %c0_i32 = arith.constant 0 : i32
    %c0_i32_0 = arith.constant 0 : i32
    %c0_i32_1 = arith.constant 0 : i32
    return %c0_i32, %c0_i32_0 : i32, i32
  }
  func.func @transform_8(%arg0: i32) -> (i32, i32) {
    %c0_i32 = arith.constant 0 : i32
    %c0_i32_0 = arith.constant 0 : i32
    %c0_i32_1 = arith.constant 0 : i32
    return %c0_i32, %c0_i32_0 : i32, i32
  }
  func.func @transform_9(%arg0: i32) -> (i32, i32) {
    %c0_i32 = arith.constant 0 : i32
    %c0_i32_0 = arith.constant 0 : i32
    %c0_i32_1 = arith.constant 0 : i32
    return %c0_i32, %c0_i32_0 : i32, i32
  }
  func.func @transform_10(%arg0: i32) -> (i32, i32) {
    %c0_i32 = arith.constant 0 : i32
    %c0_i32_0 = arith.constant 0 : i32
    %c0_i32_1 = arith.constant 0 : i32
    return %c0_i32, %c0_i32_0 : i32, i32
  }
  func.func @transform_11(%arg0: i32) -> (i32, i32) {
    %c0_i32 = arith.constant 0 : i32
    %c0_i32_0 = arith.constant 0 : i32
    %c0_i32_1 = arith.constant 0 : i32
    return %c0_i32, %c0_i32_0 : i32, i32
  }
  func.func @transform_12(%arg0: i32) -> (i32, i32) {
    %c0_i32 = arith.constant 0 : i32
    %c0_i32_0 = arith.constant 0 : i32
    %c0_i32_1 = arith.constant 0 : i32
    return %c0_i32, %c0_i32_0 : i32, i32
  }
  func.func @transform_13(%arg0: i32) -> (i32, i32) {
    %c0_i32 = arith.constant 0 : i32
    %c0_i32_0 = arith.constant 0 : i32
    %c0_i32_1 = arith.constant 0 : i32
    return %c0_i32, %c0_i32_0 : i32, i32
  }
  func.func @transform_14(%arg0: i32) -> (i32, i32) {
    %c0_i32 = arith.constant 0 : i32
    %c0_i32_0 = arith.constant 0 : i32
    %c0_i32_1 = arith.constant 0 : i32
    return %c0_i32, %c0_i32_0 : i32, i32
  }
  func.func @transform_15(%arg0: i32) -> (i32, i32) {
    %c0_i32 = arith.constant 0 : i32
    %c0_i32_0 = arith.constant 0 : i32
    return %arg0, %c0_i32 : i32, i32
  }
}

</mosaic_0001>

<bundles_post_ra>
// kernel: tpu_custom_call.1
= control target key start
LH: loop header
LB: loop body
LE: loop exit
PB: predicated region body
PF: predicated region fallthrough
CT: control target
= control target key end

     0   :  { %s6760_s0 = inlined_call_operand.vmem [shape: f32[256,128], index: 0, kind: input, shape index: {}]   ;;  %s6761_s1 = inlined_call_operand.hbm [shape: f32[256,128], index: 1, kind: input, shape index: {}]   ;;  %s6762_s2 = inlined_call_operand.vmem [shape: f32[128,16], index: 2, kind: input, shape index: {}]   ;;  %s6763_s3 = inlined_call_operand.vmem [shape: f32[16,128], index: 3, kind: input, shape index: {}]   ;;  %s6764_s4 = inlined_call_operand.vmem [shape: f32[1,128], index: 4, kind: input, shape index: {}]   ;;  %s6765_s5 = inlined_call_operand.hbm [shape: f32[128,256], index: 5, kind: input, shape index: {}]   ;;  %s6766_s6 = inlined_call_operand.vmem [shape: f32[1,256], index: 6, kind: input, shape index: {}]   ;;  %s6767_s7 = inlined_call_operand.hbm [shape: f32[128,256], index: 7, kind: input, shape index: {}]   ;;  %s6768_s8 = inlined_call_operand.vmem [shape: f32[256,16], index: 8, kind: input, shape index: {}]   ;;  %s6769_s9 = inlined_call_operand.vmem [shape: f32[16,256], index: 9, kind: input, shape index: {}]   ;;  %s6770_s10 = inlined_call_operand.vmem [shape: f32[1,256], index: 10, kind: input, shape index: {}]   ;;  %s6771_s11 = inlined_call_operand.hbm [shape: f32[256,256], index: 11, kind: input, shape index: {}]   ;;  %s6772_s12 = inlined_call_operand.vmem [shape: f32[1,256], index: 12, kind: input, shape index: {}]   ;;  %s6773_s13 = inlined_call_operand.hbm [shape: f32[128,256], index: 13, kind: input, shape index: {}]   ;;  %s6774_s14 = inlined_call_operand.vmem [shape: f32[1,256], index: 14, kind: input, shape index: {}]   ;;  %s6775_s15 = inlined_call_operand.hbm [shape: f32[256,256], index: 15, kind: output, shape index: {}]  }
   0x1   :  { %6783 = sst [smem:[#allocation19_spill]] %s6765_s5 }
   0x2   :  { %6784 = sst [smem:[#allocation20_spill]] %s6767_s7 }
   0x3   :  { %6785 = sst [smem:[#allocation21_spill]] %s6771_s11 }
   0x4   :  { %6786 = sst [smem:[#allocation22_spill]] %s6772_s12 }
   0x5   :  { %6787 = sst [smem:[#allocation23_spill]] %s6773_s13 }
   0x6   :  { %6788 = sst [smem:[#allocation24_spill]] %s6775_s15 }
   0x7   :  { %20 = vsyncpa [#allocation3], 0 }
   0x8   :  { %22 = vsyncpa [#allocation3 + $0x1], 0 }
   0x9   :  { %23 = vsyncpa [#allocation6], 0 }
   0xa   :  { %24 = vsyncpa [#allocation9], 0 }
   0xb   :  { %25 = vsyncpa [#allocation4], 0 }
   0xc   :  { %27 = vsyncpa [#allocation4 + $0x1], 0  ;;  %s5190_s18 = smov 0   ;;  %s5192_s19 = smov 0  }
   0xd   :  { %s5194_s20 = smov 0   ;;  %s5196_s21 = smov 0  }
   0xe LB: > { %6789 = sst [smem:[#allocation16_spill]] %s5083_s18  ;;  %s5211_s22 = sadd.s32 4294967295, %s5095_s21   ;;  %s5095_s21 = sphi %s5196_s21, %s6820_s21   ;;  %s5091_s20 = sphi %s5194_s20, %s6819_s20   ;;  %s5087_s19 = sphi %s5192_s19, %s6818_s19   ;;  %s5083_s18 = sphi %s5190_s18, %s6817_s18  }
   0xf   : > { %s3943_s23 = sadd.s32 4294967294, %s5095_s21   ;;  %p79_p0 = scmp.ne.s32.totalorder %s5087_s19, %s5083_s18 }
  0x10   : > { %p6779_p1 = scmp.eq.s32.totalorder %s5211_s22, 0  ;;  %p376_p2 = scmp.eq.s32.totalorder %s5211_s22, 1 }
  0x11   : > { %p382_p3 = scmp.eq.s32.totalorder %s3943_s23, 1  ;;  %p3944_p5 = scmp.ge.s32.totalorder %s5095_s21, 1 }
  0x12   : > { %p5220_p4 = por %p6779_p1, %p79_p0  ;;  %p389_p7 = scmp.lt.s32.totalorder %s5095_s21, 3 }
  0x13   : > { %p5225_p6 = por %p382_p3, %p79_p0  ;;  %s5097_s27 = smov [#allocation5]  }
  0x14   : > { %s6790_s24 = scalar_select %p5220_p4, 1, 0 }
  0x15   : > { %s6791_s25 = scalar_select %p5225_p6, 1, 0 }
  0x16   : > { %p5230_p8 = pnand %p3944_p5, %p389_p7  ;;  %s410_s28 = sshll.u32 %s5097_s27, 4  ;;  %s411_s28 = int_to_ptr.vmem [resolvable:$true] %s410_s28 }
  0x17   : > { %6792 = sst [smem:[#allocation17_spill]] %s6791_s25  ;;  %s5098_s30 = smov [#allocation8]  }
  0x18   : > { %s6793_s26 = scalar_select %p5230_p8, 1, 0 }
  0x19   : > { %p4532_p9 = pneg %p5230_p8  ;;  %s448_s16 = sshll.u32 %s5098_s30, 4  ;;  %s449_s16 = int_to_ptr.vmem [resolvable:$true] %s448_s16 }
  0x1a   : > { %s5099_s17 = smov [#allocation7]   ;;  %s4902_s25 = scalar_lea.vmem %s411_s28, 4096 }
  0x1b   : > { %p5239_p11 = pnand %p4532_p9, %p6779_p1  ;;  %s426_s23 = sshll.u32 %s5099_s17, 4  ;;  %s427_s23 = int_to_ptr.vmem [resolvable:$true] %s426_s23 }
  0x1c   : > { %p4903_p13 = scmp.ne.s32.totalorder %s411_s28, %s4902_s25  ;;  %p4910_p5 = scmp.lt.s32.totalorder %s411_s28, %s411_s28 }
  0x1d   : > { %p4893_p12 = pneg %p5239_p11  ;;  %p4911_p7 = scmp.lt.s32.totalorder %s4902_s25, %s4902_s25 }
  0x1f   : > { %p4905_p0 = pnand %p4903_p13, %p4893_p12  ;;  %p4912_p9 = por %p4911_p7, %p4910_p5 }
  0x21   : > { %p4906_p3 = pneg %p4905_p0 }
  0x23   : > { %p4913_p10 = pnand %p4912_p9, %p4906_p3 }
  0x25   : > { %4916 = shalt.err (!%p4913_p10)
}
  0x26   : > { %s5100_s27 = smov 256   ;;  %s5101_s30 = smov 16  }
  0x27   : > { %s6795_s5 = sld [smem:[#allocation19_spill]]  ;;  %s4928_s15 = scalar_lea.vmem %s449_s16, 8192 }
  0x28   : > { %p4929_p13 = scmp.ne.s32.totalorder %s449_s16, %s4928_s15  ;;  %p4936_p3 = scmp.lt.s32.totalorder %s449_s16, %s449_s16 }
  0x29   : > { %p4937_p10 = scmp.lt.s32.totalorder %s4928_s15, %s4928_s15 }
  0x2a   : > { %p4931_p0 = pnand %p4929_p13, %p4893_p12 }
  0x2b   : > { %p4938_p7 = por %p4937_p10, %p4936_p3 }
  0x2c   : > { %p4932_p5 = pneg %p4931_p0 }
  0x2d   : > { %4535 = dma.hbm_to_vmem [thread:$0]  (!%p5239_p11), %s6795_s5, 4096, %s411_s28, [#allocation6], %s5100_s27, %s5100_s27, %s5101_s30  }
  0x2e   : > { %p4939_p9 = pnand %p4938_p7, %p4932_p5 }
  0x30   : > { %4942 = shalt.err (!%p4939_p9)
}
  0x31   : > { %s6796_s11 = sld [smem:[#allocation21_spill]]  ;;  %s4954_s18 = scalar_lea.vmem %s427_s23, 4096 }
  0x32   : > { %p4955_p1 = scmp.ne.s32.totalorder %s427_s23, %s4954_s18  ;;  %p4962_p3 = scmp.lt.s32.totalorder %s427_s23, %s427_s23 }
  0x33   : > { %p4963_p5 = scmp.lt.s32.totalorder %s4954_s18, %s4954_s18 }
  0x34   : > { %p4957_p13 = pnand %p4955_p1, %p4893_p12 }
  0x35   : > { %p4964_p10 = por %p4963_p5, %p4962_p3 }
  0x36   : > { %p4958_p0 = pneg %p4957_p13 }
  0x37   : > { %4541 = dma.hbm_to_vmem [thread:$0]  (!%p5239_p11), %s6796_s11, 8192, %s449_s16, [#allocation9], %s5100_s27, %s5100_s27, %s5101_s30  }
  0x38   : > { %p4965_p7 = pnand %p4964_p10, %p4958_p0 }
  0x3a   : > { %4968 = shalt.err (!%p4965_p7)
}
  0x3b   : > { %s6797_s7 = sld [smem:[#allocation20_spill]]  ;;  %s5102_s28 = smov [#allocation10]  }
  0x3c   : > { %s464_s16 = sshll.u32 %s5102_s28, 4  ;;  %s465_s16 = int_to_ptr.vmem [resolvable:$true] %s464_s16 }
  0x3d   : > { %s4980_s17 = scalar_lea.vmem %s465_s16, 4096  ;;  %p4988_p0 = scmp.lt.s32.totalorder %s465_s16, %s465_s16 }
  0x3e   : > { %p4981_p1 = scmp.ne.s32.totalorder %s465_s16, %s4980_s17  ;;  %p4989_p3 = scmp.lt.s32.totalorder %s4980_s17, %s4980_s17 }
  0x40   : > { %p4983_p9 = pnand %p4981_p1, %p4893_p12  ;;  %p4990_p5 = por %p4989_p3, %p4988_p0 }
  0x41   : > { %4538 = dma.hbm_to_vmem [thread:$0]  (!%p5239_p11), %s6797_s7, 4096, %s427_s23, [#allocation6], %s5100_s27, %s5100_s27, %s5101_s30  }
  0x42   : > { %p4984_p13 = pneg %p4983_p9 }
  0x44   : > { %p4991_p10 = pnand %p4990_p5, %p4984_p13 }
  0x46   : > { %4994 = shalt.err (!%p4991_p10)
}
  0x47   : > { %s6798_s13 = sld [smem:[#allocation23_spill]]  ;;  %s5290_s18 = sadd.s32 1, %s5095_s21  }
  0x48   : > { %s66_s29 = sadd.s32 1, %s5091_s20  ;;  %s63_s12 = ssub.s32 %s5095_s21, %s5290_s18 }
  0x49   : > { %p73_p12 = scmp.ne.s32.totalorder %s5091_s20, %s5087_s19  ;;  %p64_p7 = scmp.eq.s32.totalorder %s63_s12, 0 }
  0x4a   : > { %p74_p1 = scmp.eq.s32.totalorder %s5095_s21, 0  ;;  %p4557_p13 = scmp.lt.s32.totalorder %s5095_s21, 2 }
  0x4b   : > { %p5300_p9 = por %p376_p2, %p73_p12  ;;  %s490_s17 = sand.u32 1, %s5091_s20  }
  0x4c   : > { %s5306_s28 = scalar_select %p64_p7, %s5091_s20, %s66_s29  }
  0x4d   : > { %4544 = dma.hbm_to_vmem [thread:$0]  (!%p5239_p11), %s6798_s13, 4096, %s465_s16, [#allocation9], %s5100_s27, %s5100_s27, %s5101_s30  }
  0x4e   : > { %s6799_s15 = scalar_select %p5300_p9, 1, 0 }
  0x4f   : > { %6800 = sst [smem:[#allocation18_spill]] %s5306_s28  ;;  %p75_p0 = por %p74_p1, %p73_p12 }
  0x50   : > { %s3950_s23 = sshll.u32 %s490_s17, 7  ;;  %s4081_s27 = sshll.u32 %s5095_s21, 11 }
  0x51   : > { %s5313_s25 = scalar_lea.hbm %s6761_s1, %s4081_s27  ;;  %s494_s12 = scalar_lea.vmem [#allocation2], %s3950_s23 }
  0x52   : > { %s501_s5 = sshll.u32 %s494_s12, 4  ;;  %p5317_p2 = pnand %p4557_p13, %p75_p0  ;;  %s5315_s5 = int_to_ptr.vmem [resolvable:$true] %s501_s5 }
  0x53   : > { %s5321_s29 = scalar_lea.sflag [#allocation3], %s490_s17  ;;  %s4995_s11 = scalar_lea.hbm %s5313_s25, 2048 }
  0x54   : > { %p4996_p11 = scmp.ne.s32.totalorder %s5313_s25, %s4995_s11  ;;  %p4997_p3 = pneg %p5317_p2 }
  0x55   : > { %s5000_s23 = scalar_lea.hbm %s6761_s1, 4096  ;;  %p5001_p12 = scmp.lt.s32.totalorder %s5313_s25, %s6761_s1 }
  0x56   : > { %p4998_p5 = pnand %p4997_p3, %p4996_p11  ;;  %p5002_p7 = scmp.lt.s32.totalorder %s5000_s23, %s4995_s11 }
  0x58   : > { %p4999_p10 = pneg %p4998_p5  ;;  %p5003_p1 = por %p5002_p7, %p5001_p12 }
  0x5a   : > { %p5004_p13 = pnand %p5003_p1, %p4999_p10 }
  0x5c   : > { %5007 = shalt.err (!%p5004_p13)
}
  0x5d   : > { %s5008_s17 = scalar_lea.vmem %s5315_s5, 2048  ;;  %s5103_s13 = smov [#allocation2]  }
  0x5e   : > { %p5009_p0 = scmp.ne.s32.totalorder %s5315_s5, %s5008_s17  ;;  %s5013_s28 = sshll.u32 %s5103_s13, 4  ;;  %s5014_s28 = int_to_ptr.vmem [resolvable:$false] %s5013_s28 }
  0x5f   : > { %s5015_s27 = scalar_lea.vmem %s5014_s28, 4096  ;;  %p5016_p5 = scmp.lt.s32.totalorder %s5315_s5, %s5014_s28 }
  0x60   : > { %p5011_p6 = pnand %p5009_p0, %p4997_p3  ;;  %p5017_p9 = scmp.lt.s32.totalorder %s5015_s27, %s5008_s17 }
  0x62   : > { %p5012_p11 = pneg %p5011_p6  ;;  %p5018_p4 = por %p5017_p9, %p5016_p5 }
  0x64   : > { %p5019_p8 = pnand %p5018_p4, %p5012_p11 }
  0x66   : > { %5022 = shalt.err (!%p5019_p8)
}
  0x67   : > { %s5104_s11 = smov 128   ;;  %s5105_s30 = smov 8  }
  0x68   : > { %4548 = dma.hbm_to_vmem [thread:$0]  (!%p5317_p2), %s5313_s25, 2048, %s5315_s5, %s5321_s29, %s5104_s11, %s5104_s11, %s5105_s30  }
  0x69   : > { %p6802_p3 = scmp.ne.s32.totalorder %s6793_s26, 0 }
  0x6a   : > { %s5345_s13 = sand.u32 (!%p6802_p3), 1, %s5087_s19   ;;  %p6803_p4 = scmp.ne.s32.totalorder (!%p6802_p3), %s6790_s24, 0 }
  0x6b   : > { %513 = sbr.rel (%p6802_p3) target bundleno = 1545 (0x609), region = 80  ;;  %s3954_s28 = sshll.u32 (!%p6802_p3), %s5345_s13, 7 }
  0x6c   : > { %s516_s23 = scalar_lea.sflag (!%p6802_p3), [#allocation3], %s5345_s13  ;;  %s5349_s16 = scalar_lea.vmem (!%p6802_p3), [#allocation2], %s3954_s28 }
  0x70   : > { %5066 = dma.done.wait (%p6803_p4), %s516_s23, 2048  }
  0x71   : > { %5068 = vsyncadd (%p6803_p4), %s516_s23, 4294965248  ;;  %p6804_p6 = scmp.eq.s32.totalorder %s5211_s22, 0 }
  0x73   : > { %5070 = dma.done.wait (%p6804_p6), [#allocation6], 8192   ;;  %p6805_p8 = pmov %p6804_p6 }
  0x74   : > { %p6806_p9 = pmov %p6804_p6 }
  0x75   : > { %5072 = vsyncadd (%p6805_p8), [#allocation6], 4294959104 }
  0x76   : > { %5074 = dma.done.wait (%p6806_p9), [#allocation9], 12288   ;;  %p6807_p2 = pmov %p6804_p6 }
  0x77   : > { %v626_v0 = vld [vmem:[%s6762_s2 + $0x78] sm:$0xff]  ;;  %v625_v1 = vld [vmem:[%s6762_s2 + $0x70] sm:$0xff]  ;;  %v624_v2 = vld [vmem:[%s6762_s2 + $0x68] sm:$0xff]  ;;  %s3960_s23 = sshll.u32 %s5211_s22, 4  ;;  %vm1016_vm0 = vcmask 130048   ;;  %s6808_s12 = sld [smem:[#allocation22_spill]] }
  0x78   : > { %5076 = vsyncadd (%p6807_p2), [#allocation9], 4294955008  ;;  %4344 = vmatprep.subr.mxu0 %v626_v0  ;;  %4400 = vmatprep.subr.mxu1 %v626_v0  ;;  %v623_v3 = vld [vmem:[%s6762_s2 + $0x60] sm:$0xff]  ;;  %v622_v4 = vld [vmem:[%s6762_s2 + $0x58] sm:$0xff]  ;;  %p588_p10 = scmp.lt.s32.totalorder %s3960_s23, 31  ;;  %s3959_s17 = sshll.u32 %s5345_s13, 8 }
  0x79   : > { %4345 = vmatpush3.msra.mxu0 %v626_v0  ;;  %4401 = vmatpush3.msra.mxu1 %v626_v0  ;;  %v621_v5 = vld [vmem:[%s6762_s2 + $0x50] sm:$0xff]  ;;  %v620_v6 = vld [vmem:[%s6762_s2 + $0x48] sm:$0xff]  ;;  %v619_v7 = vld [vmem:[%s6762_s2 + $0x40] sm:$0xff]  ;;  %s6597_s27 = scalar_lea.vmem [#allocation11], %s3959_s17  ;;  %s4083_s11 = sshll.u32 %s5211_s22, 12 }
  0x7a   : > { %4346 = vmatprep.subr.mxu0 %v625_v1  ;;  %4402 = vmatprep.subr.mxu1 %v625_v1  ;;  %v618_v8 = vld [vmem:[%s6762_s2 + $0x38] sm:$0xff]  ;;  %v617_v9 = vld [vmem:[%s6762_s2 + $0x30] sm:$0xff]  ;;  %s6822_s23 = smov (!%p588_p10, %s3960_s23), 31  ;;  %v616_v10 = vld [vmem:[%s6762_s2 + $0x28] sm:$0xff]  ;;  %s3820_s30 = sshll.u32 %s6597_s27, 4  ;;  %s6715_s30 = int_to_ptr.vmem [resolvable:$true] %s3820_s30 }
  0x7b   : > { %4347 = vmatpush3.msra.mxu0 %v625_v1  ;;  %4403 = vmatpush3.msra.mxu1 %v625_v1  ;;  %v615_v11 = vld [vmem:[%s6762_s2 + $0x20] sm:$0xff]  ;;  %s3961_s5 = sshll.u32 %s6822_s23, 3  ;;  %v614_v12 = vld [vmem:[%s6762_s2 + $0x18] sm:$0xff]  ;;  %v613_v13 = vld [vmem:[%s6762_s2 + $0x10] sm:$0xff]  ;;  %s3806_s26 = scalar_lea.sflag [#allocation4], %s5345_s13 }
  0x7c   : > { %4348 = vmatprep.subr.mxu0 %v624_v2  ;;  %4404 = vmatprep.subr.mxu1 %v624_v2  ;;  %s5406_s29 = scalar_lea.vmem %s6760_s0, %s3961_s5  ;;  %v612_v14 = vld [vmem:[%s6762_s2 + $0x8] sm:$0xff]  ;;  %v611_v17 = vld [vmem:[%s6762_s2] sm:$0xff]  ;;  %s6809_s5 = sld [smem:[#allocation24_spill]] }
  0x7d   : > { %4349 = vmatpush3.msra.mxu0 %v624_v2  ;;  %4405 = vmatpush3.msra.mxu1 %v624_v2  ;;  %v595_v15 = vld [vmem:[%s5406_s29] sm:$0xff]  ;;  %v5416_v16 = vld [vmem:[%s5406_s29 + $0x8] sm:$0xff]  ;;  %v597_v18 = vld [vmem:[%s5406_s29 + $0x10] sm:$0xff]  ;;  %p6810_p7 = scmp.ne.s32.totalorder %s6799_s15, 0  ;;  %s5107_s22 = smov [#allocation11]  }
  0x7e   : > { %4350 = vmatprep.subr.mxu0 %v623_v3  ;;  %4406 = vmatprep.subr.mxu1 %v623_v3  ;;  %v775_v19 = vmul.f32 %v595_v15, %v595_v15  ;;  %v776_v20 = vmul.f32 %v5416_v16, %v5416_v16  ;;  %v5425_v21 = vld [vmem:[%s5406_s29 + $0x18] sm:$0xff]  ;;  %v777_v22 = vmul.f32 %v597_v18, %v597_v18  ;;  %v599_v23 = vld [vmem:[%s5406_s29 + $0x20] sm:$0xff]  ;;  %v628_v24 = vld [vmem:[%s6763_s3 + $0x8] sm:$0xff]  ;;  %s5027_s25 = sshll.u32 %s5107_s22, 4  ;;  %s5028_s25 = int_to_ptr.vmem [resolvable:$false] %s5027_s25 }
  0x7f   : > { %4351 = vmatpush3.msra.mxu0 %v623_v3  ;;  %4407 = vmatpush3.msra.mxu1 %v623_v3  ;;  %v778_v25 = vmul.f32 %v5425_v21, %v5425_v21  ;;  %v5435_v26 = vld [vmem:[%s5406_s29 + $0x28] sm:$0xff]  ;;  %v779_v27 = vmul.f32 %v599_v23, %v599_v23  ;;  %v601_v28 = vld [vmem:[%s5406_s29 + $0x30] sm:$0xff]  ;;  %v602_v30 = vld [vmem:[%s5406_s29 + $0x38] sm:$0xff]  ;;  %s5029_s24 = scalar_lea.vmem %s5028_s25, 8192  ;;  %p5030_p0 = scmp.lt.s32.totalorder %s6715_s30, %s5028_s25 }
  0x80   : > { %4352 = vmatprep.subr.mxu0 %v622_v4  ;;  %4408 = vmatprep.subr.mxu1 %v622_v4  ;;  %v780_v29 = vmul.f32 %v5435_v26, %v5435_v26  ;;  %v781_v31 = vmul.f32 %v601_v28, %v601_v28  ;;  %v603_v32 = vld [vmem:[%s5406_s29 + $0x40] sm:$0xff]  ;;  %v782_v33 = vmul.f32 %v602_v30, %v602_v30  ;;  %v604_v34 = vld [vmem:[%s5406_s29 + $0x48] sm:$0xff]  ;;  %v605_v36 = vld [vmem:[%s5406_s29 + $0x50] sm:$0xff] }
  0x81   : > { %4353 = vmatpush3.msra.mxu0 %v622_v4  ;;  %4409 = vmatpush3.msra.mxu1 %v622_v4  ;;  %v783_v35 = vmul.f32 %v603_v32, %v603_v32  ;;  %v784_v37 = vmul.f32 %v604_v34, %v604_v34  ;;  %v606_v38 = vld [vmem:[%s5406_s29 + $0x58] sm:$0xff]  ;;  %v785_v39 = vmul.f32 %v605_v36, %v605_v36  ;;  %v607_v40 = vld [vmem:[%s5406_s29 + $0x60] sm:$0xff]  ;;  %v608_v42 = vld [vmem:[%s5406_s29 + $0x68] sm:$0xff] }
  0x82   : > { %4354 = vmatprep.subr.mxu0 %v621_v5  ;;  %4410 = vmatprep.subr.mxu1 %v621_v5  ;;  %v786_v41 = vmul.f32 %v606_v38, %v606_v38  ;;  %v787_v43 = vmul.f32 %v607_v40, %v607_v40  ;;  %v609_v44 = vld [vmem:[%s5406_s29 + $0x70] sm:$0xff]  ;;  %v788_v45 = vmul.f32 %v608_v42, %v608_v42  ;;  %v610_v46 = vld [vmem:[%s5406_s29 + $0x78] sm:$0xff]  ;;  %v627_v49 = vld [vmem:[%s6763_s3] sm:$0xff]  ;;  %s6713_s7 = scalar_lea.hbm %s6809_s5, %s4083_s11 }
  0x83   : > { %4355 = vmatpush3.msra.mxu0 %v621_v5  ;;  %4411 = vmatpush3.msra.mxu1 %v621_v5  ;;  %v789_v47 = vmul.f32 %v609_v44, %v609_v44  ;;  %v790_v48 = vmul.f32 %v610_v46, %v610_v46 }
  0x84   : > { %4356 = vmatprep.subr.mxu0 %v620_v6  ;;  %4412 = vmatprep.subr.mxu1 %v620_v6 }
  0x85   : > { %4357 = vmatpush3.msra.mxu0 %v620_v6  ;;  %4413 = vmatpush3.msra.mxu1 %v620_v6 }
  0x86   : > { %4358 = vmatprep.subr.mxu0 %v619_v7  ;;  %4414 = vmatprep.subr.mxu1 %v619_v7 }
  0x87   : > { %4359 = vmatpush3.msra.mxu0 %v619_v7  ;;  %4415 = vmatpush3.msra.mxu1 %v619_v7 }
  0x88   : > { %4360 = vmatprep.subr.mxu0 %v618_v8  ;;  %4416 = vmatprep.subr.mxu1 %v618_v8 }
  0x89   : > { %4361 = vmatpush3.msra.mxu0 %v618_v8  ;;  %4417 = vmatpush3.msra.mxu1 %v618_v8 }
  0x8a   : > { %4362 = vmatprep.subr.mxu0 %v617_v9  ;;  %4418 = vmatprep.subr.mxu1 %v617_v9 }
  0x8b   : > { %4363 = vmatpush3.msra.mxu0 %v617_v9  ;;  %4419 = vmatpush3.msra.mxu1 %v617_v9 }
  0x8c   : > { %4364 = vmatprep.subr.mxu0 %v616_v10  ;;  %4420 = vmatprep.subr.mxu1 %v616_v10 }
  0x8d   : > { %4365 = vmatpush3.msra.mxu0 %v616_v10  ;;  %4421 = vmatpush3.msra.mxu1 %v616_v10 }
  0x8e   : > { %4366 = vmatprep.subr.mxu0 %v615_v11  ;;  %4422 = vmatprep.subr.mxu1 %v615_v11 }
  0x8f   : > { %4367 = vmatpush3.msra.mxu0 %v615_v11  ;;  %4423 = vmatpush3.msra.mxu1 %v615_v11 }
  0x90   : > { %4368 = vmatprep.subr.mxu0 %v614_v12  ;;  %4424 = vmatprep.subr.mxu1 %v614_v12 }
  0x91   : > { %4369 = vmatpush3.msra.mxu0 %v614_v12  ;;  %4425 = vmatpush3.msra.mxu1 %v614_v12 }
  0x92   : > { %4370 = vmatprep.subr.mxu0 %v613_v13  ;;  %4426 = vmatprep.subr.mxu1 %v613_v13 }
  0x93   : > { %4371 = vmatpush3.msra.mxu0 %v613_v13  ;;  %4427 = vmatpush3.msra.mxu1 %v613_v13 }
  0x94   : > { %4372 = vmatprep.subr.mxu0 %v612_v14  ;;  %4428 = vmatprep.subr.mxu1 %v612_v14 }
  0x95   : > { %4373 = vmatpush3.msra.mxu0 %v612_v14  ;;  %4429 = vmatpush3.msra.mxu1 %v612_v14 }
  0x96   : > { %4374 = vmatprep.subr.mxu0 %v611_v17  ;;  %4430 = vmatprep.subr.mxu1 %v611_v17 }
  0x97   : > { %4375 = vmatpush3.msra.mxu0 %v611_v17  ;;  %4376 = vmatprep.mubr.f32.mxu0 %v595_v15 }
  0x98   : > { %4431 = vmatpush3.msra.mxu1 %v611_v17  ;;  %4432 = vmatprep.mubr.f32.mxu1 %v775_v19 }
  0x99   : > { %4377 = vmatmul.mubr.f32.vlgmr.msra.gmra.mxu0 %v5416_v16  ;;  %4433 = vmatmul.mubr.f32.vlgmr.msra.gmra.mxu1 %v776_v20 }
  0x9a   : > { %4379 = vmatprep.mubr.f32.mxu0 %v597_v18  ;;  %4435 = vmatprep.mubr.f32.mxu1 %v777_v22 }
  0x9b   : > { %4456 = vmatprep.subr.mxu0 %v628_v24  ;;  %4484 = vmatprep.subr.mxu1 %v628_v24 }
  0x9c   : > { %4457 = vmatpush3.msra.mxu0 %v628_v24  ;;  %4485 = vmatpush3.msra.mxu1 %v628_v24 }
  0x9d   : > { %4380 = vmatmul.mubr.f32.gmra.mxu0 %v5425_v21  ;;  %4436 = vmatmul.mubr.f32.gmra.mxu1 %v778_v25 }
  0x9e   : > { %4382 = vmatprep.mubr.f32.mxu0 %v599_v23  ;;  %4438 = vmatprep.mubr.f32.mxu1 %v779_v27 }
  0x9f   : > { %4458 = vmatprep.subr.mxu0 %v627_v49  ;;  %4486 = vmatprep.subr.mxu1 %v627_v49 }
  0xa0   : > { %4459 = vmatpush3.msra.mxu0 %v627_v49  ;;  %4487 = vmatpush3.msra.mxu1 %v627_v49 }
  0xa1   : > { %4383 = vmatmul.mubr.f32.gmra.mxu0 %v5435_v26  ;;  %4439 = vmatmul.mubr.f32.gmra.mxu1 %v780_v29 }
  0xa2   : > { %4385 = vmatprep.mubr.f32.mxu0 %v601_v28  ;;  %4441 = vmatprep.mubr.f32.mxu1 %v781_v31 }
  0xa5   : > { %4386 = vmatmul.mubr.f32.gmra.mxu0 %v602_v30  ;;  %4442 = vmatmul.mubr.f32.gmra.mxu1 %v782_v33 }
  0xa6   : > { %4388 = vmatprep.mubr.f32.mxu0 %v603_v32  ;;  %4444 = vmatprep.mubr.f32.mxu1 %v783_v35 }
  0xa9   : > { %4389 = vmatmul.mubr.f32.gmra.mxu0 %v604_v34  ;;  %4445 = vmatmul.mubr.f32.gmra.mxu1 %v784_v37 }
  0xaa   : > { %4391 = vmatprep.mubr.f32.mxu0 %v605_v36  ;;  %4447 = vmatprep.mubr.f32.mxu1 %v785_v39 }
  0xad   : > { %4392 = vmatmul.mubr.f32.gmra.mxu0 %v606_v38  ;;  %4448 = vmatmul.mubr.f32.gmra.mxu1 %v786_v41 }
  0xae   : > { %4394 = vmatprep.mubr.f32.mxu0 %v607_v40  ;;  %4450 = vmatprep.mubr.f32.mxu1 %v787_v43 }
  0xb1   : > { %4395 = vmatmul.mubr.f32.gmra.mxu0 %v608_v42  ;;  %4451 = vmatmul.mubr.f32.gmra.mxu1 %v788_v45 }
  0xb2   : > { %4397 = vmatprep.mubr.f32.mxu0 %v609_v44  ;;  %4453 = vmatprep.mubr.f32.mxu1 %v789_v47 }
  0xb5   : > { %4398 = vmatmul.mubr.f32.gmra.mxu0 %v610_v46  ;;  %4454 = vmatmul.mubr.f32.gmra.mxu1 %v790_v48 }
 0x159   : > { %v5454_v50 = vpop.f32.mrf.mxu0  ;;  %v4434_v51 = vpop.f32.mrf.mxu1 }
 0x15a   : > { %v937_v52 = vmul.f32 %v5454_v50, %v5454_v50 }
 0x15b   : > { %v5458_v53 = vpop.f32.mrf.mxu0  ;;  %v857_v54 = vpop.f32.mrf.mxu1 }
 0x15c   : > { %v953_v55 = vsub.f32 %v4434_v51, %v937_v52  ;;  %v936_v56 = vmul.f32 %v5458_v53, %v5458_v53 }
 0x15d   : > { %v5462_v57 = vpop.f32.mrf.mxu0  ;;  %v4437_v58 = vpop.f32.mrf.mxu1 }
 0x15e   : > { %v969_v59 = vmax.f32 %v953_v55, 0.0  ;;  %v952_v60 = vsub.f32 %v857_v54, %v936_v56  ;;  %v939_v61 = vmul.f32 %v5462_v57, %v5462_v57 }
 0x15f   : > { %v5466_v62 = vpop.f32.mrf.mxu0  ;;  %v867_v63 = vpop.f32.mrf.mxu1 }
 0x160   : > { %v985_v0 = vadd.f32 1e-05, %v969_v59  ;;  %v968_v1 = vmax.f32 %v952_v60, 0.0  ;;  %v938_v2 = vmul.f32 %v5466_v62, %v5466_v62  ;;  %v955_v3 = vsub.f32 %v4437_v58, %v939_v61 }
 0x161   : > { %v5470_v4 = vpop.f32.mrf.mxu0  ;;  %v4440_v5 = vpop.f32.mrf.mxu1 }
 0x162   : > { %4606 = vrsqrt.f32 %v985_v0  ;;  %v984_v6 = vadd.f32 1e-05, %v968_v1  ;;  %v971_v7 = vmax.f32 %v955_v3, 0.0  ;;  %v941_v8 = vmul.f32 %v5470_v4, %v5470_v4 }
 0x163   : > { %v954_v9 = vsub.f32 %v867_v63, %v938_v2  ;;  %v5474_v10 = vpop.f32.mrf.mxu0  ;;  %v877_v11 = vpop.f32.mrf.mxu1 }
 0x164   : > { %4608 = vrsqrt.f32 %v984_v6  ;;  %v987_v12 = vadd.f32 1e-05, %v971_v7  ;;  %v940_v13 = vmul.f32 %v5474_v10, %v5474_v10  ;;  %v957_v14 = vsub.f32 %v4440_v5, %v941_v8 }
 0x165   : > { %v970_v15 = vmax.f32 %v954_v9, 0.0  ;;  %v5478_v17 = vpop.f32.mrf.mxu0  ;;  %v4443_v18 = vpop.f32.mrf.mxu1 }
 0x166   : > { %4610 = vrsqrt.f32 %v987_v12  ;;  %v973_v19 = vmax.f32 %v957_v14, 0.0  ;;  %v943_v20 = vmul.f32 %v5478_v17, %v5478_v17  ;;  %v956_v22 = vsub.f32 %v877_v11, %v940_v13 }
 0x167   : > { %v986_v23 = vadd.f32 1e-05, %v970_v15  ;;  %v5482_v24 = vpop.f32.mrf.mxu0  ;;  %v887_v25 = vpop.f32.mrf.mxu1 }
 0x168   : > { %v989_v27 = vadd.f32 1e-05, %v973_v19  ;;  %v972_v28 = vmax.f32 %v956_v22, 0.0  ;;  %v942_v29 = vmul.f32 %v5482_v24, %v5482_v24  ;;  %v959_v30 = vsub.f32 %v4443_v18, %v943_v20 }
 0x169   : > { %4612 = vrsqrt.f32 %v986_v23  ;;  %v5486_v31 = vpop.f32.mrf.mxu0  ;;  %v4446_v32 = vpop.f32.mrf.mxu1 }
 0x16a   : > { %4614 = vrsqrt.f32 %v989_v27  ;;  %v988_v33 = vadd.f32 1e-05, %v972_v28  ;;  %v975_v34 = vmax.f32 %v959_v30, 0.0  ;;  %v945_v35 = vmul.f32 %v5486_v31, %v5486_v31 }
 0x16b   : > { %v958_v36 = vsub.f32 %v887_v25, %v942_v29  ;;  %v5490_v37 = vpop.f32.mrf.mxu0  ;;  %v897_v38 = vpop.f32.mrf.mxu1 }
 0x16c   : > { %4616 = vrsqrt.f32 %v988_v33  ;;  %v991_v39 = vadd.f32 1e-05, %v975_v34  ;;  %v944_v40 = vmul.f32 %v5490_v37, %v5490_v37  ;;  %v961_v41 = vsub.f32 %v4446_v32, %v945_v35 }
 0x16d   : > { %v974_v42 = vmax.f32 %v958_v36, 0.0  ;;  %v5494_v43 = vpop.f32.mrf.mxu0  ;;  %v4449_v44 = vpop.f32.mrf.mxu1 }
 0x16e   : > { %4618 = vrsqrt.f32 %v991_v39  ;;  %v977_v45 = vmax.f32 %v961_v41, 0.0  ;;  %v947_v46 = vmul.f32 %v5494_v43, %v5494_v43  ;;  %v960_v47 = vsub.f32 %v897_v38, %v944_v40 }
 0x16f   : > { %v4607_v48 = vpop.eup %4606  ;;  %v990_v49 = vadd.f32 1e-05, %v974_v42  ;;  %v5498_v51 = vpop.f32.mrf.mxu0 }
 0x170   : > { %v907_v52 = vpop.f32.mrf.mxu1  ;;  %v993_v54 = vadd.f32 1e-05, %v977_v45  ;;  %v976_v55 = vmax.f32 %v960_v47, 0.0  ;;  %v946_v56 = vmul.f32 %v5498_v51, %v5498_v51  ;;  %v963_v59 = vsub.f32 %v4449_v44, %v947_v46 }
 0x171   : > { %v4609_v58 = vpop.eup %4608  ;;  %4620 = vrsqrt.f32 %v990_v49  ;;  %v5502_v60 = vpop.f32.mrf.mxu0  ;;  %v1211_v63 = vmul.f32 %v4607_v48, %v5454_v50 }
 0x172   : > { %v4452_v61 = vpop.f32.mrf.mxu1  ;;  %4622 = vrsqrt.f32 %v993_v54  ;;  %v992_v0 = vadd.f32 1e-05, %v976_v55  ;;  %v949_v1 = vmul.f32 %v5502_v60, %v5502_v60  ;;  %4460 = vmatprep.mubr.msk.f32.mxu0 %vm1016_vm0, %v4609_v58  ;;  %v979_v3 = vmax.f32 %v963_v59, 0.0 }
 0x173   : > { %v4611_v2 = vpop.eup %4610  ;;  %v962_v5 = vsub.f32 %v907_v52, %v946_v56  ;;  %v5508_v6 = vpop.f32.mrf.mxu0  ;;  %4461 = vmatmul.mubr.msk.f32.vlgmr.msra.gmra.mxu0 %vm1016_vm0, %v4607_v48  ;;  %v1210_v8 = vmul.f32 %v4609_v58, %v5458_v53  ;;  %v1227_v20 = vsub.f32 0.0, %v1211_v63 }
 0x174   : > { %v917_v7 = vpop.f32.mrf.mxu1  ;;  %4624 = vrsqrt.f32 %v992_v0  ;;  %v948_v50 = vmul.f32 %v5508_v6, %v5508_v6  ;;  %v965_v9 = vsub.f32 %v4452_v61, %v949_v1  ;;  %v995_v11 = vadd.f32 1e-05, %v979_v3 }
 0x175   : > { %v978_v12 = vmax.f32 %v962_v5, 0.0  ;;  %v5514_v13 = vpop.f32.mrf.mxu0  ;;  %v1226_v14 = vsub.f32 0.0, %v1210_v8  ;;  %v1213_v18 = vmul.f32 %v4611_v2, %v5462_v57 }
 0x176   : > { %v4455_v15 = vpop.f32.mrf.mxu1  ;;  %v4613_v19 = vpop.eup %4612  ;;  %v981_v22 = vmax.f32 %v965_v9, 0.0  ;;  %v951_v23 = vmul.f32 %v5514_v13, %v5514_v13  ;;  %v964_v53 = vsub.f32 %v917_v7, %v948_v50  ;;  %4626 = vrsqrt.f32 %v995_v11 }
 0x177   : > { %v4615_v25 = vpop.eup %4614  ;;  %v994_v27 = vadd.f32 1e-05, %v978_v12  ;;  %4463 = vmatprep.mubr.msk.f32.mxu0 %vm1016_vm0, %v4613_v19  ;;  %4488 = vmatprep.mubr.msk.f32.mxu1 %vm1016_vm0, %v1226_v14  ;;  %v5521_v28 = vpop.f32.mrf.mxu0  ;;  %v1212_v30 = vmul.f32 %v4613_v19, %v5466_v62  ;;  %v1229_v38 = vsub.f32 0.0, %v1213_v18  ;;  %v1680_v14 = vld [vmem:[#allocation7 + $0xf8] sm:$0xff]  ;;  %v1678_v18 = vld [vmem:[#allocation7 + $0xe8] sm:$0xff]  ;;  %v1631_v19 = vld [vmem:[#allocation5 + $0xf0] sm:$0xff] }
 0x178   : > { %v927_v29 = vpop.f32.mrf.mxu1  ;;  %v997_v57 = vadd.f32 1e-05, %v981_v22  ;;  %v980_v32 = vmax.f32 %v964_v53, 0.0  ;;  %v950_v33 = vmul.f32 %v5521_v28, %v5521_v28  ;;  %v967_v34 = vsub.f32 %v4455_v15, %v951_v23  ;;  %4464 = vmatmul.mubr.msk.f32.gmra.mxu0 %vm1016_vm0, %v4611_v2  ;;  %4489 = vmatmul.mubr.msk.f32.vlgmr.msra.gmra.mxu1 %vm1016_vm0, %v1227_v20  ;;  %v1632_v15 = vld [vmem:[#allocation5 + $0xf8] sm:$0xff]  ;;  %v1677_v20 = vld [vmem:[#allocation7 + $0xe0] sm:$0xff]  ;;  %v1630_v22 = vld [vmem:[#allocation5 + $0xe8] sm:$0xff] }
 0x179   : > { %v4617_v35 = vpop.eup %4616  ;;  %4628 = vrsqrt.f32 %v994_v27  ;;  %v1228_v36 = vsub.f32 0.0, %v1212_v30  ;;  %v1215_v39 = vmul.f32 %v4615_v25, %v5470_v4  ;;  %1681 = vmatprep.subr.mxu0 %v1680_v14  ;;  %1842 = vmatprep.subr.mxu1 %v1632_v15  ;;  %v1676_v23 = vld [vmem:[#allocation7 + $0xd8] sm:$0xff]  ;;  %v1629_v53 = vld [vmem:[#allocation5 + $0xe0] sm:$0xff] }
 0x17a   : > { %4630 = vrsqrt.f32 %v997_v57  ;;  %v996_v40 = vadd.f32 1e-05, %v980_v32  ;;  %v983_v41 = vmax.f32 %v967_v34, 0.0  ;;  %v966_v62 = vsub.f32 %v927_v29, %v950_v33  ;;  %4466 = vmatprep.mubr.msk.f32.mxu0 %vm1016_vm0, %v4617_v35  ;;  %1843 = vmatpush1.msra.mxu1 %v1631_v19  ;;  %v1628_v27 = vld [vmem:[#allocation5 + $0xd8] sm:$0xff]  ;;  %v1627_v29 = vld [vmem:[#allocation5 + $0xd0] sm:$0xff]  ;;  %v1673_v30 = vld [vmem:[#allocation7 + $0xc0] sm:$0xff] }
 0x17b   : > { %v4619_v42 = vpop.eup %4618  ;;  %4491 = vmatprep.mubr.msk.f32.mxu1 %vm1016_vm0, %v1228_v36  ;;  %v1214_v44 = vmul.f32 %v4617_v35, %v5474_v10  ;;  %v1231_v49 = vsub.f32 0.0, %v1215_v39  ;;  %1844 = vmatprep.subr.mxu1 %v1630_v22  ;;  %v1626_v57 = vld [vmem:[#allocation5 + $0xc8] sm:$0xff]  ;;  %v1672_v32 = vld [vmem:[#allocation7 + $0xb8] sm:$0xff]  ;;  %v1625_v33 = vld [vmem:[#allocation5 + $0xc0] sm:$0xff] }
 0x17c   : > { %4632 = vrsqrt.f32 %v996_v40  ;;  %v999_v45 = vadd.f32 1e-05, %v983_v41  ;;  %v982_v46 = vmax.f32 %v966_v62, 0.0  ;;  %4492 = vmatmul.mubr.msk.f32.gmra.mxu1 %vm1016_vm0, %v1229_v38  ;;  %4467 = vmatmul.mubr.msk.f32.gmra.mxu0 %vm1016_vm0, %v4615_v25  ;;  %v1217_v52 = vmul.f32 %v4619_v42, %v5478_v17  ;;  %v1675_v25 = vld [vmem:[#allocation7 + $0xd0] sm:$0xff]  ;;  %v1624_v35 = vld [vmem:[#allocation5 + $0xb8] sm:$0xff]  ;;  %v1670_v36 = vld [vmem:[#allocation7 + $0xa8] sm:$0xff] }
 0x17d   : > { %v1230_v47 = vsub.f32 0.0, %v1214_v44  ;;  %1845 = vmatpush1.msra.mxu1 %v1629_v53  ;;  %v1671_v34 = vld [vmem:[#allocation7 + $0xb0] sm:$0xff]  ;;  %v1669_v39 = vld [vmem:[#allocation7 + $0xa0] sm:$0xff]  ;;  %v1622_v40 = vld [vmem:[#allocation5 + $0xa8] sm:$0xff] }
 0x17e   : > { %v4621_v4 = vpop.eup %4620  ;;  %4634 = vrsqrt.f32 %v999_v45  ;;  %v998_v48 = vadd.f32 1e-05, %v982_v46  ;;  %v1233_v58 = vsub.f32 0.0, %v1217_v52  ;;  %1846 = vmatprep.subr.mxu1 %v1628_v27  ;;  %v1623_v38 = vld [vmem:[#allocation5 + $0xb0] sm:$0xff]  ;;  %v1668_v41 = vld [vmem:[#allocation7 + $0x98] sm:$0xff]  ;;  %v1621_v62 = vld [vmem:[#allocation5 + $0xa0] sm:$0xff] }
 0x17f   : > { %v4623_v54 = vpop.eup %4622  ;;  %4494 = vmatprep.mubr.msk.f32.mxu1 %vm1016_vm0, %v1230_v47  ;;  %4469 = vmatprep.mubr.msk.f32.mxu0 %vm1016_vm0, %v4621_v4  ;;  %v1216_v10 = vmul.f32 %v4621_v4, %v5482_v24  ;;  %v1620_v44 = vld [vmem:[#allocation5 + $0x98] sm:$0xff]  ;;  %v1666_v45 = vld [vmem:[#allocation7 + $0x88] sm:$0xff]  ;;  %v1619_v46 = vld [vmem:[#allocation5 + $0x90] sm:$0xff] }
 0x180   : > { %4636 = vrsqrt.f32 %v998_v48  ;;  %4495 = vmatmul.mubr.msk.f32.gmra.mxu1 %vm1016_vm0, %v1231_v49  ;;  %4470 = vmatmul.mubr.msk.f32.gmra.mxu0 %vm1016_vm0, %v4619_v42  ;;  %v1219_v17 = vmul.f32 %v4623_v54, %v5486_v31  ;;  %v1667_v42 = vld [vmem:[#allocation7 + $0x90] sm:$0xff]  ;;  %v1665_v47 = vld [vmem:[#allocation7 + $0x80] sm:$0xff]  ;;  %v1618_v4 = vld [vmem:[#allocation5 + $0x88] sm:$0xff] }
 0x181   : > { %v4625_v55 = vpop.eup %4624  ;;  %v1232_v56 = vsub.f32 0.0, %v1216_v10  ;;  %1847 = vmatpush1.msra.mxu1 %v1627_v29  ;;  %v1664_v48 = vld [vmem:[#allocation7 + $0x78] sm:$0xff]  ;;  %v1617_v49 = vld [vmem:[#allocation5 + $0x80] sm:$0xff]  ;;  %v1663_v52 = vld [vmem:[#allocation7 + $0x70] sm:$0xff] }
 0x182   : > { %4472 = vmatprep.mubr.msk.f32.mxu0 %vm1016_vm0, %v4625_v55  ;;  %v1218_v59 = vmul.f32 %v4625_v55, %v5490_v37  ;;  %v1235_v0 = vsub.f32 0.0, %v1219_v17  ;;  %1848 = vmatprep.subr.mxu1 %v1626_v57  ;;  %v1662_v10 = vld [vmem:[#allocation7 + $0x68] sm:$0xff]  ;;  %v1615_v55 = vld [vmem:[#allocation5 + $0x70] sm:$0xff]  ;;  %v1613_v17 = vld [vmem:[#allocation5 + $0x60] sm:$0xff] }
 0x183   : > { %4497 = vmatprep.mubr.msk.f32.mxu1 %vm1016_vm0, %v1232_v56  ;;  %v4627_v61 = vpop.eup %4626  ;;  %1849 = vmatpush1.msra.mxu1 %v1625_v33  ;;  %v1661_v56 = vld [vmem:[#allocation7 + $0x60] sm:$0xff]  ;;  %v1635_v22 = vld [vmem:[%s5349_s16 + $0x10] sm:$0xff] }
 0x184   : > { %4498 = vmatmul.mubr.msk.f32.gmra.mxu1 %vm1016_vm0, %v1233_v58  ;;  %4473 = vmatmul.mubr.msk.f32.gmra.mxu0 %vm1016_vm0, %v4623_v54  ;;  %v1234_v24 = vsub.f32 0.0, %v1218_v59  ;;  %v1221_v1 = vmul.f32 %v4627_v61, %v5494_v43  ;;  %v1616_v54 = vld [vmem:[#allocation5 + $0x78] sm:$0xff]  ;;  %v1614_v58 = vld [vmem:[#allocation5 + $0x68] sm:$0xff]  ;;  %v1649_v14 = vld [vmem:[#allocation7] sm:$0xff] }
 0x185   : > { %1850 = vmatprep.subr.mxu1 %v1624_v35  ;;  %v1660_v59 = vld [vmem:[#allocation7 + $0x58] sm:$0xff]  ;;  %v1633_v15 = vld [vmem:[%s5349_s16] sm:$0xff]  ;;  %v1639_v27 = vld [vmem:[%s5349_s16 + $0x30] sm:$0xff] }
 0x186   : > { %v4629_v63 = vpop.eup %4628  ;;  %4500 = vmatprep.mubr.msk.f32.mxu1 %vm1016_vm0, %v1234_v24  ;;  %v1237_v7 = vsub.f32 0.0, %v1221_v1  ;;  %1851 = vmatpush1.msra.mxu1 %v1623_v38  ;;  %v1612_v24 = vld [vmem:[#allocation5 + $0x58] sm:$0xff]  ;;  %v1657_v1 = vld [vmem:[#allocation7 + $0x40] sm:$0xff]  ;;  %v1643_v57 = vld [vmem:[%s5349_s16 + $0x50] sm:$0xff] }
 0x187   : > { %v4631_v2 = vpop.eup %4630  ;;  %4475 = vmatprep.mubr.msk.f32.mxu0 %vm1016_vm0, %v4629_v63  ;;  %v1220_v37 = vmul.f32 %v4629_v63, %v5498_v51  ;;  %1852 = vmatprep.subr.mxu1 %v1622_v40  ;;  %v1658_v63 = vld [vmem:[#allocation7 + $0x48] sm:$0xff]  ;;  %v1601_v19 = vld [vmem:[#allocation5] sm:$0xff]  ;;  %v1647_v35 = vld [vmem:[%s5349_s16 + $0x70] sm:$0xff] }
 0x188   : > { %4501 = vmatmul.mubr.msk.f32.gmra.mxu1 %vm1016_vm0, %v1235_v0  ;;  %4476 = vmatmul.mubr.msk.f32.gmra.mxu0 %vm1016_vm0, %v4627_v61  ;;  %v1223_v31 = vmul.f32 %v4631_v2, %v5502_v60  ;;  %v1659_v61 = vld [vmem:[#allocation7 + $0x50] sm:$0xff]  ;;  %v1637_v53 = vld [vmem:[%s5349_s16 + $0x20] sm:$0xff]  ;;  %v2078_v38 = vld [vmem:[%s6768_s8 + $0xf8] sm:$0xff] }
 0x189   : > { %v4633_v3 = vpop.eup %4632  ;;  %v1236_v5 = vsub.f32 0.0, %v1220_v37  ;;  %1853 = vmatpush1.msra.mxu1 %v1621_v62  ;;  %v1611_v0 = vld [vmem:[#allocation5 + $0x50] sm:$0xff]  ;;  %v1656_v37 = vld [vmem:[#allocation7 + $0x38] sm:$0xff]  ;;  %v1641_v29 = vld [vmem:[%s5349_s16 + $0x40] sm:$0xff] }
 0x18a   : > { %4478 = vmatprep.mubr.msk.f32.mxu0 %vm1016_vm0, %v4633_v3  ;;  %v1222_v8 = vmul.f32 %v4633_v3, %v5508_v6  ;;  %v1239_v51 = vsub.f32 0.0, %v1223_v31  ;;  %1854 = vmatprep.subr.mxu1 %v1620_v44  ;;  %v1609_v31 = vld [vmem:[#allocation5 + $0x40] sm:$0xff]  ;;  %v1655_v3 = vld [vmem:[#allocation7 + $0x30] sm:$0xff]  ;;  %v5621_v62 = vld [vmem:[%s6768_s8 + $0xe8] sm:$0xff] }
 0x18b   : > { %v4635_v50 = vpop.eup %4634  ;;  %4503 = vmatprep.mubr.msk.f32.mxu1 %vm1016_vm0, %v1236_v5  ;;  %1855 = vmatpush1.msra.mxu1 %v1619_v46  ;;  %v1608_v5 = vld [vmem:[#allocation5 + $0x38] sm:$0xff]  ;;  %v1645_v33 = vld [vmem:[%s5349_s16 + $0x60] sm:$0xff]  ;;  %v5610_v40 = vld [vmem:[%s6768_s8 + $0xf0] sm:$0xff] }
 0x18c   : > { %4504 = vmatmul.mubr.msk.f32.gmra.mxu1 %vm1016_vm0, %v1237_v7  ;;  %4479 = vmatmul.mubr.msk.f32.gmra.mxu0 %vm1016_vm0, %v4631_v2  ;;  %v1238_v43 = vsub.f32 0.0, %v1222_v8  ;;  %v1225_v9 = vmul.f32 %v4635_v50, %v5514_v13  ;;  %v1679_v13 = vld [vmem:[#allocation7 + $0xf0] sm:$0xff]  ;;  %v1610_v2 = vld [vmem:[#allocation5 + $0x48] sm:$0xff]  ;;  %v5633_v44 = vld [vmem:[%s6768_s8 + $0xe0] sm:$0xff] }
 0x18d   : > { %v4637_v11 = vpop.eup %4636  ;;  %1682 = vmatpush1.msra.mxu0 %v1679_v13  ;;  %1856 = vmatprep.subr.mxu1 %v1618_v4  ;;  %v1654_v7 = vld [vmem:[#allocation7 + $0x28] sm:$0xff]  ;;  %v1607_v8 = vld [vmem:[#allocation5 + $0x30] sm:$0xff]  ;;  %v5645_v46 = vld [vmem:[%s6768_s8 + $0xd8] sm:$0xff] }
 0x18e   : > { %4506 = vmatprep.mubr.msk.f32.mxu1 %vm1016_vm0, %v1238_v43  ;;  %4481 = vmatprep.mubr.msk.f32.mxu0 %vm1016_vm0, %v4637_v11  ;;  %v1224_v60 = vmul.f32 %v4637_v11, %v5521_v28  ;;  %v1241_v12 = vsub.f32 0.0, %v1225_v9  ;;  %v1674_v28 = vld [vmem:[#allocation7 + $0xc8] sm:$0xff]  ;;  %v1605_v9 = vld [vmem:[#allocation5 + $0x20] sm:$0xff]  ;;  %v1651_v11 = vld [vmem:[#allocation7 + $0x10] sm:$0xff] }
 0x18f   : > { %1683 = vmatprep.subr.mxu0 %v1678_v18  ;;  %1857 = vmatpush1.msra.mxu1 %v1617_v49  ;;  %v1606_v43 = vld [vmem:[#allocation5 + $0x28] sm:$0xff]  ;;  %v5106_v18 = vmov 0.0   ;;  %v5657_v4 = vld [vmem:[%s6768_s8 + $0xd0] sm:$0xff] }
 0x190   : > { %4507 = vmatmul.mubr.msk.f32.gmra.mxu1 %vm1016_vm0, %v1239_v51  ;;  %4482 = vmatmul.mubr.msk.f32.gmra.mxu0 %vm1016_vm0, %v4635_v50  ;;  %v1240_v6 = vsub.f32 0.0, %v1224_v60  ;;  %v1653_v50 = vld [vmem:[#allocation7 + $0x20] sm:$0xff]  ;;  %v1652_v51 = vld [vmem:[#allocation7 + $0x18] sm:$0xff]  ;;  %v1602_v13 = vld [vmem:[#allocation5 + $0x8] sm:$0xff] }
 0x191   : > { %1684 = vmatpush1.msra.mxu0 %v1677_v20  ;;  %1858 = vmatprep.subr.mxu1 %v1616_v54  ;;  %v1604_v60 = vld [vmem:[#allocation5 + $0x18] sm:$0xff]  ;;  %v1634_v20 = vld [vmem:[%s5349_s16 + $0x8] sm:$0xff]  ;;  %v5681_v54 = vld [vmem:[%s6768_s8 + $0xc0] sm:$0xff] }
 0x192   : > { %4509 = vmatprep.mubr.msk.f32.mxu1 %vm1016_vm0, %v1240_v6  ;;  %1685 = vmatprep.subr.mxu0 %v1676_v23  ;;  %v1650_v6 = vld [vmem:[#allocation7 + $0x8] sm:$0xff]  ;;  %v1636_v23 = vld [vmem:[%s5349_s16 + $0x18] sm:$0xff] }
 0x193   : > { %1686 = vmatpush1.msra.mxu0 %v1675_v25  ;;  %1859 = vmatpush1.msra.mxu1 %v1615_v55  ;;  %v1638_v25 = vld [vmem:[%s5349_s16 + $0x28] sm:$0xff]  ;;  %v5693_v55 = vld [vmem:[%s6768_s8 + $0xb8] sm:$0xff] }
 0x194   : > { %4510 = vmatmul.mubr.msk.f32.gmra.mxu1 %vm1016_vm0, %v1241_v12  ;;  %1687 = vmatprep.subr.mxu0 %v1674_v28  ;;  %v1603_v12 = vld [vmem:[#allocation5 + $0x10] sm:$0xff]  ;;  %v1640_v28 = vld [vmem:[%s5349_s16 + $0x38] sm:$0xff]  ;;  %v5669_v49 = vld [vmem:[%s6768_s8 + $0xc8] sm:$0xff] }
 0x195   : > { %1688 = vmatpush1.msra.mxu0 %v1673_v30  ;;  %1860 = vmatprep.subr.mxu1 %v1614_v58  ;;  %v1642_v30 = vld [vmem:[%s5349_s16 + $0x48] sm:$0xff]  ;;  %v5705_v58 = vld [vmem:[%s6768_s8 + $0xb0] sm:$0xff] }
 0x196   : > { %1689 = vmatprep.subr.mxu0 %v1672_v32  ;;  %1861 = vmatpush1.msra.mxu1 %v1613_v17  ;;  %v1644_v32 = vld [vmem:[%s5349_s16 + $0x58] sm:$0xff]  ;;  %v5717_v17 = vld [vmem:[%s6768_s8 + $0xa8] sm:$0xff] }
 0x197   : > { %1690 = vmatpush1.msra.mxu0 %v1671_v34  ;;  %1862 = vmatprep.subr.mxu1 %v1612_v24  ;;  %v1646_v34 = vld [vmem:[%s5349_s16 + $0x68] sm:$0xff]  ;;  %v5729_v24 = vld [vmem:[%s6768_s8 + $0xa0] sm:$0xff] }
 0x198   : > { %1691 = vmatprep.subr.mxu0 %v1670_v36  ;;  %1863 = vmatpush1.msra.mxu1 %v1611_v0  ;;  %v1648_v36 = vld [vmem:[%s5349_s16 + $0x78] sm:$0xff] }
 0x199   : > { %1692 = vmatpush1.msra.mxu0 %v1669_v39  ;;  %1864 = vmatprep.subr.mxu1 %v1610_v2  ;;  %v5605_v39 = vld [vmem:[%s6768_s8 + $0x78] sm:$0xff] }
 0x19a   : > { %1693 = vmatprep.subr.mxu0 %v1668_v41  ;;  %1865 = vmatpush1.msra.mxu1 %v1609_v31  ;;  %v5615_v41 = vld [vmem:[%s6768_s8 + $0x70] sm:$0xff]  ;;  %v5747_v2 = vld [vmem:[%s6768_s8 + $0x18] sm:$0xff] }
 0x19b   : > { %1694 = vmatpush1.msra.mxu0 %v1667_v42  ;;  %1866 = vmatprep.subr.mxu1 %v1608_v5  ;;  %v5627_v42 = vld [vmem:[%s6768_s8 + $0x68] sm:$0xff]  ;;  %v5753_v31 = vld [vmem:[%s6768_s8 + $0x90] sm:$0xff] }
 0x19c   : > { %1695 = vmatprep.subr.mxu0 %v1666_v45  ;;  %1867 = vmatpush1.msra.mxu1 %v1607_v8  ;;  %v5639_v45 = vld [vmem:[%s6768_s8 + $0x60] sm:$0xff] }
 0x19d   : > { %1696 = vmatpush1.msra.mxu0 %v1665_v47  ;;  %1868 = vmatprep.subr.mxu1 %v1606_v43  ;;  %v5651_v47 = vld [vmem:[%s6768_s8 + $0x58] sm:$0xff] }
 0x19e   : > { %1697 = vmatprep.subr.mxu0 %v1664_v48  ;;  %1869 = vmatpush1.msra.mxu1 %v1605_v9  ;;  %v5663_v48 = vld [vmem:[%s6768_s8 + $0x50] sm:$0xff] }
 0x19f   : > { %1698 = vmatpush1.msra.mxu0 %v1663_v52  ;;  %1870 = vmatprep.subr.mxu1 %v1604_v60  ;;  %v5675_v52 = vld [vmem:[%s6768_s8 + $0x48] sm:$0xff] }
 0x1a0   : > { %1699 = vmatprep.subr.mxu0 %v1662_v10  ;;  %1871 = vmatpush1.msra.mxu1 %v1603_v12  ;;  %v5687_v10 = vld [vmem:[%s6768_s8 + $0x40] sm:$0xff] }
 0x1a1   : > { %1700 = vmatpush1.msra.mxu0 %v1661_v56  ;;  %1745 = vmatprep.mubr.f32.mxu0 %v5106_v18  ;;  %v5699_v56 = vld [vmem:[%s6768_s8 + $0x38] sm:$0xff] }
 0x1a2   : > { %1701 = vmatprep.subr.mxu0 %v1660_v59  ;;  %1872 = vmatprep.subr.mxu1 %v1602_v13  ;;  %v5711_v59 = vld [vmem:[%s6768_s8 + $0x30] sm:$0xff] }
 0x1a3   : > { %1702 = vmatpush1.msra.mxu0 %v1659_v61  ;;  %1873 = vmatpush1.msra.mxu1 %v1601_v19  ;;  %v5723_v61 = vld [vmem:[%s6768_s8 + $0x28] sm:$0xff] }
 0x1a4   : > { %1703 = vmatprep.subr.mxu0 %v1658_v63  ;;  %1906 = vmatprep.mubr.f32.mxu1 %v5106_v18  ;;  %v5735_v63 = vld [vmem:[%s6768_s8 + $0x20] sm:$0xff] }
 0x1a5   : > { %1704 = vmatpush1.msra.mxu0 %v1657_v1  ;;  %4264 = vmatprep.subr.mxu1 %v2078_v38  ;;  %v5741_v1 = vld [vmem:[%s6768_s8 + $0x98] sm:$0xff] }
 0x1a6   : > { %1705 = vmatprep.subr.mxu0 %v1656_v37 }
 0x1a7   : > { %1706 = vmatpush1.msra.mxu0 %v1655_v3  ;;  %v5759_v3 = vld [vmem:[%s6768_s8 + $0x10] sm:$0xff] }
 0x1a8   : > { %1707 = vmatprep.subr.mxu0 %v1654_v7  ;;  %v5766_v7 = vld [vmem:[%s6768_s8 + $0x88] sm:$0xff] }
 0x1a9   : > { %1708 = vmatpush1.msra.mxu0 %v1653_v50  ;;  %v5771_v50 = vld [vmem:[%s6764_s4] ss:$0 sm:$0xff] }
 0x1aa   : > { %1709 = vmatprep.subr.mxu0 %v1652_v51  ;;  %v4862_v51 = vld [vmem:[%s5406_s29] sm:$0xff] }
 0x1ab   : > { %1710 = vmatpush1.msra.mxu0 %v1651_v11 }
 0x1ac   : > { %1711 = vmatprep.subr.mxu0 %v1650_v6 }
 0x1ad   : > { %1712 = vmatpush1.msra.mxu0 %v1649_v14 }
 0x1ae   : > { %1746 = vmatmul.mubr.f32.vlgmr.msra.gmra.mxu0 %v1633_v15  ;;  %4184 = vmatprep.subr.mxu0 %v2078_v38 }
 0x1af   : > { %1751 = vmatprep.mubr.f32.mxu0 %v5106_v18  ;;  %4185 = vmatpush3.msra.mxu0 %v5605_v39 }
 0x1b0   : > { %4186 = vmatprep.subr.mxu0 %v5610_v40 }
 0x1b1   : > { %4187 = vmatpush3.msra.mxu0 %v5615_v41 }
 0x1b2   : > { %1752 = vmatmul.mubr.f32.gmra.mxu0 %v1634_v20  ;;  %4188 = vmatprep.subr.mxu0 %v5621_v62  ;;  %v4863_v20 = vld [vmem:[%s5406_s29 + $0x10] sm:$0xff] }
 0x1b3   : > { %1757 = vmatprep.mubr.f32.mxu0 %v5106_v18  ;;  %4189 = vmatpush3.msra.mxu0 %v5627_v42 }
 0x1b4   : > { %4190 = vmatprep.subr.mxu0 %v5633_v44 }
 0x1b5   : > { %4191 = vmatpush3.msra.mxu0 %v5639_v45 }
 0x1b6   : > { %1758 = vmatmul.mubr.f32.gmra.mxu0 %v1635_v22  ;;  %4192 = vmatprep.subr.mxu0 %v5645_v46 }
 0x1b7   : > { %1763 = vmatprep.mubr.f32.mxu0 %v5106_v18  ;;  %4193 = vmatpush3.msra.mxu0 %v5651_v47 }
 0x1b8   : > { %4194 = vmatprep.subr.mxu0 %v5657_v4 }
 0x1b9   : > { %4195 = vmatpush3.msra.mxu0 %v5663_v48 }
 0x1ba   : > { %1764 = vmatmul.mubr.f32.gmra.mxu0 %v1636_v23  ;;  %4196 = vmatprep.subr.mxu0 %v5669_v49 }
 0x1bb   : > { %1769 = vmatprep.mubr.f32.mxu0 %v5106_v18  ;;  %4197 = vmatpush3.msra.mxu0 %v5675_v52 }
 0x1bc   : > { %4198 = vmatprep.subr.mxu0 %v5681_v54 }
 0x1bd   : > { %4199 = vmatpush3.msra.mxu0 %v5687_v10 }
 0x1be   : > { %1770 = vmatmul.mubr.f32.gmra.mxu0 %v1637_v53  ;;  %4200 = vmatprep.subr.mxu0 %v5693_v55 }
 0x1bf   : > { %1775 = vmatprep.mubr.f32.mxu0 %v5106_v18  ;;  %4201 = vmatpush3.msra.mxu0 %v5699_v56 }
 0x1c0   : > { %4202 = vmatprep.subr.mxu0 %v5705_v58 }
 0x1c1   : > { %4203 = vmatpush3.msra.mxu0 %v5711_v59 }
 0x1c2   : > { %1776 = vmatmul.mubr.f32.gmra.mxu0 %v1638_v25  ;;  %4204 = vmatprep.subr.mxu0 %v5717_v17 }
 0x1c3   : > { %1781 = vmatprep.mubr.f32.mxu0 %v5106_v18  ;;  %4205 = vmatpush3.msra.mxu0 %v5723_v61 }
 0x1c4   : > { %4206 = vmatprep.subr.mxu0 %v5729_v24 }
 0x1c5   : > { %4207 = vmatpush3.msra.mxu0 %v5735_v63 }
 0x1c6   : > { %1782 = vmatmul.mubr.f32.gmra.mxu0 %v1639_v27  ;;  %4208 = vmatprep.subr.mxu0 %v5741_v1 }
 0x1c7   : > { %1787 = vmatprep.mubr.f32.mxu0 %v5106_v18  ;;  %4209 = vmatpush3.msra.mxu0 %v5747_v2 }
 0x1c8   : > { %4210 = vmatprep.subr.mxu0 %v5753_v31 }
 0x1c9   : > { %4211 = vmatpush3.msra.mxu0 %v5759_v3 }
 0x1ca   : > { %1788 = vmatmul.mubr.f32.gmra.mxu0 %v1640_v28  ;;  %4212 = vmatprep.subr.mxu0 %v5766_v7 }
 0x1cb   : > { %1793 = vmatprep.mubr.f32.mxu0 %v5106_v18 }
 0x1ce   : > { %1794 = vmatmul.mubr.f32.gmra.mxu0 %v1641_v29 }
 0x1cf   : > { %1799 = vmatprep.mubr.f32.mxu0 %v5106_v18 }
 0x1d2   : > { %1800 = vmatmul.mubr.f32.gmra.mxu0 %v1642_v30 }
 0x1d3   : > { %1805 = vmatprep.mubr.f32.mxu0 %v5106_v18 }
 0x1d6   : > { %1806 = vmatmul.mubr.f32.gmra.mxu0 %v1643_v57  ;;  %v4864_v57 = vld [vmem:[%s5406_s29 + $0x20] sm:$0xff] }
 0x1d7   : > { %1811 = vmatprep.mubr.f32.mxu0 %v5106_v18 }
 0x1da   : > { %1812 = vmatmul.mubr.f32.gmra.mxu0 %v1644_v32 }
 0x1db   : > { %1817 = vmatprep.mubr.f32.mxu0 %v5106_v18 }
 0x1de   : > { %1818 = vmatmul.mubr.f32.gmra.mxu0 %v1645_v33 }
 0x1df   : > { %1823 = vmatprep.mubr.f32.mxu0 %v5106_v18 }
 0x1e2   : > { %1824 = vmatmul.mubr.f32.gmra.mxu0 %v1646_v34 }
 0x1e3   : > { %1829 = vmatprep.mubr.f32.mxu0 %v5106_v18 }
 0x1e6   : > { %1830 = vmatmul.mubr.f32.gmra.mxu0 %v1647_v35 }
 0x1e7   : > { %1835 = vmatprep.mubr.f32.mxu0 %v5106_v18 }
 0x1ea   : > { %1836 = vmatmul.mubr.f32.gmra.mxu0 %v1648_v36 }
 0x233   : > { %v4462_v0 = vpop.f32.mrf.mxu0 }
 0x234   : > { %v1436_v5 = vmul.f32 %v4462_v0, %v5416_v16 }
 0x235   : > { %v1131_v37 = vpop.f32.mrf.mxu0 }
 0x236   : > { %v1435_v9 = vmul.f32 %v4862_v51, %v1131_v37 }
 0x238   : > { %v4465_v8 = vpop.f32.mrf.mxu0  ;;  %v4490_v43 = vpop.f32.mrf.mxu1 }
 0x239   : > { %v1438_v16 = vmul.f32 %v4465_v8, %v5425_v21  ;;  %v1452_v11 = vadd.f32 %v4490_v43, %v1436_v5  ;;  %v4865_v8 = vld [vmem:[%s5406_s29 + $0x30] sm:$0xff] }
 0x23a   : > { %v1141_v60 = vpop.f32.mrf.mxu0  ;;  %v1356_v6 = vpop.f32.mrf.mxu1 }
 0x23b   : > { %v5779_v12 = vadd.f32 %v5771_v50, %v1452_v11  ;;  %v1451_v14 = vadd.f32 %v1435_v9, %v1356_v6  ;;  %v1437_v22 = vmul.f32 %v4863_v20, %v1141_v60  ;;  %v4866_v11 = vld [vmem:[%s5406_s29 + $0x38] sm:$0xff] }
 0x23c   : > { %v4493_v13 = vpop.f32.mrf.mxu1  ;;  %v4468_v15 = vpop.f32.mrf.mxu0 }
 0x23d   : > { %v3996_v19 = vmul.f32 -1.442695, %v5779_v12  ;;  %v5784_v21 = vadd.f32 %v5771_v50, %v1451_v14  ;;  %v1454_v23 = vadd.f32 %v4493_v13, %v1438_v16  ;;  %v1440_v53 = vmul.f32 %v4468_v15, %v5435_v26 }
 0x23e   : > { %v1366_v25 = vpop.f32.mrf.mxu1  ;;  %v1151_v27 = vpop.f32.mrf.mxu0 }
 0x23f   : > { %4638 = vpow2.f32 %v3996_v19  ;;  %v3995_v28 = vmul.f32 -1.442695, %v5784_v21  ;;  %v5789_v29 = vadd.f32 %v5771_v50, %v1454_v23  ;;  %v1453_v30 = vadd.f32 %v1437_v22, %v1366_v25 }
 0x240   : > { %v1439_v32 = vmul.f32 %v4864_v57, %v1151_v27  ;;  %v4496_v33 = vpop.f32.mrf.mxu1  ;;  %v4471_v34 = vpop.f32.mrf.mxu0 }
 0x241   : > { %4640 = vpow2.f32 %v3995_v28  ;;  %v5793_v35 = vadd.f32 %v5771_v50, %v1453_v30  ;;  %v3998_v38 = vmul.f32 -1.442695, %v5789_v29  ;;  %v1456_v37 = vadd.f32 %v4496_v33, %v1440_v53  ;;  %v4867_v53 = vld [vmem:[%s5406_s29 + $0x40] sm:$0xff] }
 0x242   : > { %v1376_v26 = vpop.f32.mrf.mxu1  ;;  %v1161_v36 = vpop.f32.mrf.mxu0  ;;  %v1442_v60 = vmul.f32 %v4866_v11, %v4471_v34 }
 0x243   : > { %v3997_v0 = vmul.f32 -1.442695, %v5793_v35  ;;  %v1455_v5 = vadd.f32 %v1439_v32, %v1376_v26  ;;  %v1441_v43 = vmul.f32 %v4865_v8, %v1161_v36  ;;  %v5803_v14 = vadd.f32 %v5771_v50, %v1456_v37  ;;  %v4868_v32 = vld [vmem:[%s5406_s29 + $0x48] sm:$0xff] }
 0x244   : > { %v4499_v51 = vpop.f32.mrf.mxu1  ;;  %v4474_v9 = vpop.f32.mrf.mxu0 }
 0x245   : > { %4642 = vpow2.f32 %v3997_v0  ;;  %v5799_v16 = vadd.f32 %v5771_v50, %v1455_v5  ;;  %v1458_v22 = vadd.f32 %v4499_v51, %v1442_v60  ;;  %v4000_v27 = vmul.f32 -1.442695, %v5803_v14  ;;  %v4869_v60 = vld [vmem:[%s5406_s29 + $0x50] sm:$0xff] }
 0x246   : > { %v1386_v6 = vpop.f32.mrf.mxu1  ;;  %4644 = vpow2.f32 %v3998_v38  ;;  %v1171_v19 = vpop.f32.mrf.mxu0  ;;  %v1444_v33 = vmul.f32 %v4868_v32, %v4474_v9 }
 0x247   : > { %v3999_v13 = vmul.f32 -1.442695, %v5799_v16  ;;  %v1457_v15 = vadd.f32 %v1441_v43, %v1386_v6  ;;  %v1443_v25 = vmul.f32 %v4867_v53, %v1171_v19  ;;  %v5813_v26 = vadd.f32 %v5771_v50, %v1458_v22 }
 0x248   : > { %v4502_v20 = vpop.f32.mrf.mxu1  ;;  %v4477_v28 = vpop.f32.mrf.mxu0 }
 0x249   : > { %v5807_v23 = vadd.f32 %v5771_v50, %v1457_v15  ;;  %4646 = vpow2.f32 %v3999_v13  ;;  %v1460_v43 = vadd.f32 %v4502_v20, %v1444_v33  ;;  %v4002_v11 = vmul.f32 -1.442695, %v5813_v26  ;;  %v4870_v20 = vld [vmem:[%s5406_s29 + $0x58] sm:$0xff] }
 0x24a   : > { %v1396_v30 = vpop.f32.mrf.mxu1  ;;  %4648 = vpow2.f32 %v4000_v27  ;;  %v1181_v5 = vpop.f32.mrf.mxu0 }
 0x24b   : > { %v4001_v36 = vmul.f32 -1.442695, %v5807_v23  ;;  %v1459_v38 = vadd.f32 %v1443_v25, %v1396_v30  ;;  %v1445_v6 = vmul.f32 %v4869_v60, %v1181_v5  ;;  %v5822_v53 = vadd.f32 %v5771_v50, %v1460_v43  ;;  %v4872_v60 = vld [vmem:[%s5406_s29 + $0x68] sm:$0xff] }
 0x24c   : > { %v4639_v57 = vpop.eup %4638  ;;  %v4505_v8 = vpop.f32.mrf.mxu1  ;;  %v1446_v25 = vmul.f32 %v4870_v20, %v4477_v28 }
 0x24d   : > { %v1538_v0 = vadd.f32 1.0, %v4639_v57  ;;  %v5818_v9 = vadd.f32 %v5771_v50, %v1459_v38  ;;  %v4480_v15 = vpop.f32.mrf.mxu0 }
 0x24e   : > { %v4641_v34 = vpop.eup %4640  ;;  %v1406_v19 = vpop.f32.mrf.mxu1  ;;  %v1462_v38 = vadd.f32 %v4505_v8, %v1446_v25 }
 0x24f   : > { %v1537_v37 = vadd.f32 1.0, %v4641_v34  ;;  %v4003_v27 = vmul.f32 -1.442695, %v5818_v9  ;;  %v1461_v30 = vadd.f32 %v1445_v6, %v1406_v19  ;;  %v1191_v32 = vpop.f32.mrf.mxu0  ;;  %v1448_v6 = vmul.f32 %v4872_v60, %v4480_v15 }
 0x250   : > { %v4508_v33 = vpop.f32.mrf.mxu1  ;;  %v5833_v19 = vadd.f32 %v5771_v50, %v1462_v38  ;;  %v4873_v38 = vld [vmem:[%s5406_s29 + $0x70] sm:$0xff] }
 0x251   : > { %4650 = vrcp.f32 %v1537_v37  ;;  %v4871_v37 = vld [vmem:[%s5406_s29 + $0x60] sm:$0xff]  ;;  %v4483_v43 = vpop.f32.mrf.mxu0 }
 0x252   : > { %v4643_v51 = vpop.eup %4642  ;;  %4652 = vpow2.f32 %v4001_v36  ;;  %v4004_v36 = vmul.f32 -1.442695, %v5822_v53  ;;  %v1447_v5 = vmul.f32 %v4871_v37, %v1191_v32  ;;  %v4006_v15 = vmul.f32 -1.442695, %v5833_v19 }
 0x253   : > { %4654 = vrcp.f32 %v1538_v0  ;;  %v1539_v13 = vadd.f32 1.0, %v4643_v51  ;;  %v4645_v22 = vpop.eup %4644  ;;  %v5828_v0 = vadd.f32 %v5771_v50, %v1461_v30  ;;  %v1416_v51 = vpop.f32.mrf.mxu1 }
 0x254   : > { %4656 = vpow2.f32 %v4002_v11  ;;  %v1540_v57 = vadd.f32 1.0, %v4645_v22  ;;  %v1463_v22 = vadd.f32 %v1447_v5, %v1416_v51  ;;  %v1201_v30 = vpop.f32.mrf.mxu0 }
 0x255   : > { %4658 = vrcp.f32 %v1539_v13  ;;  %v4005_v8 = vmul.f32 -1.442695, %v5828_v0  ;;  %v1449_v37 = vmul.f32 %v4873_v38, %v1201_v30  ;;  %v2063_v38 = vld [vmem:[%s6768_s8 + $0x80] sm:$0xff] }
 0x256   : > { %v4647_v34 = vpop.eup %4646  ;;  %4660 = vpow2.f32 %v4003_v27 }
 0x257   : > { %4662 = vrcp.f32 %v1540_v57  ;;  %v1541_v28 = vadd.f32 1.0, %v4647_v34  ;;  %v4649_v11 = vpop.eup %4648  ;;  %v4511_v57 = vpop.f32.mrf.mxu1  ;;  %v1464_v34 = vadd.f32 %v4508_v33, %v1448_v6 }
 0x258   : > { %4664 = vpow2.f32 %v4004_v36  ;;  %v1542_v27 = vadd.f32 1.0, %v4649_v11  ;;  %v5839_v36 = vadd.f32 %v5771_v50, %v1463_v22  ;;  %v4874_v11 = vld [vmem:[%s5406_s29 + $0x78] sm:$0xff] }
 0x259   : > { %4666 = vrcp.f32 %v1541_v28  ;;  %v1426_v28 = vpop.f32.mrf.mxu1  ;;  %v1450_v60 = vmul.f32 %v4874_v11, %v4483_v43  ;;  %v5850_v6 = vadd.f32 %v5771_v50, %v1464_v34 }
 0x25a   : > { %4668 = vpow2.f32 %v4005_v8 }
 0x25b   : > { %4670 = vrcp.f32 %v1542_v27  ;;  %v1466_v8 = vadd.f32 %v4511_v57, %v1450_v60 }
 0x25c   : > { %4672 = vpow2.f32 %v4006_v15 }
 0x25e   : > { %v4651_v13 = vpop.eup %4650 }
 0x25f   : > { %v4653_v20 = vpop.eup %4652  ;;  %v1585_v25 = vmul.f32 %v4651_v13, %v5784_v21  ;;  %v1465_v13 = vadd.f32 %v1449_v37, %v1426_v28  ;;  %v2047_v37 = vld [vmem:[%s6768_s8] sm:$0xff]  ;;  %v2082_v28 = vld [vmem:[%s6769_s9 + $0x18] sm:$0xff] }
 0x260   : > { %v4655_v32 = vpop.eup %4654  ;;  %v1543_v5 = vadd.f32 1.0, %v4653_v20 }
 0x261   : > { %1907 = vmatmul.mubr.f32.vlgmr.msra.gmra.mxu1 %v1585_v25  ;;  %v4657_v21 = vpop.eup %4656  ;;  %v1586_v33 = vmul.f32 %v4655_v32, %v5779_v12  ;;  %v5861_v22 = vadd.f32 %v5771_v50, %v1465_v13 }
 0x262   : > { %1912 = vmatprep.mubr.f32.mxu1 %v5106_v18  ;;  %4265 = vmatpush3.msra.mxu1 %v5605_v39  ;;  %v4659_v51 = vpop.eup %4658  ;;  %v4007_v39 = vmul.f32 -1.442695, %v5839_v36  ;;  %v1544_v12 = vadd.f32 1.0, %v4657_v21  ;;  %4674 = vrcp.f32 %v1543_v5 }
 0x263   : > { %4266 = vmatprep.subr.mxu1 %v5610_v40  ;;  %v4661_v40 = vpop.eup %4660  ;;  %v4009_v20 = vmul.f32 -1.442695, %v5861_v22 }
 0x264   : > { %4267 = vmatpush3.msra.mxu1 %v5615_v41  ;;  %v1587_v41 = vmul.f32 %v4659_v51, %v5793_v35  ;;  %v4663_v43 = vpop.eup %4662  ;;  %4676 = vpow2.f32 %v4007_v39 }
 0x265   : > { %1913 = vmatmul.mubr.f32.gmra.mxu1 %v1586_v33  ;;  %4268 = vmatprep.subr.mxu1 %v5621_v62  ;;  %v4008_v62 = vmul.f32 -1.442695, %v5850_v6  ;;  %4678 = vrcp.f32 %v1544_v12  ;;  %v1588_v35 = vmul.f32 %v4663_v43, %v5789_v29 }
 0x266   : > { %1918 = vmatprep.mubr.f32.mxu1 %v5106_v18  ;;  %4269 = vmatpush3.msra.mxu1 %v5627_v42  ;;  %v4665_v42 = vpop.eup %4664 }
 0x267   : > { %4270 = vmatprep.subr.mxu1 %v5633_v44  ;;  %v1545_v44 = vadd.f32 1.0, %v4661_v40  ;;  %4680 = vpow2.f32 %v4008_v62  ;;  %v1546_v29 = vadd.f32 1.0, %v4665_v42  ;;  %v2005_v62 = vlaneseq }
 0x268   : > { %4271 = vmatpush3.msra.mxu1 %v5639_v45  ;;  %v4667_v45 = vpop.eup %4666 }
 0x269   : > { %1919 = vmatmul.mubr.f32.gmra.mxu1 %v1587_v41  ;;  %4272 = vmatprep.subr.mxu1 %v5645_v46  ;;  %v5870_v46 = vadd.f32 %v5771_v50, %v1466_v8  ;;  %4682 = vrcp.f32 %v1545_v44 }
 0x26a   : > { %1924 = vmatprep.mubr.f32.mxu1 %v5106_v18  ;;  %4273 = vmatpush3.msra.mxu1 %v5651_v47  ;;  %v4669_v47 = vpop.eup %4668  ;;  %4684 = vpow2.f32 %v4009_v20 }
 0x26b   : > { %4274 = vmatprep.subr.mxu1 %v5657_v4  ;;  %v1589_v4 = vmul.f32 %v4667_v45, %v5799_v16  ;;  %4686 = vrcp.f32 %v1546_v29  ;;  %v1547_v50 = vadd.f32 1.0, %v4669_v47 }
 0x26c   : > { %4275 = vmatpush3.msra.mxu1 %v5663_v48  ;;  %v4671_v48 = vpop.eup %4670 }
 0x26d   : > { %1925 = vmatmul.mubr.f32.gmra.mxu1 %v1588_v35  ;;  %4276 = vmatprep.subr.mxu1 %v5669_v49  ;;  %v4010_v49 = vmul.f32 -1.442695, %v5870_v46  ;;  %v1590_v16 = vmul.f32 %v4671_v48, %v5803_v14  ;;  %v2003_v35 = vld [vmem:[%s6766_s6] sm:$0x3] }
 0x26e   : > { %1930 = vmatprep.mubr.f32.mxu1 %v5106_v18  ;;  %4277 = vmatpush3.msra.mxu1 %v5675_v52  ;;  %v4673_v52 = vpop.eup %4672  ;;  %v1747_v21 = vpop.f32.mrf.mxu0 }
 0x26f   : > { %4278 = vmatprep.subr.mxu1 %v5681_v54  ;;  %v4675_v54 = vpop.eup %4674  ;;  %4688 = vpow2.f32 %v4010_v49 }
 0x270   : > { %4279 = vmatpush3.msra.mxu1 %v5687_v10  ;;  %4690 = vrcp.f32 %v1547_v50  ;;  %v1749_v5 = vpop.f32.mrf.mxu0 }
 0x271   : > { %1931 = vmatmul.mubr.f32.gmra.mxu1 %v1589_v4  ;;  %4280 = vmatprep.subr.mxu1 %v5693_v55  ;;  %v4677_v10 = vpop.eup %4676  ;;  %v1548_v55 = vadd.f32 1.0, %v4673_v52 }
 0x272   : > { %1936 = vmatprep.mubr.f32.mxu1 %v5106_v18  ;;  %4281 = vmatpush3.msra.mxu1 %v5699_v56  ;;  %v1591_v56 = vmul.f32 %v4675_v54, %v5807_v23  ;;  %v4679_v14 = vpop.eup %4678  ;;  %v1753_v33 = vpop.f32.mrf.mxu0 }
 0x273   : > { %4282 = vmatprep.subr.mxu1 %v5705_v58  ;;  %4692 = vrcp.f32 %v1548_v55 }
 0x274   : > { %4283 = vmatpush3.msra.mxu1 %v5711_v59  ;;  %v4681_v58 = vpop.eup %4680  ;;  %v1549_v59 = vadd.f32 1.0, %v4677_v10  ;;  %v1755_v51 = vpop.f32.mrf.mxu0 }
 0x275   : > { %1937 = vmatmul.mubr.f32.gmra.mxu1 %v1590_v16  ;;  %4284 = vmatprep.subr.mxu1 %v5717_v17  ;;  %v1592_v17 = vmul.f32 %v4679_v14, %v5813_v26  ;;  %v2081_v14 = vld [vmem:[%s6769_s9 + $0x10] sm:$0xff] }
 0x276   : > { %1942 = vmatprep.mubr.f32.mxu1 %v5106_v18  ;;  %4285 = vmatpush3.msra.mxu1 %v5723_v61  ;;  %v4683_v61 = vpop.eup %4682  ;;  %4694 = vrcp.f32 %v1549_v59  ;;  %v1759_v11 = vpop.f32.mrf.mxu0 }
 0x277   : > { %4286 = vmatprep.subr.mxu1 %v5729_v24  ;;  %v4685_v24 = vpop.eup %4684 }
 0x278   : > { %4287 = vmatpush3.msra.mxu1 %v5735_v63  ;;  %v1550_v63 = vadd.f32 1.0, %v4681_v58  ;;  %v1761_v60 = vpop.f32.mrf.mxu0 }
 0x279   : > { %1943 = vmatmul.mubr.f32.gmra.mxu1 %v1591_v56  ;;  %4288 = vmatprep.subr.mxu1 %v5741_v1  ;;  %v1593_v1 = vmul.f32 %v4683_v61, %v5818_v9 }
 0x27a   : > { %1948 = vmatprep.mubr.f32.mxu1 %v5106_v18  ;;  %4289 = vmatpush3.msra.mxu1 %v5747_v2  ;;  %v4687_v2 = vpop.eup %4686  ;;  %4696 = vrcp.f32 %v1550_v63 }
 0x27b   : > { %4290 = vmatprep.subr.mxu1 %v5753_v31  ;;  %v1551_v31 = vadd.f32 1.0, %v4685_v24  ;;  %v1594_v26 = vmul.f32 %v4687_v2, %v5822_v53 }
 0x27c   : > { %4291 = vmatpush3.msra.mxu1 %v5759_v3  ;;  %v4689_v23 = vpop.eup %4688 }
 0x27d   : > { %1949 = vmatmul.mubr.f32.gmra.mxu1 %v1592_v17  ;;  %4292 = vmatprep.subr.mxu1 %v5766_v7  ;;  %v4691_v3 = vpop.eup %4690  ;;  %v1552_v7 = vadd.f32 1.0, %v4689_v23  ;;  %4698 = vrcp.f32 %v1551_v31  ;;  %v2080_v17 = vld [vmem:[%s6769_s9 + $0x8] sm:$0xff] }
 0x27e   : > { %1954 = vmatprep.mubr.f32.mxu1 %v5106_v18  ;;  %v1595_v25 = vmul.f32 %v4691_v3, %v5828_v0 }
 0x27f   : > { %4700 = vrcp.f32 %v1552_v7 }
 0x280   : > { %v4693_v27 = vpop.eup %4692 }
 0x281   : > { %1955 = vmatmul.mubr.f32.gmra.mxu1 %v1593_v1  ;;  %v1596_v9 = vmul.f32 %v4693_v27, %v5833_v19 }
 0x282   : > { %1960 = vmatprep.mubr.f32.mxu1 %v5106_v18 }
 0x283   : > { %v4695_v30 = vpop.eup %4694 }
 0x284   : > { %v1597_v53 = vmul.f32 %v4695_v30, %v5839_v36  ;;  %v2048_v36 = vld [vmem:[%s6768_s8 + $0x8] sm:$0xff] }
 0x285   : > { %1961 = vmatmul.mubr.f32.gmra.mxu1 %v1594_v26  ;;  %4213 = vmatpush3.msra.mxu0 %v2048_v36  ;;  %v2079_v26 = vld [vmem:[%s6769_s9] sm:$0xff] }
 0x286   : > { %1966 = vmatprep.mubr.f32.mxu1 %v5106_v18  ;;  %4293 = vmatpush3.msra.mxu1 %v2048_v36 }
 0x287   : > { %v4697_v57 = vpop.eup %4696  ;;  %4214 = vmatprep.subr.mxu0 %v2063_v38  ;;  %4294 = vmatprep.subr.mxu1 %v2063_v38 }
 0x288   : > { %v1598_v32 = vmul.f32 %v4697_v57, %v5850_v6  ;;  %4215 = vmatpush3.msra.mxu0 %v2047_v37  ;;  %4295 = vmatpush3.msra.mxu1 %v2047_v37  ;;  %v1765_v6 = vpop.f32.mrf.mxu0 }
 0x289   : > { %1967 = vmatmul.mubr.f32.gmra.mxu1 %v1595_v25  ;;  %2562 = vmatprep.subr.mxu0 %v2082_v28 }
 0x28a   : > { %1972 = vmatprep.mubr.f32.mxu1 %v5106_v18  ;;  %v4699_v0 = vpop.eup %4698  ;;  %2803 = vmatprep.subr.mxu1 %v2082_v28  ;;  %v1767_v39 = vpop.f32.mrf.mxu0 }
 0x28b   : > { %v1599_v34 = vmul.f32 %v4699_v0, %v5861_v22  ;;  %v2006_v22 = vshrl.u32 %v2005_v62, 7 }
 0x28c   : > { %v4701_v15 = vpop.eup %4700  ;;  %v5926_v13 = vpop.f32.mrf.mxu0 }
 0x28d   : > { %1973 = vmatmul.mubr.f32.gmra.mxu1 %v1596_v9  ;;  %v1600_v19 = vmul.f32 %v4701_v15, %v5870_v46  ;;  %v5940_v44 = vsub.s32 0, %v2006_v22  ;;  %v5945_v45 = vsub.s32 1, %v2006_v22 }
 0x28e   : > { %1978 = vmatprep.mubr.f32.mxu1 %v5106_v18  ;;  %v5928_v40 = vpop.f32.mrf.mxu0 }
 0x28f   : > { %v5950_v47 = vrot.slane %v2003_v35, %v5940_v44  ;;  %v5953_v4 = vrot.slane %v2003_v35, %v5945_v45 }
 0x290   : > { %v5930_v12 = vpop.f32.mrf.mxu0 }
 0x291   : > { %1979 = vmatmul.mubr.f32.gmra.mxu1 %v1597_v53 }
 0x292   : > { %1984 = vmatprep.mubr.f32.mxu1 %v5106_v18  ;;  %v5932_v41 = vpop.f32.mrf.mxu0 }
 0x294   : > { %v5934_v43 = vpop.f32.mrf.mxu0 }
 0x295   : > { %1985 = vmatmul.mubr.f32.gmra.mxu1 %v1598_v32 }
 0x296   : > { %1990 = vmatprep.mubr.f32.mxu1 %v5106_v18  ;;  %v5936_v8 = vpop.f32.mrf.mxu0 }
 0x298   : > { %v5938_v42 = vpop.f32.mrf.mxu0 }
 0x299   : > { %1991 = vmatmul.mubr.f32.gmra.mxu1 %v1599_v34 }
 0x29a   : > { %1996 = vmatprep.mubr.f32.mxu1 %v5106_v18  ;;  %v5947_v46 = vpop.f32.mrf.mxu0 }
 0x29c   : > { %v5955_v49 = vpop.f32.mrf.mxu0 }
 0x29d   : > { %1997 = vmatmul.mubr.f32.gmra.mxu1 %v1600_v19 }
 0x29e   : > { %v5963_v56 = vpop.f32.mrf.mxu0 }
 0x2a0   : > { %v5983_v31 = vpop.f32.mrf.mxu0 }
 0x2a2   : > { %v6000_v32 = vpop.f32.mrf.mxu0 }
 0x321   : > { %v1908_v20 = vpop.f32.mrf.mxu1 }
 0x322   : > { %v1909_v29 = vadd.f32 %v1908_v20, %v1747_v21 }
 0x323   : > { %v1910_v48 = vpop.f32.mrf.mxu1 }
 0x324   : > { %v1911_v52 = vadd.f32 %v1910_v48, %v1749_v5  ;;  %v5958_v50 = vadd.f32 %v5950_v47, %v1909_v29  ;;  %v6015_v5 = vpop.f32.mrf.mxu0 }
 0x325   : > { %v1914_v16 = vpop.f32.mrf.mxu1 }
 0x326   : > { %v5961_v54 = vadd.f32 %v5953_v4, %v1911_v52  ;;  %v1915_v10 = vadd.f32 %v1914_v16, %v1753_v33  ;;  %v2229_v61 = vmul.f32 %v5958_v50, %v5958_v50 }
 0x327   : > { %v1916_v55 = vpop.f32.mrf.mxu1 }
 0x328   : > { %v1917_v58 = vadd.f32 %v1916_v55, %v1755_v51  ;;  %2148 = vmatprep.mubr.f32.mxu0 %v5961_v54  ;;  %v2230_v59 = vmul.f32 %v5961_v54, %v5961_v54  ;;  %v5977_v24 = vadd.f32 %v5950_v47, %v1915_v10 }
 0x329   : > { %v1920_v63 = vpop.f32.mrf.mxu1  ;;  %2149 = vmatmul.mubr.f32.vlgmr.msra.gmra.mxu0 %v5958_v50 }
 0x32a   : > { %v5981_v1 = vadd.f32 %v5953_v4, %v1917_v58  ;;  %v1921_v2 = vadd.f32 %v1920_v63, %v1759_v11  ;;  %2325 = vmatprep.mubr.f32.mxu1 %v2230_v59  ;;  %2563 = vmatpush1.msra.mxu0 %v2081_v14  ;;  %v2231_v9 = vmul.f32 %v5977_v24, %v5977_v24 }
 0x32b   : > { %v1922_v23 = vpop.f32.mrf.mxu1  ;;  %2326 = vmatmul.mubr.f32.vlgmr.msra.gmra.mxu1 %v2229_v61  ;;  %2564 = vmatprep.subr.mxu0 %v2080_v17 }
 0x32c   : > { %v1923_v3 = vadd.f32 %v1922_v23, %v1761_v60  ;;  %2153 = vmatprep.mubr.f32.mxu0 %v5981_v1  ;;  %v2232_v7 = vmul.f32 %v5981_v1, %v5981_v1  ;;  %2804 = vmatpush1.msra.mxu1 %v2081_v14  ;;  %v5992_v25 = vadd.f32 %v5950_v47, %v1921_v2 }
 0x32d   : > { %v1926_v27 = vpop.f32.mrf.mxu1  ;;  %2154 = vmatmul.mubr.f32.gmra.mxu0 %v5977_v24  ;;  %2805 = vmatprep.subr.mxu1 %v2080_v17 }
 0x32e   : > { %v5998_v30 = vadd.f32 %v5953_v4, %v1923_v3  ;;  %v1927_v53 = vadd.f32 %v1926_v27, %v1765_v6  ;;  %2330 = vmatprep.mubr.f32.mxu1 %v2232_v7  ;;  %2565 = vmatpush1.msra.mxu0 %v2079_v26  ;;  %v2233_v36 = vmul.f32 %v5992_v25, %v5992_v25 }
 0x32f   : > { %v1928_v57 = vpop.f32.mrf.mxu1  ;;  %2331 = vmatmul.mubr.f32.gmra.mxu1 %v2231_v9 }
 0x330   : > { %v1929_v0 = vadd.f32 %v1928_v57, %v1767_v39  ;;  %2158 = vmatprep.mubr.f32.mxu0 %v5998_v30  ;;  %v2234_v34 = vmul.f32 %v5998_v30, %v5998_v30  ;;  %2806 = vmatpush1.msra.mxu1 %v2079_v26  ;;  %v6006_v15 = vadd.f32 %v5950_v47, %v1927_v53 }
 0x331   : > { %v1932_v19 = vpop.f32.mrf.mxu1  ;;  %2159 = vmatmul.mubr.f32.gmra.mxu0 %v5992_v25 }
 0x332   : > { %v6012_v38 = vadd.f32 %v5953_v4, %v1929_v0  ;;  %v1933_v37 = vadd.f32 %v1932_v19, %v5926_v13  ;;  %2335 = vmatprep.mubr.f32.mxu1 %v2234_v34  ;;  %v2235_v60 = vmul.f32 %v6006_v15, %v6006_v15 }
 0x333   : > { %v1934_v21 = vpop.f32.mrf.mxu1  ;;  %2336 = vmatmul.mubr.f32.gmra.mxu1 %v2233_v36 }
 0x334   : > { %v1935_v28 = vadd.f32 %v1934_v21, %v5928_v40  ;;  %2163 = vmatprep.mubr.f32.mxu0 %v6012_v38  ;;  %v2236_v33 = vmul.f32 %v6012_v38, %v6012_v38  ;;  %v6022_v51 = vadd.f32 %v5950_v47, %v1933_v37  ;;  %v6031_v40 = vpop.f32.mrf.mxu0 }
 0x335   : > { %v1938_v11 = vpop.f32.mrf.mxu1  ;;  %2164 = vmatmul.mubr.f32.gmra.mxu0 %v6006_v15 }
 0x336   : > { %v6028_v6 = vadd.f32 %v5953_v4, %v1935_v28  ;;  %v1939_v39 = vadd.f32 %v1938_v11, %v5930_v12  ;;  %2340 = vmatprep.mubr.f32.mxu1 %v2236_v33  ;;  %v2237_v12 = vmul.f32 %v6022_v51, %v6022_v51  ;;  %v1813_v52 = vpop.f32.mrf.mxu0 }
 0x337   : > { %v1940_v13 = vpop.f32.mrf.mxu1  ;;  %2341 = vmatmul.mubr.f32.gmra.mxu1 %v2235_v60 }
 0x338   : > { %v1941_v62 = vadd.f32 %v1940_v13, %v5932_v41  ;;  %2168 = vmatprep.mubr.f32.mxu0 %v6028_v6  ;;  %v2238_v22 = vmul.f32 %v6028_v6, %v6028_v6  ;;  %v6038_v35 = vadd.f32 %v5950_v47, %v1939_v39  ;;  %v1815_v17 = vpop.f32.mrf.mxu0 }
 0x339   : > { %v1944_v20 = vpop.f32.mrf.mxu1  ;;  %2169 = vmatmul.mubr.f32.gmra.mxu0 %v6022_v51 }
 0x33a   : > { %v6044_v29 = vadd.f32 %v5953_v4, %v1941_v62  ;;  %v1945_v48 = vadd.f32 %v1944_v20, %v5934_v43  ;;  %2345 = vmatprep.mubr.f32.mxu1 %v2238_v22  ;;  %v2239_v43 = vmul.f32 %v6038_v35, %v6038_v35  ;;  %v1819_v7 = vpop.f32.mrf.mxu0 }
 0x33b   : > { %v1946_v41 = vpop.f32.mrf.mxu1  ;;  %2346 = vmatmul.mubr.f32.gmra.mxu1 %v2237_v12 }
 0x33c   : > { %v1947_v16 = vadd.f32 %v1946_v41, %v5936_v8  ;;  %2173 = vmatprep.mubr.f32.mxu0 %v6044_v29  ;;  %v2240_v10 = vmul.f32 %v6044_v29, %v6044_v29  ;;  %v6052_v55 = vadd.f32 %v5950_v47, %v1945_v48  ;;  %v1821_v19 = vpop.f32.mrf.mxu0 }
 0x33d   : > { %v1950_v14 = vpop.f32.mrf.mxu1  ;;  %2174 = vmatmul.mubr.f32.gmra.mxu0 %v6038_v35 }
 0x33e   : > { %v6058_v58 = vadd.f32 %v5953_v4, %v1947_v16  ;;  %v1951_v59 = vadd.f32 %v1950_v14, %v5938_v42  ;;  %2350 = vmatprep.mubr.f32.mxu1 %v2240_v10  ;;  %v2241_v42 = vmul.f32 %v6052_v55, %v6052_v55  ;;  %v1825_v60 = vpop.f32.mrf.mxu0 }
 0x33f   : > { %v1952_v8 = vpop.f32.mrf.mxu1  ;;  %2351 = vmatmul.mubr.f32.gmra.mxu1 %v2239_v43 }
 0x340   : > { %v1953_v61 = vadd.f32 %v1952_v8, %v5947_v46  ;;  %2178 = vmatprep.mubr.f32.mxu0 %v6058_v58  ;;  %v2242_v63 = vmul.f32 %v6058_v58, %v6058_v58  ;;  %v6066_v2 = vadd.f32 %v5950_v47, %v1951_v59  ;;  %v1827_v48 = vpop.f32.mrf.mxu0 }
 0x341   : > { %v1956_v23 = vpop.f32.mrf.mxu1  ;;  %2179 = vmatmul.mubr.f32.gmra.mxu0 %v6052_v55 }
 0x342   : > { %v6072_v26 = vadd.f32 %v5953_v4, %v1953_v61  ;;  %v1957_v3 = vadd.f32 %v1956_v23, %v5955_v49  ;;  %2355 = vmatprep.mubr.f32.mxu1 %v2242_v63  ;;  %v2243_v49 = vmul.f32 %v6066_v2, %v6066_v2 }
 0x343   : > { %v1958_v46 = vpop.f32.mrf.mxu1  ;;  %2356 = vmatmul.mubr.f32.gmra.mxu1 %v2241_v42 }
 0x344   : > { %v1959_v27 = vadd.f32 %v1958_v46, %v5963_v56  ;;  %2183 = vmatprep.mubr.f32.mxu0 %v6072_v26  ;;  %v2244_v9 = vmul.f32 %v6072_v26, %v6072_v26  ;;  %v6080_v53 = vadd.f32 %v5950_v47, %v1957_v3 }
 0x345   : > { %v1962_v57 = vpop.f32.mrf.mxu1  ;;  %2184 = vmatmul.mubr.f32.gmra.mxu0 %v6066_v2 }
 0x346   : > { %v6086_v0 = vadd.f32 %v5953_v4, %v1959_v27  ;;  %v1963_v34 = vadd.f32 %v1962_v57, %v5983_v31  ;;  %2360 = vmatprep.mubr.f32.mxu1 %v2244_v9  ;;  %v2245_v31 = vmul.f32 %v6080_v53, %v6080_v53 }
 0x347   : > { %v1964_v56 = vpop.f32.mrf.mxu1  ;;  %2361 = vmatmul.mubr.f32.gmra.mxu1 %v2243_v49 }
 0x348   : > { %v1965_v36 = vadd.f32 %v1964_v56, %v6000_v32  ;;  %2188 = vmatprep.mubr.f32.mxu0 %v6086_v0  ;;  %v2246_v37 = vmul.f32 %v6086_v0, %v6086_v0  ;;  %v6094_v21 = vadd.f32 %v5950_v47, %v1963_v34 }
 0x349   : > { %v1968_v28 = vpop.f32.mrf.mxu1  ;;  %2189 = vmatmul.mubr.f32.gmra.mxu0 %v6080_v53 }
 0x34a   : > { %v6100_v33 = vadd.f32 %v5953_v4, %v1965_v36  ;;  %v1969_v11 = vadd.f32 %v1968_v28, %v6015_v5  ;;  %2365 = vmatprep.mubr.f32.mxu1 %v2246_v37  ;;  %v2247_v5 = vmul.f32 %v6094_v21, %v6094_v21 }
 0x34b   : > { %v1970_v32 = vpop.f32.mrf.mxu1  ;;  %2366 = vmatmul.mubr.f32.gmra.mxu1 %v2245_v31 }
 0x34c   : > { %v1971_v39 = vadd.f32 %v1970_v32, %v6031_v40  ;;  %2193 = vmatprep.mubr.f32.mxu0 %v6100_v33  ;;  %v2248_v13 = vmul.f32 %v6100_v33, %v6100_v33  ;;  %v6108_v62 = vadd.f32 %v5950_v47, %v1969_v11 }
 0x34d   : > { %v1974_v22 = vpop.f32.mrf.mxu1  ;;  %2194 = vmatmul.mubr.f32.gmra.mxu0 %v6094_v21 }
 0x34e   : > { %v6114_v20 = vadd.f32 %v5953_v4, %v1971_v39  ;;  %v1975_v12 = vadd.f32 %v1974_v22, %v1813_v52  ;;  %2370 = vmatprep.mubr.f32.mxu1 %v2248_v13  ;;  %v2249_v43 = vmul.f32 %v6108_v62, %v6108_v62 }
 0x34f   : > { %v1976_v40 = vpop.f32.mrf.mxu1  ;;  %2371 = vmatmul.mubr.f32.gmra.mxu1 %v2247_v5 }
 0x350   : > { %v1977_v41 = vadd.f32 %v1976_v40, %v1815_v17  ;;  %2198 = vmatprep.mubr.f32.mxu0 %v6114_v20  ;;  %v2250_v16 = vmul.f32 %v6114_v20, %v6114_v20  ;;  %v6120_v10 = vadd.f32 %v5950_v47, %v1975_v12  ;;  %v1831_v17 = vpop.f32.mrf.mxu0 }
 0x351   : > { %v1980_v14 = vpop.f32.mrf.mxu1  ;;  %2199 = vmatmul.mubr.f32.gmra.mxu0 %v6108_v62 }
 0x352   : > { %v6126_v52 = vadd.f32 %v5953_v4, %v1977_v41  ;;  %v1981_v59 = vadd.f32 %v1980_v14, %v1819_v7  ;;  %2375 = vmatprep.mubr.f32.mxu1 %v2250_v16  ;;  %v2251_v3 = vmul.f32 %v6120_v10, %v6120_v10  ;;  %v1833_v9 = vpop.f32.mrf.mxu0 }
 0x353   : > { %v1982_v8 = vpop.f32.mrf.mxu1  ;;  %2376 = vmatmul.mubr.f32.gmra.mxu1 %v2249_v43 }
 0x354   : > { %v1983_v61 = vadd.f32 %v1982_v8, %v1821_v19  ;;  %2203 = vmatprep.mubr.f32.mxu0 %v6126_v52  ;;  %v2252_v63 = vmul.f32 %v6126_v52, %v6126_v52  ;;  %v6132_v23 = vadd.f32 %v5950_v47, %v1981_v59  ;;  %v1837_v28 = vpop.f32.mrf.mxu0  ;;  %v3535_v8 = vld [vmem:[#allocation10 + $0xf8] sm:$0xff] }
 0x355   : > { %v1986_v42 = vpop.f32.mrf.mxu1  ;;  %2204 = vmatmul.mubr.f32.gmra.mxu0 %v6120_v10  ;;  %3548 = vmatprep.subr.mxu1 %v3535_v8 }
 0x356   : > { %v6138_v46 = vadd.f32 %v5953_v4, %v1983_v61  ;;  %v1987_v7 = vadd.f32 %v1986_v42, %v1825_v60  ;;  %2380 = vmatprep.mubr.f32.mxu1 %v2252_v63  ;;  %v2253_v19 = vmul.f32 %v6132_v23, %v6132_v23  ;;  %v1839_v12 = vpop.f32.mrf.mxu0 }
 0x357   : > { %v1988_v27 = vpop.f32.mrf.mxu1  ;;  %2381 = vmatmul.mubr.f32.gmra.mxu1 %v2251_v3 }
 0x358   : > { %v1989_v57 = vadd.f32 %v1988_v27, %v1827_v48  ;;  %2208 = vmatprep.mubr.f32.mxu0 %v6138_v46  ;;  %v2254_v49 = vmul.f32 %v6138_v46, %v6138_v46  ;;  %v6144_v34 = vadd.f32 %v5950_v47, %v1987_v7 }
 0x359   : > { %v1992_v56 = vpop.f32.mrf.mxu1  ;;  %2209 = vmatmul.mubr.f32.gmra.mxu0 %v6132_v23 }
 0x35a   : > { %v6150_v36 = vadd.f32 %v5953_v4, %v1989_v57  ;;  %v1993_v37 = vadd.f32 %v1992_v56, %v1831_v17  ;;  %2385 = vmatprep.mubr.f32.mxu1 %v2254_v49  ;;  %v2255_v13 = vmul.f32 %v6144_v34, %v6144_v34 }
 0x35b   : > { %v1994_v31 = vpop.f32.mrf.mxu1  ;;  %2386 = vmatmul.mubr.f32.gmra.mxu1 %v2253_v19 }
 0x35c   : > { %v1995_v11 = vadd.f32 %v1994_v31, %v1833_v9  ;;  %2213 = vmatprep.mubr.f32.mxu0 %v6150_v36  ;;  %v2256_v32 = vmul.f32 %v6150_v36, %v6150_v36  ;;  %v6156_v60 = vadd.f32 %v5950_v47, %v1993_v37 }
 0x35d   : > { %v1998_v39 = vpop.f32.mrf.mxu1  ;;  %2214 = vmatmul.mubr.f32.gmra.mxu0 %v6144_v34 }
 0x35e   : > { %v6162_v22 = vadd.f32 %v5953_v4, %v1995_v11  ;;  %v1999_v5 = vadd.f32 %v1998_v39, %v1837_v28  ;;  %2390 = vmatprep.mubr.f32.mxu1 %v2256_v32  ;;  %v2257_v14 = vmul.f32 %v6156_v60, %v6156_v60 }
 0x35f   : > { %v2000_v40 = vpop.f32.mrf.mxu1  ;;  %2391 = vmatmul.mubr.f32.gmra.mxu1 %v2255_v13 }
 0x360   : > { %v2001_v48 = vadd.f32 %v2000_v40, %v1839_v12  ;;  %2218 = vmatprep.mubr.f32.mxu0 %v6162_v22  ;;  %v2258_v41 = vmul.f32 %v6162_v22, %v6162_v22  ;;  %v6168_v16 = vadd.f32 %v5950_v47, %v1999_v5 }
 0x361   : > { %2219 = vmatmul.mubr.f32.gmra.mxu0 %v6156_v60 }
 0x362   : > { %v6174_v43 = vadd.f32 %v5953_v4, %v2001_v48  ;;  %2395 = vmatprep.mubr.f32.mxu1 %v2258_v41  ;;  %v2259_v47 = vmul.f32 %v6168_v16, %v6168_v16  ;;  %v3298_v4 = vld [vmem:[#allocation8 + $0xf8] sm:$0xff] }
 0x363   : > { %2396 = vmatmul.mubr.f32.gmra.mxu1 %v2257_v14  ;;  %3343 = vmatprep.subr.mxu0 %v3298_v4 }
 0x364   : > { %2223 = vmatprep.mubr.f32.mxu0 %v6174_v43  ;;  %v2260_v59 = vmul.f32 %v6174_v43, %v6174_v43 }
 0x365   : > { %2224 = vmatmul.mubr.f32.gmra.mxu0 %v6168_v16 }
 0x366   : > { %2400 = vmatprep.mubr.f32.mxu1 %v2260_v59  ;;  %2598 = vmatprep.mubr.f32.mxu0 %v5106_v18 }
 0x367   : > { %2401 = vmatmul.mubr.f32.gmra.mxu1 %v2259_v47 }
 0x368   : > { %2839 = vmatprep.mubr.f32.mxu1 %v5106_v18 }
 0x3e9   : > { %v4216_v17 = vpop.f32.mrf.mxu0 }
 0x3eb   : > { %v4217_v61 = vpop.f32.mrf.mxu0  ;;  %v4296_v63 = vpop.f32.mrf.mxu1 }
 0x3ec   : > { %v6184_v42 = vadd.f32 %v4217_v61, %v4216_v17 }
 0x3ed   : > { %v4219_v3 = vpop.f32.mrf.mxu0  ;;  %v4297_v7 = vpop.f32.mrf.mxu1 }
 0x3ee   : > { %v2406_v27 = vmul.f32 %v6184_v42, %v6184_v42  ;;  %v4298_v9 = vadd.f32 %v4297_v7, %v4296_v63 }
 0x3ef   : > { %v4220_v57 = vpop.f32.mrf.mxu0  ;;  %v4299_v49 = vpop.f32.mrf.mxu1 }
 0x3f0   : > { %v2422_v56 = vsub.f32 %v4298_v9, %v2406_v27  ;;  %v6188_v19 = vadd.f32 %v4220_v57, %v4219_v3 }
 0x3f1   : > { %v4222_v37 = vpop.f32.mrf.mxu0  ;;  %v4300_v28 = vpop.f32.mrf.mxu1 }
 0x3f2   : > { %v2438_v31 = vmax.f32 %v2422_v56, 0.0  ;;  %v2407_v11 = vmul.f32 %v6188_v19, %v6188_v19  ;;  %v4301_v32 = vadd.f32 %v4300_v28, %v4299_v49 }
 0x3f3   : > { %v4223_v39 = vpop.f32.mrf.mxu0  ;;  %v4302_v13 = vpop.f32.mrf.mxu1 }
 0x3f4   : > { %v2454_v5 = vadd.f32 1e-05, %v2438_v31  ;;  %v2423_v12 = vsub.f32 %v4301_v32, %v2407_v11  ;;  %v6192_v40 = vadd.f32 %v4223_v39, %v4222_v37 }
 0x3f5   : > { %v4225_v48 = vpop.f32.mrf.mxu0  ;;  %v4303_v41 = vpop.f32.mrf.mxu1 }
 0x3f6   : > { %4702 = vrsqrt.f32 %v2454_v5  ;;  %v2439_v14 = vmax.f32 %v2423_v12, 0.0  ;;  %v2408_v59 = vmul.f32 %v6192_v40, %v6192_v40  ;;  %v4304_v47 = vadd.f32 %v4303_v41, %v4302_v13 }
 0x3f7   : > { %v4226_v4 = vpop.f32.mrf.mxu0  ;;  %v4305_v8 = vpop.f32.mrf.mxu1 }
 0x3f8   : > { %v2455_v17 = vadd.f32 1e-05, %v2439_v14  ;;  %v2424_v61 = vsub.f32 %v4304_v47, %v2408_v59  ;;  %v6196_v63 = vadd.f32 %v4226_v4, %v4225_v48 }
 0x3f9   : > { %v4228_v3 = vpop.f32.mrf.mxu0  ;;  %v4306_v7 = vpop.f32.mrf.mxu1 }
 0x3fa   : > { %4704 = vrsqrt.f32 %v2455_v17  ;;  %v2440_v27 = vmax.f32 %v2424_v61, 0.0  ;;  %v2409_v9 = vmul.f32 %v6196_v63, %v6196_v63  ;;  %v4307_v57 = vadd.f32 %v4306_v7, %v4305_v8 }
 0x3fb   : > { %v4229_v49 = vpop.f32.mrf.mxu0  ;;  %v4308_v56 = vpop.f32.mrf.mxu1 }
 0x3fc   : > { %v2456_v37 = vadd.f32 1e-05, %v2440_v27  ;;  %v2425_v28 = vsub.f32 %v4307_v57, %v2409_v9  ;;  %v6200_v31 = vadd.f32 %v4229_v49, %v4228_v3  ;;  %v3297_v3 = vld [vmem:[#allocation8 + $0xf0] sm:$0xff]  ;;  %v3296_v57 = vld [vmem:[#allocation8 + $0xe8] sm:$0xff] }
 0x3fd   : > { %v4231_v11 = vpop.f32.mrf.mxu0  ;;  %v4309_v32 = vpop.f32.mrf.mxu1 }
 0x3fe   : > { %4706 = vrsqrt.f32 %v2456_v37  ;;  %v2441_v39 = vmax.f32 %v2425_v28, 0.0  ;;  %v2410_v13 = vmul.f32 %v6200_v31, %v6200_v31  ;;  %v4310_v5 = vadd.f32 %v4309_v32, %v4308_v56 }
 0x3ff   : > { %v4232_v12 = vpop.f32.mrf.mxu0  ;;  %v4311_v48 = vpop.f32.mrf.mxu1 }
 0x400   : > { %v2457_v41 = vadd.f32 1e-05, %v2441_v39  ;;  %v2426_v14 = vsub.f32 %v4310_v5, %v2410_v13  ;;  %v6204_v59 = vadd.f32 %v4232_v12, %v4231_v11  ;;  %v3295_v11 = vld [vmem:[#allocation8 + $0xe0] sm:$0xff]  ;;  %v3294_v13 = vld [vmem:[#allocation8 + $0xd8] sm:$0xff] }
 0x401   : > { %v4234_v47 = vpop.f32.mrf.mxu0  ;;  %v4312_v4 = vpop.f32.mrf.mxu1 }
 0x402   : > { %4708 = vrsqrt.f32 %v2457_v41  ;;  %v2442_v8 = vmax.f32 %v2426_v14, 0.0  ;;  %v2411_v17 = vmul.f32 %v6204_v59, %v6204_v59  ;;  %v4313_v61 = vadd.f32 %v4312_v4, %v4311_v48 }
 0x403   : > { %v4703_v7 = vpop.eup %4702  ;;  %v4235_v27 = vpop.f32.mrf.mxu0 }
 0x404   : > { %v4314_v9 = vpop.f32.mrf.mxu1  ;;  %v2458_v49 = vadd.f32 1e-05, %v2442_v8  ;;  %v2427_v56 = vsub.f32 %v4313_v61, %v2411_v17  ;;  %v6208_v37 = vadd.f32 %v4235_v27, %v4234_v47  ;;  %4011 = vmatmul.mubr.msk.f32.vlgmr.msra.gmra.mxu0 %vm1016_vm0, %v4703_v7  ;;  %v2695_v28 = vmul.f32 %v4703_v7, %v6184_v42  ;;  %v3534_v8 = vld [vmem:[#allocation10 + $0xf0] sm:$0xff]  ;;  %v3533_v7 = vld [vmem:[#allocation10 + $0xe8] sm:$0xff] }
 0x405   : > { %v4237_v32 = vpop.f32.mrf.mxu0  ;;  %2604 = vmatprep.mubr.f32.mxu0 %v5106_v18  ;;  %3344 = vmatpush1.msra.mxu0 %v3297_v3  ;;  %v3293_v27 = vld [vmem:[#allocation8 + $0xd0] sm:$0xff] }
 0x406   : > { %v4315_v39 = vpop.f32.mrf.mxu1  ;;  %4710 = vrsqrt.f32 %v2458_v49  ;;  %v2443_v5 = vmax.f32 %v2427_v56, 0.0  ;;  %v2412_v12 = vmul.f32 %v6208_v37, %v6208_v37  ;;  %3345 = vmatprep.subr.mxu0 %v3296_v57  ;;  %v2711_v4 = vsub.f32 0.0, %v2695_v28  ;;  %v3532_v49 = vld [vmem:[#allocation10 + $0xe0] sm:$0xff] }
 0x407   : > { %v4316_v48 = vadd.f32 %v4315_v39, %v4314_v9  ;;  %v4705_v41 = vpop.eup %4704  ;;  %v4238_v14 = vpop.f32.mrf.mxu0  ;;  %3346 = vmatpush1.msra.mxu0 %v3295_v11 }
 0x408   : > { %v4317_v47 = vpop.f32.mrf.mxu1  ;;  %v2459_v42 = vadd.f32 1e-05, %v2443_v5  ;;  %v6215_v61 = vadd.f32 %v4238_v14, %v4237_v32  ;;  %4012 = vmatmul.mubr.msk.f32.gmra.mxu0 %vm1016_vm0, %v4705_v41  ;;  %v2696_v3 = vmul.f32 %v4705_v41, %v6188_v19  ;;  %3347 = vmatprep.subr.mxu0 %v3294_v13  ;;  %v3292_v5 = vld [vmem:[#allocation8 + $0xc8] sm:$0xff] }
 0x409   : > { %v2428_v17 = vsub.f32 %v4316_v48, %v2412_v12  ;;  %4027 = vmatmul.mubr.msk.f32.vlgmr.msra.gmra.mxu1 %vm1016_vm0, %v2711_v4  ;;  %v4240_v9 = vpop.f32.mrf.mxu0  ;;  %2610 = vmatprep.mubr.f32.mxu0 %v5106_v18  ;;  %v3531_v4 = vld [vmem:[#allocation10 + $0xd8] sm:$0xff] }
 0x40a   : > { %v4318_v57 = vpop.f32.mrf.mxu1  ;;  %4712 = vrsqrt.f32 %v2459_v42  ;;  %v2413_v28 = vmul.f32 %v6215_v61, %v6215_v61  ;;  %2845 = vmatprep.mubr.f32.mxu1 %v5106_v18  ;;  %3549 = vmatpush1.msra.mxu1 %v3534_v8  ;;  %v2712_v13 = vsub.f32 0.0, %v2696_v3 }
 0x40b   : > { %v2444_v56 = vmax.f32 %v2428_v17, 0.0  ;;  %v4319_v11 = vadd.f32 %v4318_v57, %v4317_v47  ;;  %v4707_v19 = vpop.eup %4706  ;;  %v4241_v32 = vpop.f32.mrf.mxu0  ;;  %3550 = vmatprep.subr.mxu1 %v3533_v7  ;;  %3348 = vmatpush1.msra.mxu0 %v3293_v27  ;;  %v3291_v47 = vld [vmem:[#allocation8 + $0xc0] sm:$0xff]  ;;  %v3290_v17 = vld [vmem:[#allocation8 + $0xb8] sm:$0xff] }
 0x40c   : > { %v4320_v39 = vpop.f32.mrf.mxu1  ;;  %v6224_v41 = vadd.f32 %v4241_v32, %v4240_v9  ;;  %4013 = vmatmul.mubr.msk.f32.gmra.mxu0 %vm1016_vm0, %v4707_v19  ;;  %v2697_v14 = vmul.f32 %v4707_v19, %v6192_v40  ;;  %3551 = vmatpush1.msra.mxu1 %v3532_v49 }
 0x40d   : > { %v2460_v12 = vadd.f32 1e-05, %v2444_v56  ;;  %v2429_v48 = vsub.f32 %v4319_v11, %v2413_v28  ;;  %4028 = vmatmul.mubr.msk.f32.gmra.mxu1 %vm1016_vm0, %v2712_v13  ;;  %v4243_v8 = vpop.f32.mrf.mxu0  ;;  %2616 = vmatprep.mubr.f32.mxu0 %v5106_v18  ;;  %v3289_v56 = vld [vmem:[#allocation8 + $0xb0] sm:$0xff]  ;;  %v3288_v13 = vld [vmem:[#allocation8 + $0xa8] sm:$0xff] }
 0x40e   : > { %v4321_v42 = vpop.f32.mrf.mxu1  ;;  %v2414_v7 = vmul.f32 %v6224_v41, %v6224_v41  ;;  %2851 = vmatprep.mubr.f32.mxu1 %v5106_v18  ;;  %3349 = vmatprep.subr.mxu0 %v3292_v5  ;;  %v2713_v49 = vsub.f32 0.0, %v2697_v14 }
 0x40f   : > { %4714 = vrsqrt.f32 %v2460_v12  ;;  %v2445_v3 = vmax.f32 %v2429_v48, 0.0  ;;  %v4322_v27 = vadd.f32 %v4321_v42, %v4320_v39  ;;  %v4709_v40 = vpop.eup %4708  ;;  %v4244_v9 = vpop.f32.mrf.mxu0  ;;  %3350 = vmatpush1.msra.mxu0 %v3291_v47  ;;  %3552 = vmatprep.subr.mxu1 %v3531_v4  ;;  %v3530_v39 = vld [vmem:[#allocation10 + $0xd0] sm:$0xff]  ;;  %v3529_v48 = vld [vmem:[#allocation10 + $0xc8] sm:$0xff] }
 0x410   : > { %v4323_v57 = vpop.f32.mrf.mxu1  ;;  %v6233_v19 = vadd.f32 %v4244_v9, %v4243_v8  ;;  %4014 = vmatmul.mubr.msk.f32.gmra.mxu0 %vm1016_vm0, %v4709_v40  ;;  %v2698_v32 = vmul.f32 %v4709_v40, %v6196_v63  ;;  %3351 = vmatprep.subr.mxu0 %v3290_v17 }
 0x411   : > { %v2461_v28 = vadd.f32 1e-05, %v2445_v3  ;;  %v2430_v11 = vsub.f32 %v4322_v27, %v2414_v7  ;;  %4029 = vmatmul.mubr.msk.f32.gmra.mxu1 %vm1016_vm0, %v2713_v49  ;;  %v4246_v5 = vpop.f32.mrf.mxu0  ;;  %2622 = vmatprep.mubr.f32.mxu0 %v5106_v18  ;;  %v3287_v3 = vld [vmem:[#allocation8 + $0xa0] sm:$0xff]  ;;  %v3286_v49 = vld [vmem:[#allocation8 + $0x98] sm:$0xff] }
 0x412   : > { %v4324_v12 = vpop.f32.mrf.mxu1  ;;  %v2415_v47 = vmul.f32 %v6233_v19, %v6233_v19  ;;  %2857 = vmatprep.mubr.f32.mxu1 %v5106_v18  ;;  %3352 = vmatpush1.msra.mxu0 %v3289_v56  ;;  %v2714_v17 = vsub.f32 0.0, %v2698_v32 }
 0x413   : > { %4716 = vrsqrt.f32 %v2461_v28  ;;  %v2446_v14 = vmax.f32 %v2430_v11, 0.0  ;;  %v4325_v4 = vadd.f32 %v4324_v12, %v4323_v57  ;;  %v4711_v63 = vpop.eup %4710  ;;  %v4247_v8 = vpop.f32.mrf.mxu0  ;;  %3553 = vmatpush1.msra.mxu1 %v3530_v39  ;;  %3353 = vmatprep.subr.mxu0 %v3288_v13  ;;  %v3528_v57 = vld [vmem:[#allocation10 + $0xc0] sm:$0xff]  ;;  %v3527_v11 = vld [vmem:[#allocation10 + $0xb8] sm:$0xff] }
 0x414   : > { %v4326_v42 = vpop.f32.mrf.mxu1  ;;  %v6242_v40 = vadd.f32 %v4247_v8, %v4246_v5  ;;  %4015 = vmatmul.mubr.msk.f32.gmra.mxu0 %vm1016_vm0, %v4711_v63  ;;  %v2699_v9 = vmul.f32 %v4711_v63, %v6200_v31  ;;  %3554 = vmatprep.subr.mxu1 %v3529_v48 }
 0x415   : > { %v2462_v7 = vadd.f32 1e-05, %v2446_v14  ;;  %v2431_v27 = vsub.f32 %v4325_v4, %v2415_v47  ;;  %4030 = vmatmul.mubr.msk.f32.gmra.mxu1 %vm1016_vm0, %v2714_v17  ;;  %v4249_v56 = vpop.f32.mrf.mxu0  ;;  %2628 = vmatprep.mubr.f32.mxu0 %v5106_v18  ;;  %v3285_v14 = vld [vmem:[#allocation8 + $0x90] sm:$0xff]  ;;  %v3284_v17 = vld [vmem:[#allocation8 + $0x88] sm:$0xff] }
 0x416   : > { %v4327_v28 = vpop.f32.mrf.mxu1  ;;  %v2416_v39 = vmul.f32 %v6242_v40, %v6242_v40  ;;  %2863 = vmatprep.mubr.f32.mxu1 %v5106_v18  ;;  %3354 = vmatpush1.msra.mxu0 %v3287_v3  ;;  %v2715_v48 = vsub.f32 0.0, %v2699_v9 }
 0x417   : > { %4718 = vrsqrt.f32 %v2462_v7  ;;  %v2447_v32 = vmax.f32 %v2431_v27, 0.0  ;;  %v4328_v13 = vadd.f32 %v4327_v28, %v4326_v42  ;;  %v4713_v31 = vpop.eup %4712  ;;  %v4250_v5 = vpop.f32.mrf.mxu0  ;;  %3355 = vmatprep.subr.mxu0 %v3286_v49  ;;  %3555 = vmatpush1.msra.mxu1 %v3528_v57  ;;  %v3526_v42 = vld [vmem:[#allocation10 + $0xb0] sm:$0xff] }
 0x418   : > { %v4329_v12 = vpop.f32.mrf.mxu1  ;;  %v6251_v63 = vadd.f32 %v4250_v5, %v4249_v56  ;;  %4016 = vmatmul.mubr.msk.f32.gmra.mxu0 %vm1016_vm0, %v4713_v31  ;;  %v2700_v8 = vmul.f32 %v4713_v31, %v6204_v59  ;;  %3556 = vmatprep.subr.mxu1 %v3527_v11  ;;  %v3283_v11 = vld [vmem:[#allocation8 + $0x80] sm:$0xff]  ;;  %v3282_v5 = vld [vmem:[#allocation8 + $0x78] sm:$0xff] }
 0x419   : > { %v2463_v47 = vadd.f32 1e-05, %v2447_v32  ;;  %v2432_v4 = vsub.f32 %v4328_v13, %v2416_v39  ;;  %4031 = vmatmul.mubr.msk.f32.gmra.mxu1 %vm1016_vm0, %v2715_v48  ;;  %v4252_v3 = vpop.f32.mrf.mxu0  ;;  %2634 = vmatprep.mubr.f32.mxu0 %v5106_v18 }
 0x41a   : > { %v4330_v7 = vpop.f32.mrf.mxu1  ;;  %v2417_v9 = vmul.f32 %v6251_v63, %v6251_v63  ;;  %2869 = vmatprep.mubr.f32.mxu1 %v5106_v18  ;;  %3356 = vmatpush1.msra.mxu0 %v3285_v14  ;;  %v2716_v28 = vsub.f32 0.0, %v2700_v8 }
 0x41b   : > { %4720 = vrsqrt.f32 %v2463_v47  ;;  %v2448_v27 = vmax.f32 %v2432_v4, 0.0  ;;  %v4331_v49 = vadd.f32 %v4330_v7, %v4329_v12  ;;  %v4253_v59 = vpop.f32.mrf.mxu0  ;;  %3357 = vmatprep.subr.mxu0 %v3284_v17  ;;  %3557 = vmatpush1.msra.mxu1 %v3526_v42 }
 0x41c   : > { %v4715_v57 = vpop.eup %4714  ;;  %v4332_v56 = vpop.f32.mrf.mxu1  ;;  %v6260_v13 = vadd.f32 %v4253_v59, %v4252_v3  ;;  %3358 = vmatpush1.msra.mxu0 %v3283_v11  ;;  %v3281_v3 = vld [vmem:[#allocation8 + $0x70] sm:$0xff] }
 0x41d   : > { %v2464_v32 = vadd.f32 1e-05, %v2448_v27  ;;  %v2433_v39 = vsub.f32 %v4331_v49, %v2417_v9  ;;  %4017 = vmatmul.mubr.msk.f32.gmra.mxu0 %vm1016_vm0, %v4715_v57  ;;  %v2701_v31 = vmul.f32 %v4715_v57, %v6208_v37  ;;  %4032 = vmatmul.mubr.msk.f32.gmra.mxu1 %vm1016_vm0, %v2716_v28  ;;  %v4255_v12 = vpop.f32.mrf.mxu0  ;;  %v3280_v57 = vld [vmem:[#allocation8 + $0x68] sm:$0xff] }
 0x41e   : > { %v4333_v48 = vpop.f32.mrf.mxu1  ;;  %2640 = vmatprep.mubr.f32.mxu0 %v5106_v18  ;;  %v2418_v47 = vmul.f32 %v6260_v13, %v6260_v13  ;;  %2875 = vmatprep.mubr.f32.mxu1 %v5106_v18 }
 0x41f   : > { %4722 = vrsqrt.f32 %v2464_v32  ;;  %v2449_v14 = vmax.f32 %v2433_v39, 0.0  ;;  %v4334_v4 = vadd.f32 %v4333_v48, %v4332_v56  ;;  %v4256_v17 = vpop.f32.mrf.mxu0  ;;  %v2717_v37 = vsub.f32 0.0, %v2701_v31  ;;  %3359 = vmatprep.subr.mxu0 %v3282_v5 }
 0x420   : > { %v4717_v8 = vpop.eup %4716  ;;  %v4335_v42 = vpop.f32.mrf.mxu1  ;;  %v6269_v9 = vadd.f32 %v4256_v17, %v4255_v12  ;;  %3360 = vmatpush1.msra.mxu0 %v3281_v3 }
 0x421   : > { %v2465_v7 = vadd.f32 1e-05, %v2449_v14  ;;  %v2434_v27 = vsub.f32 %v4334_v4, %v2418_v47  ;;  %4018 = vmatmul.mubr.msk.f32.gmra.mxu0 %vm1016_vm0, %v4717_v8  ;;  %v2702_v49 = vmul.f32 %v4717_v8, %v6215_v61  ;;  %4033 = vmatmul.mubr.msk.f32.gmra.mxu1 %vm1016_vm0, %v2717_v37  ;;  %v4258_v59 = vpop.f32.mrf.mxu0 }
 0x422   : > { %v4336_v56 = vpop.f32.mrf.mxu1  ;;  %2646 = vmatprep.mubr.f32.mxu0 %v5106_v18  ;;  %v2419_v11 = vmul.f32 %v6269_v9, %v6269_v9  ;;  %2881 = vmatprep.mubr.f32.mxu1 %v5106_v18 }
 0x423   : > { %4724 = vrsqrt.f32 %v2465_v7  ;;  %v2450_v28 = vmax.f32 %v2434_v27, 0.0  ;;  %v4337_v32 = vadd.f32 %v4336_v56, %v4335_v42  ;;  %v4259_v31 = vpop.f32.mrf.mxu0  ;;  %v2718_v61 = vsub.f32 0.0, %v2702_v49  ;;  %3361 = vmatprep.subr.mxu0 %v3280_v57 }
 0x424   : > { %v4719_v39 = vpop.eup %4718  ;;  %v4338_v5 = vpop.f32.mrf.mxu1  ;;  %v6278_v14 = vadd.f32 %v4259_v31, %v4258_v59 }
 0x425   : > { %v2466_v12 = vadd.f32 1e-05, %v2450_v28  ;;  %v2435_v48 = vsub.f32 %v4337_v32, %v2419_v11  ;;  %4019 = vmatmul.mubr.msk.f32.gmra.mxu0 %vm1016_vm0, %v4719_v39  ;;  %v2703_v47 = vmul.f32 %v4719_v39, %v6224_v41  ;;  %4034 = vmatmul.mubr.msk.f32.gmra.mxu1 %vm1016_vm0, %v2718_v61  ;;  %v4261_v4 = vpop.f32.mrf.mxu0 }
 0x426   : > { %v4339_v8 = vpop.f32.mrf.mxu1  ;;  %2652 = vmatprep.mubr.f32.mxu0 %v5106_v18  ;;  %v2420_v42 = vmul.f32 %v6278_v14, %v6278_v14  ;;  %2887 = vmatprep.mubr.f32.mxu1 %v5106_v18 }
 0x427   : > { %4726 = vrsqrt.f32 %v2466_v12  ;;  %v2451_v17 = vmax.f32 %v2435_v48, 0.0  ;;  %v4340_v37 = vadd.f32 %v4339_v8, %v4338_v5  ;;  %v4262_v7 = vpop.f32.mrf.mxu0  ;;  %v2719_v49 = vsub.f32 0.0, %v2703_v47 }
 0x428   : > { %v4721_v3 = vpop.eup %4720  ;;  %v4341_v27 = vpop.f32.mrf.mxu1  ;;  %v4263_v59 = vadd.f32 %v4262_v7, %v4261_v4 }
 0x429   : > { %v2467_v57 = vadd.f32 1e-05, %v2451_v17  ;;  %v2436_v41 = vsub.f32 %v4340_v37, %v2420_v42  ;;  %4020 = vmatmul.mubr.msk.f32.gmra.mxu0 %vm1016_vm0, %v4721_v3  ;;  %v2704_v56 = vmul.f32 %v4721_v3, %v6233_v19  ;;  %4035 = vmatmul.mubr.msk.f32.gmra.mxu1 %vm1016_vm0, %v2719_v49 }
 0x42a   : > { %v4342_v28 = vpop.f32.mrf.mxu1  ;;  %2658 = vmatprep.mubr.f32.mxu0 %v5106_v18  ;;  %v2421_v32 = vmul.f32 %v4263_v59, %v4263_v59  ;;  %2893 = vmatprep.mubr.f32.mxu1 %v5106_v18 }
 0x42b   : > { %4728 = vrsqrt.f32 %v2467_v57  ;;  %v2452_v11 = vmax.f32 %v2436_v41, 0.0  ;;  %v4343_v39 = vadd.f32 %v4342_v28, %v4341_v27  ;;  %v2720_v5 = vsub.f32 0.0, %v2704_v56  ;;  %v3279_v28 = vld [vmem:[#allocation8 + $0x60] sm:$0xff] }
 0x42c   : > { %v4723_v31 = vpop.eup %4722  ;;  %3362 = vmatpush1.msra.mxu0 %v3279_v28  ;;  %v3319_v28 = vld [vmem:[#allocation8 + $0x1a0] sm:$0xff] }
 0x42d   : > { %v2468_v61 = vadd.f32 1e-05, %v2452_v11  ;;  %v2437_v12 = vsub.f32 %v4343_v39, %v2421_v32  ;;  %4021 = vmatmul.mubr.msk.f32.gmra.mxu0 %vm1016_vm0, %v4723_v31  ;;  %v2705_v48 = vmul.f32 %v4723_v31, %v6242_v40  ;;  %4036 = vmatmul.mubr.msk.f32.gmra.mxu1 %vm1016_vm0, %v2720_v5  ;;  %v3525_v11 = vld [vmem:[#allocation10 + $0xa8] sm:$0xff]  ;;  %v3277_v32 = vld [vmem:[#allocation8 + $0x50] sm:$0xff]  ;;  %v3524_v39 = vld [vmem:[#allocation10 + $0xa0] sm:$0xff] }
 0x42e   : > { %2664 = vmatprep.mubr.f32.mxu0 %v5106_v18  ;;  %2899 = vmatprep.mubr.f32.mxu1 %v5106_v18  ;;  %v3276_v31 = vld [vmem:[#allocation8 + $0x48] sm:$0xff]  ;;  %v3274_v5 = vld [vmem:[#allocation8 + $0x38] sm:$0xff] }
 0x42f   : > { %4730 = vrsqrt.f32 %v2468_v61  ;;  %v2453_v19 = vmax.f32 %v2437_v12, 0.0  ;;  %v2721_v47 = vsub.f32 0.0, %v2705_v48  ;;  %3558 = vmatprep.subr.mxu1 %v3525_v11  ;;  %v3273_v61 = vld [vmem:[#allocation8 + $0x30] sm:$0xff]  ;;  %v3272_v12 = vld [vmem:[#allocation8 + $0x28] sm:$0xff]  ;;  %v3271_v48 = vld [vmem:[#allocation8 + $0x20] sm:$0xff] }
 0x430   : > { %v4725_v4 = vpop.eup %4724  ;;  %3559 = vmatpush1.msra.mxu1 %v3524_v39  ;;  %v3318_v11 = vld [vmem:[#allocation8 + $0x198] sm:$0xff]  ;;  %v3317_v39 = vld [vmem:[#allocation8 + $0x190] sm:$0xff] }
 0x431   : > { %v2469_v8 = vadd.f32 1e-05, %v2453_v19  ;;  %4022 = vmatmul.mubr.msk.f32.gmra.mxu0 %vm1016_vm0, %v4725_v4  ;;  %v2706_v17 = vmul.f32 %v4725_v4, %v6251_v63  ;;  %4037 = vmatmul.mubr.msk.f32.gmra.mxu1 %vm1016_vm0, %v2721_v47  ;;  %v3270_v19 = vld [vmem:[#allocation8 + $0x18] sm:$0xff]  ;;  %v3269_v47 = vld [vmem:[#allocation8 + $0x10] sm:$0xff]  ;;  %v3268_v4 = vld [vmem:[#allocation8 + $0x8] sm:$0xff] }
 0x432   : > { %2670 = vmatprep.mubr.f32.mxu0 %v5106_v18  ;;  %2905 = vmatprep.mubr.f32.mxu1 %v5106_v18 }
 0x433   : > { %4732 = vrsqrt.f32 %v2469_v8  ;;  %v2722_v40 = vsub.f32 0.0, %v2706_v17  ;;  %v3267_v8 = vld [vmem:[#allocation8] sm:$0xff]  ;;  %v3330_v17 = vld [vmem:[#allocation8 + $0x1f8] sm:$0xff] }
 0x434   : > { %v4727_v42 = vpop.eup %4726 }
 0x435   : > { %4023 = vmatmul.mubr.msk.f32.gmra.mxu0 %vm1016_vm0, %v4727_v42  ;;  %v2707_v37 = vmul.f32 %v4727_v42, %v6260_v13  ;;  %4038 = vmatmul.mubr.msk.f32.gmra.mxu1 %vm1016_vm0, %v2722_v40  ;;  %v3329_v40 = vld [vmem:[#allocation8 + $0x1f0] sm:$0xff]  ;;  %v3328_v42 = vld [vmem:[#allocation8 + $0x1e8] sm:$0xff] }
 0x436   : > { %2676 = vmatprep.mubr.f32.mxu0 %v5106_v18  ;;  %2911 = vmatprep.mubr.f32.mxu1 %v5106_v18 }
 0x437   : > { %v2723_v63 = vsub.f32 0.0, %v2707_v37  ;;  %v3327_v37 = vld [vmem:[#allocation8 + $0x1e0] sm:$0xff] }
 0x438   : > { %v4729_v3 = vpop.eup %4728 }
 0x439   : > { %4024 = vmatmul.mubr.msk.f32.gmra.mxu0 %vm1016_vm0, %v4729_v3  ;;  %v2708_v7 = vmul.f32 %v4729_v3, %v6269_v9  ;;  %4039 = vmatmul.mubr.msk.f32.gmra.mxu1 %vm1016_vm0, %v2723_v63  ;;  %v3326_v63 = vld [vmem:[#allocation8 + $0x1d8] sm:$0xff]  ;;  %v3325_v3 = vld [vmem:[#allocation8 + $0x1d0] sm:$0xff] }
 0x43a   : > { %2682 = vmatprep.mubr.f32.mxu0 %v5106_v18  ;;  %2917 = vmatprep.mubr.f32.mxu1 %v5106_v18 }
 0x43b   : > { %v2724_v27 = vsub.f32 0.0, %v2708_v7  ;;  %v3324_v7 = vld [vmem:[#allocation8 + $0x1c8] sm:$0xff] }
 0x43c   : > { %v4731_v13 = vpop.eup %4730 }
 0x43d   : > { %4025 = vmatmul.mubr.msk.f32.gmra.mxu0 %vm1016_vm0, %v4731_v13  ;;  %v2709_v49 = vmul.f32 %v4731_v13, %v6278_v14  ;;  %4040 = vmatmul.mubr.msk.f32.gmra.mxu1 %vm1016_vm0, %v2724_v27  ;;  %v3278_v14 = vld [vmem:[#allocation8 + $0x58] sm:$0xff]  ;;  %v3323_v27 = vld [vmem:[#allocation8 + $0x1c0] sm:$0xff] }
 0x43e   : > { %2688 = vmatprep.mubr.f32.mxu0 %v5106_v18  ;;  %2923 = vmatprep.mubr.f32.mxu1 %v5106_v18  ;;  %v3322_v13 = vld [vmem:[#allocation8 + $0x1b8] sm:$0xff] }
 0x43f   : > { %v2725_v57 = vsub.f32 0.0, %v2709_v49  ;;  %3363 = vmatprep.subr.mxu0 %v3278_v14  ;;  %v3523_v49 = vld [vmem:[#allocation10 + $0x98] sm:$0xff]  ;;  %v3520_v14 = vld [vmem:[#allocation10 + $0x80] sm:$0xff] }
 0x440   : > { %v4733_v9 = vpop.eup %4732  ;;  %3364 = vmatpush1.msra.mxu0 %v3277_v32  ;;  %3560 = vmatprep.subr.mxu1 %v3523_v49  ;;  %v3519_v32 = vld [vmem:[#allocation10 + $0x78] sm:$0xff]  ;;  %v3307_v49 = vld [vmem:[#allocation8 + $0x140] sm:$0xff] }
 0x441   : > { %4026 = vmatmul.mubr.msk.f32.gmra.mxu0 %vm1016_vm0, %v4733_v9  ;;  %v2710_v41 = vmul.f32 %v4733_v9, %v4263_v59  ;;  %4041 = vmatmul.mubr.msk.f32.gmra.mxu1 %vm1016_vm0, %v2725_v57  ;;  %v3275_v59 = vld [vmem:[#allocation8 + $0x40] sm:$0xff]  ;;  %v3321_v57 = vld [vmem:[#allocation8 + $0x1b0] sm:$0xff] }
 0x442   : > { %2929 = vmatprep.mubr.f32.mxu1 %v5106_v18  ;;  %3365 = vmatprep.subr.mxu0 %v3276_v31  ;;  %v3522_v9 = vld [vmem:[#allocation10 + $0x90] sm:$0xff] }
 0x443   : > { %v2726_v56 = vsub.f32 0.0, %v2710_v41  ;;  %3366 = vmatpush1.msra.mxu0 %v3275_v59  ;;  %v3320_v41 = vld [vmem:[#allocation8 + $0x1a8] sm:$0xff]  ;;  %3561 = vmatpush1.msra.mxu1 %v3522_v9  ;;  %v3518_v31 = vld [vmem:[#allocation10 + $0x70] sm:$0xff]  ;;  %v3306_v9 = vld [vmem:[#allocation8 + $0x138] sm:$0xff] }
 0x444   : > { %3367 = vmatprep.subr.mxu0 %v3274_v5  ;;  %v3316_v59 = vld [vmem:[#allocation8 + $0x188] sm:$0xff] }
 0x445   : > { %4042 = vmatmul.mubr.msk.f32.gmra.mxu1 %vm1016_vm0, %v2726_v56  ;;  %3368 = vmatpush1.msra.mxu0 %v3273_v61  ;;  %v3521_v56 = vld [vmem:[#allocation10 + $0x88] sm:$0xff]  ;;  %v3315_v61 = vld [vmem:[#allocation8 + $0x180] sm:$0xff] }
 0x446   : > { %3612 = vmatprep.mubr.f32.mxu1 %v5106_v18  ;;  %3369 = vmatprep.subr.mxu0 %v3272_v12  ;;  %v3517_v5 = vld [vmem:[#allocation10 + $0x68] sm:$0xff]  ;;  %v3516_v12 = vld [vmem:[#allocation10 + $0x60] sm:$0xff] }
 0x447   : > { %3370 = vmatpush1.msra.mxu0 %v3271_v48  ;;  %3562 = vmatprep.subr.mxu1 %v3521_v56  ;;  %v3314_v48 = vld [vmem:[#allocation8 + $0x178] sm:$0xff] }
 0x448   : > { %3371 = vmatprep.subr.mxu0 %v3270_v19  ;;  %3563 = vmatpush1.msra.mxu1 %v3520_v14  ;;  %v3313_v19 = vld [vmem:[#allocation8 + $0x170] sm:$0xff]  ;;  %v3507_v56 = vld [vmem:[#allocation10 + $0x18] sm:$0xff] }
 0x449   : > { %3372 = vmatpush1.msra.mxu0 %v3269_v47  ;;  %3564 = vmatprep.subr.mxu1 %v3519_v32  ;;  %v3515_v47 = vld [vmem:[#allocation10 + $0x58] sm:$0xff]  ;;  %v3506_v14 = vld [vmem:[#allocation10 + $0x10] sm:$0xff] }
 0x44a   : > { %3373 = vmatprep.subr.mxu0 %v3268_v4  ;;  %3565 = vmatpush1.msra.mxu1 %v3518_v31  ;;  %v3312_v4 = vld [vmem:[#allocation8 + $0x168] sm:$0xff]  ;;  %v3302_v32 = vld [vmem:[#allocation8 + $0x118] sm:$0xff]  ;;  %v3301_v31 = vld [vmem:[#allocation8 + $0x110] sm:$0xff] }
 0x44b   : > { %3374 = vmatpush1.msra.mxu0 %v3267_v8  ;;  %3566 = vmatprep.subr.mxu1 %v3517_v5  ;;  %v3514_v8 = vld [vmem:[#allocation10 + $0x50] sm:$0xff]  ;;  %v3300_v5 = vld [vmem:[#allocation8 + $0x108] sm:$0xff] }
 0x44c   : > { %3375 = vmatprep.subr.mxu0 %v3330_v17  ;;  %3567 = vmatpush1.msra.mxu1 %v3516_v12  ;;  %v3311_v17 = vld [vmem:[#allocation8 + $0x160] sm:$0xff] }
 0x44d   : > { %3376 = vmatpush2.msra.mxu0 %v3329_v40  ;;  %3568 = vmatprep.subr.mxu1 %v3515_v47  ;;  %v3513_v40 = vld [vmem:[#allocation10 + $0x48] sm:$0xff]  ;;  %v4875_v12 = vld [vmem:[%s5406_s29] sm:$0xff]  ;;  %v4878_v47 = vld [vmem:[%s5406_s29 + $0x18] sm:$0xff] }
 0x44e   : > { %3377 = vmatprep.subr.mxu0 %v3328_v42  ;;  %3569 = vmatpush1.msra.mxu1 %v3514_v8  ;;  %v3310_v42 = vld [vmem:[#allocation8 + $0x158] sm:$0xff]  ;;  %v4880_v8 = vld [vmem:[%s5406_s29 + $0x28] sm:$0xff] }
 0x44f   : > { %3378 = vmatpush2.msra.mxu0 %v3327_v37  ;;  %3570 = vmatprep.subr.mxu1 %v3513_v40  ;;  %v3512_v37 = vld [vmem:[#allocation10 + $0x40] sm:$0xff]  ;;  %v4882_v40 = vld [vmem:[%s5406_s29 + $0x38] sm:$0xff] }
 0x450   : > { %3379 = vmatprep.subr.mxu0 %v3326_v63  ;;  %v3309_v63 = vld [vmem:[#allocation8 + $0x150] sm:$0xff]  ;;  %3571 = vmatpush1.msra.mxu1 %v3512_v37  ;;  %v4884_v37 = vld [vmem:[%s5406_s29 + $0x48] sm:$0xff] }
 0x451   : > { %3380 = vmatpush2.msra.mxu0 %v3325_v3  ;;  %v3511_v3 = vld [vmem:[#allocation10 + $0x38] sm:$0xff] }
 0x452   : > { %3381 = vmatprep.subr.mxu0 %v3324_v7  ;;  %v3308_v7 = vld [vmem:[#allocation8 + $0x148] sm:$0xff]  ;;  %3572 = vmatprep.subr.mxu1 %v3511_v3  ;;  %v4886_v3 = vld [vmem:[%s5406_s29 + $0x58] sm:$0xff] }
 0x453   : > { %3382 = vmatpush2.msra.mxu0 %v3323_v27  ;;  %v3510_v27 = vld [vmem:[#allocation10 + $0x30] sm:$0xff] }
 0x454   : > { %3383 = vmatprep.subr.mxu0 %v3322_v13  ;;  %3573 = vmatpush1.msra.mxu1 %v3510_v27  ;;  %v3509_v13 = vld [vmem:[#allocation10 + $0x28] sm:$0xff] }
 0x455   : > { %3384 = vmatpush2.msra.mxu0 %v3321_v57  ;;  %3574 = vmatprep.subr.mxu1 %v3509_v13  ;;  %v3508_v57 = vld [vmem:[#allocation10 + $0x20] sm:$0xff]  ;;  %v4888_v27 = vld [vmem:[%s5406_s29 + $0x68] sm:$0xff]  ;;  %v4889_v13 = vld [vmem:[%s5406_s29 + $0x70] sm:$0xff] }
 0x456   : > { %3385 = vmatprep.subr.mxu0 %v3320_v41  ;;  %3575 = vmatpush1.msra.mxu1 %v3508_v57  ;;  %v3305_v41 = vld [vmem:[#allocation8 + $0x130] sm:$0xff] }
 0x457   : > { %3386 = vmatpush2.msra.mxu0 %v3319_v28  ;;  %v3304_v28 = vld [vmem:[#allocation8 + $0x128] sm:$0xff]  ;;  %3576 = vmatprep.subr.mxu1 %v3507_v56 }
 0x458   : > { %3387 = vmatprep.subr.mxu0 %v3318_v11  ;;  %v3303_v11 = vld [vmem:[#allocation8 + $0x120] sm:$0xff]  ;;  %3577 = vmatpush1.msra.mxu1 %v3506_v14 }
 0x459   : > { %3388 = vmatpush2.msra.mxu0 %v3317_v39  ;;  %v3505_v39 = vld [vmem:[#allocation10 + $0x8] sm:$0xff] }
 0x45a   : > { %3389 = vmatprep.subr.mxu0 %v3316_v59  ;;  %3578 = vmatprep.subr.mxu1 %v3505_v39  ;;  %v3504_v59 = vld [vmem:[#allocation10] sm:$0xff] }
 0x45b   : > { %3390 = vmatpush2.msra.mxu0 %v3315_v61  ;;  %3579 = vmatpush1.msra.mxu1 %v3504_v59  ;;  %v3299_v61 = vld [vmem:[#allocation8 + $0x100] sm:$0xff] }
 0x45c   : > { %3391 = vmatprep.subr.mxu0 %v3314_v48  ;;  %3613 = vmatmul.mubr.f32.vlgmr.msra.gmra.mxu1 %v4875_v12  ;;  %v4876_v48 = vld [vmem:[%s5406_s29 + $0x8] sm:$0xff] }
 0x45d   : > { %3392 = vmatpush2.msra.mxu0 %v3313_v19  ;;  %3618 = vmatprep.mubr.f32.mxu1 %v5106_v18  ;;  %v4877_v19 = vld [vmem:[%s5406_s29 + $0x10] sm:$0xff] }
 0x45e   : > { %3393 = vmatprep.subr.mxu0 %v3312_v4  ;;  %v4879_v4 = vld [vmem:[%s5406_s29 + $0x20] sm:$0xff] }
 0x45f   : > { %3394 = vmatpush2.msra.mxu0 %v3311_v17  ;;  %v4881_v17 = vld [vmem:[%s5406_s29 + $0x30] sm:$0xff] }
 0x460   : > { %3395 = vmatprep.subr.mxu0 %v3310_v42  ;;  %3619 = vmatmul.mubr.f32.gmra.mxu1 %v4876_v48  ;;  %v4883_v42 = vld [vmem:[%s5406_s29 + $0x40] sm:$0xff] }
 0x461   : > { %3396 = vmatpush2.msra.mxu0 %v3309_v63  ;;  %3624 = vmatprep.mubr.f32.mxu1 %v5106_v18  ;;  %v4885_v63 = vld [vmem:[%s5406_s29 + $0x50] sm:$0xff] }
 0x462   : > { %3397 = vmatprep.subr.mxu0 %v3308_v7  ;;  %v4887_v7 = vld [vmem:[%s5406_s29 + $0x60] sm:$0xff] }
 0x463   : > { %3398 = vmatpush2.msra.mxu0 %v3307_v49  ;;  %v4890_v49 = vld [vmem:[%s5406_s29 + $0x78] sm:$0xff]  ;;  %s5023_s29 = scalar_lea.vmem %s6715_s30, 4096 }
 0x464   : > { %3399 = vmatprep.subr.mxu0 %v3306_v9  ;;  %3625 = vmatmul.mubr.f32.gmra.mxu1 %v4877_v19  ;;  %v2083_v9 = vld [vmem:[%s6770_s10] sm:$0x3]  ;;  %p5024_p12 = scmp.ne.s32.totalorder %s6715_s30, %s5023_s29  ;;  %p5031_p11 = scmp.lt.s32.totalorder %s5029_s24, %s5023_s29 }
 0x465   : > { %3400 = vmatpush2.msra.mxu0 %v3305_v41  ;;  %3630 = vmatprep.mubr.f32.mxu1 %v5106_v18  ;;  %v6358_v14 = vrot.slane %v2083_v9, %v5940_v44 }
 0x466   : > { %3401 = vmatprep.subr.mxu0 %v3304_v28  ;;  %p5025_p1 = pnand %p5024_p12, %p6810_p7  ;;  %p5032_p5 = por %p5031_p11, %p5030_p0 }
 0x467   : > { %3402 = vmatpush2.msra.mxu0 %v3303_v11 }
 0x468   : > { %3403 = vmatprep.subr.mxu0 %v3302_v32  ;;  %3631 = vmatmul.mubr.f32.gmra.mxu1 %v4878_v47  ;;  %p5026_p13 = pneg %p5025_p1 }
 0x469   : > { %3404 = vmatpush2.msra.mxu0 %v3301_v31  ;;  %3636 = vmatprep.mubr.f32.mxu1 %v5106_v18 }
 0x46a   : > { %3405 = vmatprep.subr.mxu0 %v3300_v5  ;;  %p5033_p3 = pnand %p5032_p5, %p5026_p13 }
 0x46b   : > { %3406 = vmatpush2.msra.mxu0 %v3299_v61 }
 0x46c   : > { %3637 = vmatmul.mubr.f32.gmra.mxu1 %v4879_v4 }
 0x46d   : > { %3642 = vmatprep.mubr.f32.mxu1 %v5106_v18 }
 0x470   : > { %3643 = vmatmul.mubr.f32.gmra.mxu1 %v4880_v8 }
 0x471   : > { %3648 = vmatprep.mubr.f32.mxu1 %v5106_v18 }
 0x474   : > { %3649 = vmatmul.mubr.f32.gmra.mxu1 %v4881_v17 }
 0x475   : > { %3654 = vmatprep.mubr.f32.mxu1 %v5106_v18 }
 0x478   : > { %3655 = vmatmul.mubr.f32.gmra.mxu1 %v4882_v40 }
 0x479   : > { %3660 = vmatprep.mubr.f32.mxu1 %v5106_v18 }
 0x47c   : > { %3661 = vmatmul.mubr.f32.gmra.mxu1 %v4883_v42 }
 0x47d   : > { %3666 = vmatprep.mubr.f32.mxu1 %v5106_v18 }
 0x480   : > { %3667 = vmatmul.mubr.f32.gmra.mxu1 %v4884_v37 }
 0x481   : > { %3672 = vmatprep.mubr.f32.mxu1 %v5106_v18 }
 0x484   : > { %3673 = vmatmul.mubr.f32.gmra.mxu1 %v4885_v63 }
 0x485   : > { %3678 = vmatprep.mubr.f32.mxu1 %v5106_v18 }
 0x488   : > { %3679 = vmatmul.mubr.f32.gmra.mxu1 %v4886_v3 }
 0x489   : > { %3684 = vmatprep.mubr.f32.mxu1 %v5106_v18 }
 0x48c   : > { %3685 = vmatmul.mubr.f32.gmra.mxu1 %v4887_v7 }
 0x48d   : > { %3690 = vmatprep.mubr.f32.mxu1 %v5106_v18 }
 0x490   : > { %3691 = vmatmul.mubr.f32.gmra.mxu1 %v4888_v27 }
 0x491   : > { %3696 = vmatprep.mubr.f32.mxu1 %v5106_v18 }
 0x494   : > { %3697 = vmatmul.mubr.f32.gmra.mxu1 %v4889_v13 }
 0x495   : > { %3702 = vmatprep.mubr.f32.mxu1 %v5106_v18  ;;  %v6362_v18 = vrot.slane %v2083_v9, %v5945_v45 }
 0x498   : > { %3703 = vmatmul.mubr.f32.gmra.mxu1 %v4890_v49 }
 0x4c4   : > { %v2600_v57 = vpop.f32.mrf.mxu0 }
 0x4c5   : > { %v2936_v56 = vmul.f32 %v2600_v57, %v5958_v50 }
 0x4c6   : > { %v2602_v41 = vpop.f32.mrf.mxu0 }
 0x4c7   : > { %v2937_v32 = vmul.f32 %v2602_v41, %v5961_v54 }
 0x4c8   : > { %v2606_v28 = vpop.f32.mrf.mxu0 }
 0x4c9   : > { %v2841_v11 = vpop.f32.mrf.mxu1  ;;  %v2938_v5 = vmul.f32 %v2606_v28, %v5977_v24 }
 0x4ca   : > { %v2968_v39 = vadd.f32 %v2936_v56, %v2841_v11  ;;  %v2608_v31 = vpop.f32.mrf.mxu0 }
 0x4cb   : > { %v2843_v59 = vpop.f32.mrf.mxu1  ;;  %v2939_v47 = vmul.f32 %v2608_v31, %v5981_v1 }
 0x4cc   : > { %v6366_v61 = vadd.f32 %v6358_v14, %v2968_v39  ;;  %v2969_v12 = vadd.f32 %v2937_v32, %v2843_v59  ;;  %v2612_v50 = vpop.f32.mrf.mxu0 }
 0x4cd   : > { %v2847_v48 = vpop.f32.mrf.mxu1  ;;  %v2940_v17 = vmul.f32 %v2612_v50, %v5992_v25 }
 0x4ce   : > { %v4043_v19 = vmul.f32 -1.442695, %v6366_v61  ;;  %v6371_v54 = vadd.f32 %v6362_v18, %v2969_v12  ;;  %v2970_v4 = vadd.f32 %v2938_v5, %v2847_v48  ;;  %v2614_v8 = vpop.f32.mrf.mxu0 }
 0x4cf   : > { %v2849_v40 = vpop.f32.mrf.mxu1  ;;  %v2941_v3 = vmul.f32 %v2614_v8, %v5998_v30 }
 0x4d0   : > { %4734 = vpow2.f32 %v4043_v19  ;;  %v4044_v24 = vmul.f32 -1.442695, %v6371_v54  ;;  %v6376_v42 = vadd.f32 %v6358_v14, %v2970_v4  ;;  %v2971_v37 = vadd.f32 %v2939_v47, %v2849_v40  ;;  %v2618_v63 = vpop.f32.mrf.mxu0 }
 0x4d1   : > { %v2853_v7 = vpop.f32.mrf.mxu1  ;;  %v2942_v49 = vmul.f32 %v2618_v63, %v6006_v15 }
 0x4d2   : > { %4736 = vpow2.f32 %v4044_v24  ;;  %v4045_v1 = vmul.f32 -1.442695, %v6376_v42  ;;  %v6381_v27 = vadd.f32 %v6362_v18, %v2971_v37  ;;  %v2972_v13 = vadd.f32 %v2940_v17, %v2853_v7  ;;  %v2620_v25 = vpop.f32.mrf.mxu0 }
 0x4d3   : > { %v2855_v57 = vpop.f32.mrf.mxu1  ;;  %v2943_v28 = vmul.f32 %v2620_v25, %v6012_v38 }
 0x4d4   : > { %4738 = vpow2.f32 %v4045_v1  ;;  %v4046_v9 = vmul.f32 -1.442695, %v6381_v27  ;;  %v6386_v41 = vadd.f32 %v6358_v14, %v2972_v13  ;;  %v2973_v56 = vadd.f32 %v2941_v3, %v2855_v57  ;;  %v2624_v30 = vpop.f32.mrf.mxu0 }
 0x4d5   : > { %v2859_v11 = vpop.f32.mrf.mxu1  ;;  %v2944_v59 = vmul.f32 %v2624_v30, %v6022_v51 }
 0x4d6   : > { %4740 = vpow2.f32 %v4046_v9  ;;  %v4047_v32 = vmul.f32 -1.442695, %v6386_v41  ;;  %v6391_v39 = vadd.f32 %v6362_v18, %v2973_v56  ;;  %v2974_v31 = vadd.f32 %v2942_v49, %v2859_v11  ;;  %v2626_v15 = vpop.f32.mrf.mxu0 }
 0x4d7   : > { %v2861_v5 = vpop.f32.mrf.mxu1  ;;  %v2945_v19 = vmul.f32 %v2626_v15, %v6028_v6 }
 0x4d8   : > { %4742 = vpow2.f32 %v4047_v32  ;;  %v4048_v12 = vmul.f32 -1.442695, %v6391_v39  ;;  %v6396_v50 = vadd.f32 %v6358_v14, %v2974_v31  ;;  %v2975_v48 = vadd.f32 %v2943_v28, %v2861_v5  ;;  %v2630_v38 = vpop.f32.mrf.mxu0 }
 0x4d9   : > { %v2865_v47 = vpop.f32.mrf.mxu1  ;;  %v2946_v6 = vmul.f32 %v2630_v38, %v6038_v35 }
 0x4da   : > { %4744 = vpow2.f32 %v4048_v12  ;;  %v4049_v4 = vmul.f32 -1.442695, %v6396_v50  ;;  %v6401_v8 = vadd.f32 %v6362_v18, %v2975_v48  ;;  %v2976_v17 = vadd.f32 %v2944_v59, %v2865_v47  ;;  %v2632_v51 = vpop.f32.mrf.mxu0 }
 0x4db   : > { %v2867_v40 = vpop.f32.mrf.mxu1  ;;  %v2947_v1 = vmul.f32 %v2632_v51, %v6044_v29 }
 0x4dc   : > { %4746 = vpow2.f32 %v4049_v4  ;;  %v4050_v24 = vmul.f32 -1.442695, %v6401_v8  ;;  %v6405_v37 = vadd.f32 %v6358_v14, %v2976_v17  ;;  %v2977_v63 = vadd.f32 %v2945_v19, %v2867_v40 }
 0x4dd   : > { %v2636_v3 = vpop.f32.mrf.mxu0  ;;  %v4735_v7 = vpop.eup %4734 }
 0x4de   : > { %v2871_v13 = vpop.f32.mrf.mxu1  ;;  %v3139_v25 = vadd.f32 1.0, %v4735_v7  ;;  %4748 = vpow2.f32 %v4050_v24  ;;  %v4051_v49 = vmul.f32 -1.442695, %v6405_v37  ;;  %v6411_v57 = vadd.f32 %v6362_v18, %v2977_v63 }
 0x4df   : > { %v2638_v9 = vpop.f32.mrf.mxu0  ;;  %v4737_v56 = vpop.eup %4736  ;;  %v2948_v30 = vmul.f32 %v2636_v3, %v6052_v55  ;;  %v2978_v28 = vadd.f32 %v2946_v6, %v2871_v13 }
 0x4e0   : > { %v2873_v11 = vpop.f32.mrf.mxu1  ;;  %4750 = vrcp.f32 %v3139_v25  ;;  %v3140_v32 = vadd.f32 1.0, %v4737_v56  ;;  %v4052_v35 = vmul.f32 -1.442695, %v6411_v57  ;;  %v2949_v4 = vmul.f32 %v2638_v9, %v6058_v58 }
 0x4e1   : > { %v2979_v31 = vadd.f32 %v2947_v1, %v2873_v11  ;;  %v2642_v29 = vpop.f32.mrf.mxu0  ;;  %v4739_v15 = vpop.eup %4738  ;;  %4752 = vpow2.f32 %v4051_v49  ;;  %v6416_v59 = vadd.f32 %v6358_v14, %v2978_v28 }
 0x4e2   : > { %v2877_v5 = vpop.f32.mrf.mxu1  ;;  %4754 = vrcp.f32 %v3140_v32  ;;  %v3141_v12 = vadd.f32 1.0, %v4739_v15  ;;  %v2950_v17 = vmul.f32 %v2642_v29, %v6066_v2 }
 0x4e3   : > { %v6419_v48 = vadd.f32 %v6362_v18, %v2979_v31  ;;  %v2980_v55 = vadd.f32 %v2948_v30, %v2877_v5  ;;  %v2644_v38 = vpop.f32.mrf.mxu0  ;;  %v4741_v19 = vpop.eup %4740  ;;  %4756 = vpow2.f32 %v4052_v35  ;;  %v4053_v47 = vmul.f32 -1.442695, %v6416_v59 }
 0x4e4   : > { %v2879_v51 = vpop.f32.mrf.mxu1  ;;  %4758 = vrcp.f32 %v3141_v12  ;;  %v3142_v40 = vadd.f32 1.0, %v4741_v19  ;;  %v2951_v6 = vmul.f32 %v2644_v38, %v6072_v26 }
 0x4e5   : > { %v4054_v24 = vmul.f32 -1.442695, %v6419_v48  ;;  %v6426_v63 = vadd.f32 %v6358_v14, %v2980_v55  ;;  %v2648_v3 = vpop.f32.mrf.mxu0  ;;  %v4743_v7 = vpop.eup %4742  ;;  %4760 = vpow2.f32 %v4053_v47  ;;  %v2981_v1 = vadd.f32 %v2949_v4, %v2879_v51 }
 0x4e6   : > { %v2883_v13 = vpop.f32.mrf.mxu1  ;;  %4762 = vrcp.f32 %v3142_v40  ;;  %v3143_v25 = vadd.f32 1.0, %v4743_v7  ;;  %v2952_v29 = vmul.f32 %v2648_v3, %v6080_v53 }
 0x4e7   : > { %v4055_v58 = vmul.f32 -1.442695, %v6426_v63  ;;  %v2982_v2 = vadd.f32 %v2950_v17, %v2883_v13  ;;  %v2650_v49 = vpop.f32.mrf.mxu0  ;;  %v4745_v9 = vpop.eup %4744  ;;  %4764 = vpow2.f32 %v4054_v24  ;;  %v6431_v56 = vadd.f32 %v6362_v18, %v2981_v1 }
 0x4e8   : > { %v2885_v30 = vpop.f32.mrf.mxu1  ;;  %4766 = vrcp.f32 %v3143_v25  ;;  %v3144_v28 = vadd.f32 1.0, %v4745_v9  ;;  %v2953_v15 = vmul.f32 %v2650_v49, %v6086_v0 }
 0x4e9   : > { %v6434_v11 = vadd.f32 %v6358_v14, %v2982_v2  ;;  %v2983_v26 = vadd.f32 %v2951_v6, %v2885_v30  ;;  %v2654_v32 = vpop.f32.mrf.mxu0  ;;  %v4747_v35 = vpop.eup %4746  ;;  %4768 = vpow2.f32 %v4055_v58  ;;  %v4056_v31 = vmul.f32 -1.442695, %v6431_v56 }
 0x4ea   : > { %v2889_v5 = vpop.f32.mrf.mxu1  ;;  %4770 = vrcp.f32 %v3144_v28  ;;  %v3145_v12 = vadd.f32 1.0, %v4747_v35  ;;  %v2954_v4 = vmul.f32 %v2654_v32, %v6094_v21 }
 0x4eb   : > { %v4057_v55 = vmul.f32 -1.442695, %v6434_v11  ;;  %v6441_v38 = vadd.f32 %v6362_v18, %v2983_v26  ;;  %v2656_v19 = vpop.f32.mrf.mxu0  ;;  %v4749_v47 = vpop.eup %4748  ;;  %4772 = vpow2.f32 %v4056_v31  ;;  %v2984_v17 = vadd.f32 %v2952_v29, %v2889_v5 }
 0x4ec   : > { %v2891_v51 = vpop.f32.mrf.mxu1  ;;  %4774 = vrcp.f32 %v3145_v12  ;;  %v3146_v40 = vadd.f32 1.0, %v4749_v47  ;;  %v2955_v13 = vmul.f32 %v2656_v19, %v6100_v33 }
 0x4ed   : > { %v4058_v53 = vmul.f32 -1.442695, %v6441_v38  ;;  %v2985_v0 = vadd.f32 %v2953_v15, %v2891_v51  ;;  %v2660_v24 = vpop.f32.mrf.mxu0  ;;  %v4751_v3 = vpop.eup %4750  ;;  %4776 = vpow2.f32 %v4057_v55  ;;  %v6446_v7 = vadd.f32 %v6358_v14, %v2984_v17 }
 0x4ee   : > { %v2895_v6 = vpop.f32.mrf.mxu1  ;;  %v4753_v1 = vpop.eup %4752  ;;  %4778 = vrcp.f32 %v3146_v40  ;;  %v3235_v15 = vmul.f32 %v4751_v3, %v6366_v61  ;;  %v2956_v12 = vmul.f32 %v2660_v24, %v6108_v62 }
 0x4ef   : > { %v6450_v21 = vadd.f32 %v6362_v18, %v2985_v0  ;;  %v2986_v25 = vadd.f32 %v2954_v4, %v2895_v6  ;;  %v2662_v58 = vpop.f32.mrf.mxu0  ;;  %v4755_v2 = vpop.eup %4754  ;;  %v3147_v49 = vadd.f32 1.0, %v4753_v1  ;;  %4780 = vpow2.f32 %v4058_v53 }
 0x4f0   : > { %v4059_v9 = vmul.f32 -1.442695, %v6446_v7  ;;  %v2897_v30 = vpop.f32.mrf.mxu1  ;;  %v4757_v28 = vpop.eup %4756  ;;  %v3236_v33 = vmul.f32 %v4755_v2, %v6371_v54  ;;  %v2957_v4 = vmul.f32 %v2662_v58, %v6114_v20 }
 0x4f1   : > { %v4060_v26 = vmul.f32 -1.442695, %v6450_v21  ;;  %v6455_v32 = vadd.f32 %v6358_v14, %v2986_v25  ;;  %v2987_v35 = vadd.f32 %v2955_v13, %v2897_v30  ;;  %v2666_v31 = vpop.f32.mrf.mxu0  ;;  %v4759_v29 = vpop.eup %4758  ;;  %4782 = vrcp.f32 %v3147_v49 }
 0x4f2   : > { %v3148_v5 = vadd.f32 1.0, %v4757_v28  ;;  %v2901_v55 = vpop.f32.mrf.mxu1  ;;  %v4761_v19 = vpop.eup %4760  ;;  %4784 = vpow2.f32 %v4059_v9  ;;  %3407 = vmatprep.mubr.f32.mxu0 %v3236_v33  ;;  %v2958_v61 = vmul.f32 %v2666_v31, %v6120_v10  ;;  %v3237_v13 = vmul.f32 %v4759_v29, %v6376_v42 }
 0x4f3   : > { %v4061_v47 = vmul.f32 -1.442695, %v6455_v32  ;;  %v6463_v17 = vadd.f32 %v6362_v18, %v2987_v35  ;;  %v2668_v51 = vpop.f32.mrf.mxu0  ;;  %v4763_v54 = vpop.eup %4762  ;;  %v3149_v40 = vadd.f32 1.0, %v4761_v19  ;;  %v2988_v53 = vadd.f32 %v2956_v12, %v2901_v55  ;;  %3408 = vmatmul.mubr.f32.vlgmr.msra.gmra.mxu0 %v3235_v15 }
 0x4f4   : > { %4786 = vrcp.f32 %v3148_v5  ;;  %v2903_v0 = vpop.f32.mrf.mxu1  ;;  %v4765_v62 = vpop.eup %4764  ;;  %v3238_v20 = vmul.f32 %v4763_v54, %v6381_v27  ;;  %v2959_v49 = vmul.f32 %v2668_v51, %v6126_v52 }
 0x4f5   : > { %4788 = vpow2.f32 %v4060_v26  ;;  %v4062_v24 = vmul.f32 -1.442695, %v6463_v17  ;;  %v2989_v3 = vadd.f32 %v2957_v4, %v2903_v0  ;;  %v2672_v6 = vpop.f32.mrf.mxu0  ;;  %v4767_v1 = vpop.eup %4766  ;;  %v3150_v25 = vadd.f32 1.0, %v4765_v62 }
 0x4f6   : > { %4790 = vrcp.f32 %v3149_v40  ;;  %v6470_v58 = vadd.f32 %v6358_v14, %v2988_v53  ;;  %v2907_v10 = vpop.f32.mrf.mxu1  ;;  %v4769_v2 = vpop.eup %4768  ;;  %3413 = vmatprep.mubr.f32.mxu0 %v3238_v20  ;;  %v2960_v35 = vmul.f32 %v2672_v6, %v6132_v23  ;;  %v3239_v55 = vmul.f32 %v4767_v1, %v6386_v41 }
 0x4f7   : > { %4792 = vpow2.f32 %v4061_v47  ;;  %v6474_v9 = vadd.f32 %v6362_v18, %v2989_v3  ;;  %v2990_v30 = vadd.f32 %v2958_v61, %v2907_v10  ;;  %v2674_v28 = vpop.f32.mrf.mxu0  ;;  %v4771_v27 = vpop.eup %4770  ;;  %v3151_v26 = vadd.f32 1.0, %v4769_v2  ;;  %3414 = vmatmul.mubr.f32.gmra.mxu0 %v3237_v13 }
 0x4f8   : > { %4794 = vrcp.f32 %v3150_v25  ;;  %v4063_v42 = vmul.f32 -1.442695, %v6470_v58  ;;  %v2909_v31 = vpop.f32.mrf.mxu1  ;;  %v4773_v33 = vpop.eup %4772  ;;  %v3240_v4 = vmul.f32 %v4771_v27, %v6391_v39  ;;  %v2961_v54 = vmul.f32 %v2674_v28, %v6138_v46 }
 0x4f9   : > { %4796 = vpow2.f32 %v4062_v24  ;;  %v4064_v29 = vmul.f32 -1.442695, %v6474_v9  ;;  %v6480_v52 = vadd.f32 %v6358_v14, %v2990_v30  ;;  %v2991_v15 = vadd.f32 %v2959_v49, %v2909_v31  ;;  %v2678_v5 = vpop.f32.mrf.mxu0  ;;  %v4775_v12 = vpop.eup %4774 }
 0x4fa   : > { %4798 = vrcp.f32 %v3151_v26  ;;  %v3152_v19 = vadd.f32 1.0, %v4773_v33  ;;  %v2913_v47 = vpop.f32.mrf.mxu1  ;;  %v4777_v23 = vpop.eup %4776  ;;  %v2962_v41 = vmul.f32 %v2678_v5, %v6144_v34  ;;  %3419 = vmatprep.mubr.f32.mxu0 %v3240_v4  ;;  %v3241_v1 = vmul.f32 %v4775_v12, %v6396_v50 }
 0x4fb   : > { %4800 = vpow2.f32 %v4063_v42  ;;  %v4065_v51 = vmul.f32 -1.442695, %v6480_v52  ;;  %v6487_v40 = vadd.f32 %v6362_v18, %v2991_v15  ;;  %v2680_v61 = vpop.f32.mrf.mxu0  ;;  %v4779_v53 = vpop.eup %4778  ;;  %v3153_v0 = vadd.f32 1.0, %v4777_v23  ;;  %3420 = vmatmul.mubr.f32.gmra.mxu0 %v3239_v55 }
 0x4fc   : > { %4802 = vrcp.f32 %v3152_v19  ;;  %v2992_v62 = vadd.f32 %v2960_v35, %v2913_v47  ;;  %v2915_v24 = vpop.f32.mrf.mxu1  ;;  %v4781_v3 = vpop.eup %4780  ;;  %v3242_v46 = vmul.f32 %v4779_v53, %v6401_v8  ;;  %v2963_v2 = vmul.f32 %v2680_v61, %v6150_v36 }
 0x4fd   : > { %4804 = vpow2.f32 %v4064_v29  ;;  %v4066_v39 = vmul.f32 -1.442695, %v6487_v40  ;;  %v2993_v6 = vadd.f32 %v2961_v54, %v2915_v24  ;;  %v2684_v20 = vpop.f32.mrf.mxu0  ;;  %v3154_v13 = vadd.f32 1.0, %v4781_v3 }
 0x4fe   : > { %4806 = vrcp.f32 %v3153_v0  ;;  %v6494_v25 = vadd.f32 %v6358_v14, %v2992_v62  ;;  %v2919_v34 = vpop.f32.mrf.mxu1  ;;  %v4783_v10 = vpop.eup %4782  ;;  %3425 = vmatprep.mubr.f32.mxu0 %v3242_v46  ;;  %v2964_v26 = vmul.f32 %v2684_v20, %v6156_v60 }
 0x4ff   : > { %4808 = vpow2.f32 %v4065_v51  ;;  %v6498_v49 = vadd.f32 %v6362_v18, %v2993_v6  ;;  %v2994_v30 = vadd.f32 %v2962_v41, %v2919_v34  ;;  %v2686_v28 = vpop.f32.mrf.mxu0  ;;  %v4785_v27 = vpop.eup %4784  ;;  %v3243_v8 = vmul.f32 %v4783_v10, %v6405_v37  ;;  %3426 = vmatmul.mubr.f32.gmra.mxu0 %v3241_v1 }
 0x500   : > { %4810 = vrcp.f32 %v3154_v13  ;;  %v4067_v50 = vmul.f32 -1.442695, %v6494_v25  ;;  %v2921_v42 = vpop.f32.mrf.mxu1  ;;  %v3155_v31 = vadd.f32 1.0, %v4785_v27  ;;  %v2965_v37 = vmul.f32 %v2686_v28, %v6162_v22 }
 0x501   : > { %v4787_v35 = vpop.eup %4786  ;;  %4812 = vpow2.f32 %v4066_v39  ;;  %v4068_v36 = vmul.f32 -1.442695, %v6498_v49  ;;  %v6505_v33 = vadd.f32 %v6358_v14, %v2994_v30  ;;  %v2690_v29 = vpop.f32.mrf.mxu0  ;;  %v2995_v5 = vadd.f32 %v2963_v2, %v2921_v42 }
 0x502   : > { %v4789_v15 = vpop.eup %4788  ;;  %4814 = vpow2.f32 %v4067_v50  ;;  %v2925_v12 = vpop.f32.mrf.mxu1  ;;  %v3244_v55 = vmul.f32 %v4787_v35, %v6411_v57  ;;  %v2966_v22 = vmul.f32 %v2690_v29, %v6168_v16 }
 0x503   : > { %v4791_v60 = vpop.eup %4790  ;;  %4816 = vrcp.f32 %v3155_v31  ;;  %v3156_v19 = vadd.f32 1.0, %v4789_v15  ;;  %v4069_v47 = vmul.f32 -1.442695, %v6505_v33  ;;  %v2996_v4 = vadd.f32 %v2964_v26, %v2925_v12  ;;  %v2692_v23 = vpop.f32.mrf.mxu0 }
 0x504   : > { %v4793_v51 = vpop.eup %4792  ;;  %v3245_v54 = vmul.f32 %v4791_v60, %v6416_v59  ;;  %4818 = vpow2.f32 %v4068_v36  ;;  %v6512_v61 = vadd.f32 %v6362_v18, %v2995_v5  ;;  %3431 = vmatprep.mubr.f32.mxu0 %v3244_v55  ;;  %v2927_v53 = vpop.f32.mrf.mxu1  ;;  %v2967_v3 = vmul.f32 %v2692_v23, %v6174_v43 }
 0x505   : > { %v4795_v0 = vpop.eup %4794  ;;  %4820 = vrcp.f32 %v3156_v19  ;;  %v3157_v57 = vadd.f32 1.0, %v4793_v51  ;;  %v6516_v41 = vadd.f32 %v6358_v14, %v2996_v4  ;;  %v2997_v62 = vadd.f32 %v2965_v37, %v2927_v53  ;;  %3432 = vmatmul.mubr.f32.gmra.mxu0 %v3243_v8 }
 0x506   : > { %v4797_v24 = vpop.eup %4796  ;;  %4822 = vpow2.f32 %v4069_v47  ;;  %v4070_v59 = vmul.f32 -1.442695, %v6512_v61  ;;  %v2931_v39 = vpop.f32.mrf.mxu1  ;;  %v3246_v6 = vmul.f32 %v4795_v0, %v6419_v48 }
 0x507   : > { %v4799_v16 = vpop.eup %4798  ;;  %4824 = vrcp.f32 %v3157_v57  ;;  %v3158_v20 = vadd.f32 1.0, %v4797_v24  ;;  %v4071_v46 = vmul.f32 -1.442695, %v6516_v41  ;;  %v6523_v1 = vadd.f32 %v6362_v18, %v2997_v62 }
 0x508   : > { %v4801_v13 = vpop.eup %4800  ;;  %4826 = vpow2.f32 %v4070_v59  ;;  %v2998_v34 = vadd.f32 %v2966_v22, %v2931_v39  ;;  %3437 = vmatprep.mubr.f32.mxu0 %v3246_v6  ;;  %v2933_v10 = vpop.f32.mrf.mxu1  ;;  %v3247_v26 = vmul.f32 %v4799_v16, %v6426_v63 }
 0x509   : > { %v4803_v2 = vpop.eup %4802  ;;  %4828 = vrcp.f32 %v3158_v20  ;;  %v3159_v30 = vadd.f32 1.0, %v4801_v13  ;;  %v4072_v43 = vmul.f32 -1.442695, %v6523_v1  ;;  %v2999_v28 = vadd.f32 %v2967_v3, %v2933_v10  ;;  %3438 = vmatmul.mubr.f32.gmra.mxu0 %v3245_v54 }
 0x50a   : > { %v4805_v48 = vpop.eup %4804  ;;  %4830 = vpow2.f32 %v4071_v46  ;;  %v6527_v27 = vadd.f32 %v6358_v14, %v2998_v34  ;;  %v3248_v8 = vmul.f32 %v4803_v2, %v6431_v56 }
 0x50b   : > { %v4807_v50 = vpop.eup %4806  ;;  %4832 = vrcp.f32 %v3159_v30  ;;  %v3160_v42 = vadd.f32 1.0, %v4805_v48  ;;  %v6532_v35 = vadd.f32 %v6362_v18, %v2999_v28 }
 0x50c   : > { %v4809_v31 = vpop.eup %4808  ;;  %4834 = vpow2.f32 %v4072_v43  ;;  %v4073_v36 = vmul.f32 -1.442695, %v6527_v27  ;;  %3443 = vmatprep.mubr.f32.mxu0 %v3248_v8  ;;  %v3249_v5 = vmul.f32 %v4807_v50, %v6434_v11 }
 0x50d   : > { %v4811_v29 = vpop.eup %4810  ;;  %4836 = vrcp.f32 %v3160_v42  ;;  %v3161_v15 = vadd.f32 1.0, %v4809_v31  ;;  %v4074_v14 = vmul.f32 -1.442695, %v6532_v35  ;;  %3444 = vmatmul.mubr.f32.gmra.mxu0 %v3247_v26 }
 0x50e   : > { %v4813_v56 = vpop.eup %4812  ;;  %4838 = vpow2.f32 %v4073_v36  ;;  %v3250_v63 = vmul.f32 %v4811_v29, %v6441_v38 }
 0x50f   : > { %v4815_v37 = vpop.eup %4814  ;;  %4840 = vrcp.f32 %v3161_v15  ;;  %v3162_v18 = vadd.f32 1.0, %v4813_v56 }
 0x510   : > { %v4817_v12 = vpop.eup %4816  ;;  %v3163_v55 = vadd.f32 1.0, %v4815_v37  ;;  %4842 = vpow2.f32 %v4074_v14  ;;  %3449 = vmatprep.mubr.f32.mxu0 %v3250_v63 }
 0x511   : > { %v4819_v60 = vpop.eup %4818  ;;  %4844 = vrcp.f32 %v3162_v18  ;;  %3450 = vmatmul.mubr.f32.gmra.mxu0 %v3249_v5  ;;  %v3251_v38 = vmul.f32 %v4817_v12, %v6446_v7  ;;  %v3536_v18 = vld [vmem:[%s6774_s14] sm:$0x3] }
 0x512   : > { %v4821_v19 = vpop.eup %4820  ;;  %v3164_v47 = vadd.f32 1.0, %v4819_v60  ;;  %4846 = vrcp.f32 %v3163_v55  ;;  %v3331_v12 = vld [vmem:[%s6808_s12] sm:$0x3]  ;;  %v6573_v60 = vrot.slane %v3536_v18, %v5940_v44 }
 0x513   : > { %v4823_v4 = vpop.eup %4822  ;;  %v3252_v23 = vmul.f32 %v4821_v19, %v6450_v21  ;;  %v6576_v19 = vrot.slane %v3331_v12, %v5940_v44 }
 0x514   : > { %v4825_v51 = vpop.eup %4824  ;;  %4848 = vrcp.f32 %v3164_v47  ;;  %v3165_v11 = vadd.f32 1.0, %v4823_v4 }
 0x515   : > { %v4827_v54 = vpop.eup %4826  ;;  %3455 = vmatprep.mubr.f32.mxu0 %v3252_v23  ;;  %v3253_v24 = vmul.f32 %v4825_v51, %v6455_v32  ;;  %v6582_v23 = vrot.slane %v3536_v18, %v5945_v45  ;;  %v6585_v51 = vrot.slane %v3331_v12, %v5945_v45 }
 0x516   : > { %v4829_v22 = vpop.eup %4828  ;;  %v3166_v53 = vadd.f32 1.0, %v4827_v54  ;;  %3456 = vmatmul.mubr.f32.gmra.mxu0 %v3251_v38  ;;  %4850 = vrcp.f32 %v3165_v11 }
 0x517   : > { %v4831_v0 = vpop.eup %4830  ;;  %v3254_v57 = vmul.f32 %v4829_v22, %v6463_v17 }
 0x518   : > { %v4833_v62 = vpop.eup %4832  ;;  %4852 = vrcp.f32 %v3166_v53  ;;  %v3167_v59 = vadd.f32 1.0, %v4831_v0 }
 0x519   : > { %v4835_v21 = vpop.eup %4834  ;;  %3461 = vmatprep.mubr.f32.mxu0 %v3254_v57  ;;  %v3255_v20 = vmul.f32 %v4833_v62, %v6470_v58 }
 0x51a   : > { %v4837_v3 = vpop.eup %4836  ;;  %v3168_v7 = vadd.f32 1.0, %v4835_v21  ;;  %3462 = vmatmul.mubr.f32.gmra.mxu0 %v3253_v24  ;;  %4854 = vrcp.f32 %v3167_v59 }
 0x51b   : > { %v4839_v39 = vpop.eup %4838  ;;  %v3256_v6 = vmul.f32 %v4837_v3, %v6474_v9 }
 0x51c   : > { %v4841_v16 = vpop.eup %4840  ;;  %4856 = vrcp.f32 %v3168_v7  ;;  %v3169_v46 = vadd.f32 1.0, %v4839_v39 }
 0x51d   : > { %v4843_v17 = vpop.eup %4842  ;;  %3467 = vmatprep.mubr.f32.mxu0 %v3256_v6  ;;  %v3257_v2 = vmul.f32 %v4841_v16, %v6480_v52 }
 0x51e   : > { %v4845_v13 = vpop.eup %4844  ;;  %v3170_v32 = vadd.f32 1.0, %v4843_v17  ;;  %3468 = vmatmul.mubr.f32.gmra.mxu0 %v3255_v20  ;;  %4858 = vrcp.f32 %v3169_v46 }
 0x51f   : > { %v3258_v34 = vmul.f32 %v4845_v13, %v6487_v40  ;;  %v4847_v10 = vpop.eup %4846 }
 0x520   : > { %4860 = vrcp.f32 %v3170_v32  ;;  %v3259_v43 = vmul.f32 %v4847_v10, %v6494_v25 }
 0x521   : > { %v4849_v30 = vpop.eup %4848  ;;  %3473 = vmatprep.mubr.f32.mxu0 %v3258_v34 }
 0x522   : > { %3474 = vmatmul.mubr.f32.gmra.mxu0 %v3257_v2  ;;  %v3260_v9 = vmul.f32 %v4849_v30, %v6498_v49 }
 0x523   : > { %v4851_v58 = vpop.eup %4850 }
 0x524   : > { %3479 = vmatprep.mubr.f32.mxu0 %v3260_v9  ;;  %v3261_v40 = vmul.f32 %v4851_v58, %v6505_v33 }
 0x525   : > { %v4853_v28 = vpop.eup %4852 }
 0x526   : > { %3480 = vmatmul.mubr.f32.gmra.mxu0 %v3259_v43  ;;  %v3262_v48 = vmul.f32 %v4853_v28, %v6512_v61  ;;  %v3614_v61 = vpop.f32.mrf.mxu1 }
 0x527   : > { %v4855_v8 = vpop.eup %4854  ;;  %v3615_v4 = vadd.f32 %v3614_v61, %v6573_v60 }
 0x528   : > { %3485 = vmatprep.mubr.f32.mxu0 %v3262_v48  ;;  %v3263_v42 = vmul.f32 %v4855_v8, %v6516_v41  ;;  %v3616_v36 = vpop.f32.mrf.mxu1 }
 0x529   : > { %v4857_v50 = vpop.eup %4856  ;;  %v3617_v44 = vadd.f32 %v3616_v36, %v6582_v23 }
 0x52a   : > { %3486 = vmatmul.mubr.f32.gmra.mxu0 %v3261_v40  ;;  %v3264_v52 = vmul.f32 %v4857_v50, %v6523_v1  ;;  %v3620_v33 = vpop.f32.mrf.mxu1 }
 0x52b   : > { %v4859_v26 = vpop.eup %4858  ;;  %v3621_v57 = vadd.f32 %v3620_v33, %v6573_v60 }
 0x52c   : > { %3491 = vmatprep.mubr.f32.mxu0 %v3264_v52  ;;  %v3265_v31 = vmul.f32 %v4859_v26, %v6527_v27  ;;  %v3622_v29 = vpop.f32.mrf.mxu1 }
 0x52d   : > { %v4861_v49 = vpop.eup %4860  ;;  %v3623_v6 = vadd.f32 %v3622_v29, %v6582_v23 }
 0x52e   : > { %3492 = vmatmul.mubr.f32.gmra.mxu0 %v3263_v42  ;;  %v3266_v25 = vmul.f32 %v4861_v49, %v6532_v35  ;;  %v3626_v15 = vpop.f32.mrf.mxu1 }
 0x52f   : > { %v3627_v20 = vadd.f32 %v3626_v15, %v6573_v60 }
 0x530   : > { %3497 = vmatprep.mubr.f32.mxu0 %v3266_v25  ;;  %v3628_v14 = vpop.f32.mrf.mxu1 }
 0x531   : > { %v3629_v9 = vadd.f32 %v3628_v14, %v6582_v23 }
 0x532   : > { %3498 = vmatmul.mubr.f32.gmra.mxu0 %v3265_v31  ;;  %v3632_v56 = vpop.f32.mrf.mxu1 }
 0x533   : > { %v3633_v43 = vadd.f32 %v3632_v56, %v6573_v60 }
 0x534   : > { %v3634_v1 = vpop.f32.mrf.mxu1 }
 0x535   : > { %v3635_v52 = vadd.f32 %v3634_v1, %v6582_v23 }
 0x536   : > { %v3638_v63 = vpop.f32.mrf.mxu1 }
 0x537   : > { %v3639_v31 = vadd.f32 %v3638_v63, %v6573_v60 }
 0x538   : > { %v6554_v41 = vpop.f32.mrf.mxu1 }
 0x539   : > { %v3641_v14 = vadd.f32 %v6554_v41, %v6582_v23 }
 0x53a   : > { %v6556_v37 = vpop.f32.mrf.mxu1 }
 0x53b   : > { %v3645_v63 = vadd.f32 %v6556_v37, %v6573_v60 }
 0x53c   : > { %v6558_v5 = vpop.f32.mrf.mxu1 }
 0x53d   : > { %v3647_v41 = vadd.f32 %v6558_v5, %v6582_v23 }
 0x53e   : > { %v6560_v35 = vpop.f32.mrf.mxu1 }
 0x53f   : > { %v3651_v37 = vadd.f32 %v6560_v35, %v6573_v60 }
 0x540   : > { %v6562_v27 = vpop.f32.mrf.mxu1 }
 0x541   : > { %v3653_v5 = vadd.f32 %v6562_v27, %v6582_v23 }
 0x542   : > { %v6570_v55 = vpop.f32.mrf.mxu1 }
 0x543   : > { %v3657_v35 = vadd.f32 %v6570_v55, %v6573_v60 }
 0x544   : > { %v6578_v47 = vpop.f32.mrf.mxu1 }
 0x546   : > { %v6589_v22 = vpop.f32.mrf.mxu1 }
 0x547   : > { %v3663_v55 = vadd.f32 %v6589_v22, %v6573_v60 }
 0x548   : > { %v6595_v3 = vpop.f32.mrf.mxu1 }
 0x54a   : > { %v6605_v34 = vpop.f32.mrf.mxu1 }
 0x54b   : > { %v3669_v22 = vadd.f32 %v6605_v34, %v6573_v60 }
 0x54c   : > { %v6613_v50 = vpop.f32.mrf.mxu1 }
 0x54e   : > { %v6621_v15 = vpop.f32.mrf.mxu1 }
 0x54f   : > { %v3675_v34 = vadd.f32 %v6621_v15, %v6573_v60 }
 0x5b3   : > { %v3409_v38 = vpop.f32.mrf.mxu0 }
 0x5b4   : > { %v3410_v11 = vadd.f32 %v3409_v38, %v6576_v19 }
 0x5b5   : > { %v3411_v54 = vpop.f32.mrf.mxu0 }
 0x5b6   : > { %v3709_v53 = vadd.f32 %v3615_v4, %v3410_v11  ;;  %v3412_v0 = vadd.f32 %v3411_v54, %v6585_v51 }
 0x5b7   : > { %v3415_v62 = vpop.f32.mrf.mxu0 }
 0x5b8   : > { %v3741_v24 = vmul.f32 0.70710677, %v3709_v53  ;;  %v3710_v59 = vadd.f32 %v3617_v44, %v3412_v0  ;;  %v3416_v45 = vadd.f32 %v3415_v62, %v6576_v19  ;;  %v6631_v53 = vpop.f32.mrf.mxu1 }
 0x5b9   : > { %v3417_v21 = vpop.f32.mrf.mxu0 }
 0x5ba   : > { %3773 = vst [vmem:[%s6597_s27] sm:$0xff] %v3741_v24  ;;  %v3742_v7 = vmul.f32 0.70710677, %v3710_v59  ;;  %v3711_v39 = vadd.f32 %v3621_v57, %v3416_v45  ;;  %v3418_v16 = vadd.f32 %v3417_v21, %v6585_v51 }
 0x5bb   : > { %v3421_v13 = vpop.f32.mrf.mxu0 }
 0x5bc   : > { %3774 = vst [vmem:[%s6597_s27 + $0x8] sm:$0xff] %v3742_v7  ;;  %v3743_v46 = vmul.f32 0.70710677, %v3711_v39  ;;  %v3712_v17 = vadd.f32 %v3623_v6, %v3418_v16  ;;  %v3422_v32 = vadd.f32 %v3421_v13, %v6576_v19  ;;  %v3680_v7 = vpop.f32.mrf.mxu1 }
 0x5bd   : > { %v3423_v2 = vpop.f32.mrf.mxu0  ;;  %v3681_v15 = vadd.f32 %v3680_v7, %v6573_v60 }
 0x5be   : > { %3775 = vst [vmem:[%s6597_s27 + $0x10] sm:$0xff] %v3743_v46  ;;  %v3744_v10 = vmul.f32 0.70710677, %v3712_v17  ;;  %v3713_v30 = vadd.f32 %v3627_v20, %v3422_v32  ;;  %v3424_v58 = vadd.f32 %v3423_v2, %v6585_v51 }
 0x5bf   : > { %v3427_v28 = vpop.f32.mrf.mxu0 }
 0x5c0   : > { %3776 = vst [vmem:[%s6597_s27 + $0x18] sm:$0xff] %v3744_v10  ;;  %v3745_v48 = vmul.f32 0.70710677, %v3713_v30  ;;  %v3714_v8 = vadd.f32 %v3629_v9, %v3424_v58  ;;  %v3428_v40 = vadd.f32 %v3427_v28, %v6576_v19  ;;  %v3682_v10 = vpop.f32.mrf.mxu1  ;;  %v3659_v9 = vadd.f32 %v6578_v47, %v6582_v23 }
 0x5c1   : > { %v3429_v26 = vpop.f32.mrf.mxu0  ;;  %v3665_v47 = vadd.f32 %v6595_v3, %v6582_v23 }
 0x5c2   : > { %3777 = vst [vmem:[%s6597_s27 + $0x20] sm:$0xff] %v3745_v48  ;;  %v3746_v42 = vmul.f32 0.70710677, %v3714_v8  ;;  %v3715_v49 = vadd.f32 %v3633_v43, %v3428_v40  ;;  %v3430_v25 = vadd.f32 %v3429_v26, %v6585_v51  ;;  %v3686_v8 = vpop.f32.mrf.mxu1 }
 0x5c4   : > { %3778 = vst [vmem:[%s6597_s27 + $0x28] sm:$0xff] %v3746_v42  ;;  %v3747_v36 = vmul.f32 0.70710677, %v3715_v49  ;;  %v3716_v33 = vadd.f32 %v3635_v52, %v3430_v25 }
 0x5c5   : > { %v3433_v61 = vpop.f32.mrf.mxu0 }
 0x5c6   : > { %v3434_v29 = vadd.f32 %v3433_v61, %v6576_v19  ;;  %3779 = vst [vmem:[%s6597_s27 + $0x30] sm:$0xff] %v3747_v36  ;;  %v3748_v1 = vmul.f32 0.70710677, %v3716_v33 }
 0x5c7   : > { %v3435_v56 = vpop.f32.mrf.mxu0 }
 0x5c8   : > { %v3717_v18 = vadd.f32 %v3639_v31, %v3434_v29  ;;  %v3436_v12 = vadd.f32 %v3435_v56, %v6585_v51  ;;  %3780 = vst [vmem:[%s6597_s27 + $0x38] sm:$0xff] %v3748_v1  ;;  %v3688_v31 = vpop.f32.mrf.mxu1  ;;  %v3671_v29 = vadd.f32 %v6613_v50, %v6582_v23  ;;  %v3677_v50 = vadd.f32 %v6631_v53, %v6582_v23 }
 0x5c9   : > { %v3439_v4 = vpop.f32.mrf.mxu0 }
 0x5ca   : > { %v3749_v38 = vmul.f32 0.70710677, %v3717_v18  ;;  %v3718_v11 = vadd.f32 %v3641_v14, %v3436_v12  ;;  %v3440_v54 = vadd.f32 %v3439_v4, %v6576_v19  ;;  %v3692_v12 = vpop.f32.mrf.mxu1 }
 0x5cb   : > { %v3441_v44 = vpop.f32.mrf.mxu0 }
 0x5cc   : > { %3781 = vst [vmem:[%s6597_s27 + $0x40] sm:$0xff] %v3749_v38  ;;  %v3750_v0 = vmul.f32 0.70710677, %v3718_v11  ;;  %v3719_v57 = vadd.f32 %v3645_v63, %v3440_v54  ;;  %v3442_v62 = vadd.f32 %v3441_v44, %v6585_v51 }
 0x5cd   : > { %v3445_v24 = vpop.f32.mrf.mxu0 }
 0x5ce   : > { %3782 = vst [vmem:[%s6597_s27 + $0x48] sm:$0xff] %v3750_v0  ;;  %v3751_v59 = vmul.f32 0.70710677, %v3719_v57  ;;  %v3720_v45 = vadd.f32 %v3647_v41, %v3442_v62  ;;  %v3446_v21 = vadd.f32 %v3445_v24, %v6576_v19  ;;  %v3694_v57 = vpop.f32.mrf.mxu1 }
 0x5cf   : > { %v3447_v39 = vpop.f32.mrf.mxu0 }
 0x5d0   : > { %3783 = vst [vmem:[%s6597_s27 + $0x50] sm:$0xff] %v3751_v59  ;;  %v3752_v6 = vmul.f32 0.70710677, %v3720_v45  ;;  %v3721_v16 = vadd.f32 %v3651_v37, %v3446_v21  ;;  %v3448_v20 = vadd.f32 %v3447_v39, %v6585_v51  ;;  %v3683_v59 = vadd.f32 %v3682_v10, %v6582_v23 }
 0x5d1   : > { %v3451_v46 = vpop.f32.mrf.mxu0  ;;  %v3687_v39 = vadd.f32 %v3686_v8, %v6573_v60 }
 0x5d2   : > { %3784 = vst [vmem:[%s6597_s27 + $0x58] sm:$0xff] %v3752_v6  ;;  %v3753_v17 = vmul.f32 0.70710677, %v3721_v16  ;;  %v3722_v13 = vadd.f32 %v3653_v5, %v3448_v20  ;;  %v3452_v32 = vadd.f32 %v3451_v46, %v6576_v19  ;;  %v3698_v6 = vpop.f32.mrf.mxu1  ;;  %v3689_v46 = vadd.f32 %v3688_v31, %v6582_v23 }
 0x5d3   : > { %v3453_v2 = vpop.f32.mrf.mxu0 }
 0x5d4   : > { %3785 = vst [vmem:[%s6597_s27 + $0x60] sm:$0xff] %v3753_v17  ;;  %v3754_v27 = vmul.f32 0.70710677, %v3722_v13  ;;  %v3723_v30 = vadd.f32 %v3657_v35, %v3452_v32  ;;  %v3454_v58 = vadd.f32 %v3453_v2, %v6585_v51  ;;  %v3693_v2 = vadd.f32 %v3692_v12, %v6573_v60 }
 0x5d6   : > { %3786 = vst [vmem:[%s6597_s27 + $0x68] sm:$0xff] %v3754_v27  ;;  %v3755_v43 = vmul.f32 0.70710677, %v3723_v30  ;;  %v3724_v28 = vadd.f32 %v3659_v9, %v3454_v58  ;;  %v3457_v48 = vpop.f32.mrf.mxu0  ;;  %v3700_v30 = vpop.f32.mrf.mxu1 }
 0x5d7   : > { %v3458_v40 = vadd.f32 %v3457_v48, %v6576_v19 }
 0x5d8   : > { %3787 = vst [vmem:[%s6597_s27 + $0x70] sm:$0xff] %v3755_v43  ;;  %v3756_v52 = vmul.f32 0.70710677, %v3724_v28  ;;  %v3459_v26 = vpop.f32.mrf.mxu0  ;;  %v3695_v43 = vadd.f32 %v3694_v57, %v6582_v23 }
 0x5d9   : > { %v3725_v42 = vadd.f32 %v3663_v55, %v3458_v40  ;;  %v3460_v49 = vadd.f32 %v3459_v26, %v6585_v51 }
 0x5da   : > { %3788 = vst [vmem:[%s6597_s27 + $0x78] sm:$0xff] %v3756_v52  ;;  %v3463_v25 = vpop.f32.mrf.mxu0  ;;  %v3699_v52 = vadd.f32 %v3698_v6, %v6573_v60 }
 0x5db   : > { %v3757_v61 = vmul.f32 0.70710677, %v3725_v42  ;;  %v3726_v36 = vadd.f32 %v3665_v47, %v3460_v49  ;;  %v3464_v33 = vadd.f32 %v3463_v25, %v6576_v19  ;;  %v3704_v42 = vpop.f32.mrf.mxu1  ;;  %v3701_v25 = vadd.f32 %v3700_v30, %v6582_v23 }
 0x5dc   : > { %v3465_v14 = vpop.f32.mrf.mxu0 }
 0x5dd   : > { %3789 = vst [vmem:[%s6597_s27 + $0x80] sm:$0xff] %v3757_v61  ;;  %v3758_v3 = vmul.f32 0.70710677, %v3726_v36  ;;  %v3727_v56 = vadd.f32 %v3669_v22, %v3464_v33  ;;  %v3466_v1 = vadd.f32 %v3465_v14, %v6585_v51 }
 0x5de   : > { %v3469_v18 = vpop.f32.mrf.mxu0 }
 0x5df   : > { %3790 = vst [vmem:[%s6597_s27 + $0x88] sm:$0xff] %v3758_v3  ;;  %v3759_v63 = vmul.f32 0.70710677, %v3727_v56  ;;  %v3728_v4 = vadd.f32 %v3671_v29, %v3466_v1  ;;  %v3470_v38 = vadd.f32 %v3469_v18, %v6576_v19  ;;  %v3705_v29 = vadd.f32 %v3704_v42, %v6573_v60  ;;  %v3706_v3 = vpop.f32.mrf.mxu1 }
 0x5e0   : > { %v3471_v11 = vpop.f32.mrf.mxu0 }
 0x5e1   : > { %3791 = vst [vmem:[%s6597_s27 + $0x90] sm:$0xff] %v3759_v63  ;;  %v3760_v54 = vmul.f32 0.70710677, %v3728_v4  ;;  %v3729_v41 = vadd.f32 %v3675_v34, %v3470_v38  ;;  %v3472_v44 = vadd.f32 %v3471_v11, %v6585_v51  ;;  %v3707_v4 = vadd.f32 %v3706_v3, %v6582_v23 }
 0x5e2   : > { %v3475_v0 = vpop.f32.mrf.mxu0 }
 0x5e3   : > { %3792 = vst [vmem:[%s6597_s27 + $0x98] sm:$0xff] %v3760_v54  ;;  %v3761_v62 = vmul.f32 0.70710677, %v3729_v41  ;;  %v3730_v37 = vadd.f32 %v3677_v50, %v3472_v44  ;;  %v3476_v24 = vadd.f32 %v3475_v0, %v6576_v19 }
 0x5e4   : > { %v3477_v53 = vpop.f32.mrf.mxu0 }
 0x5e5   : > { %3793 = vst [vmem:[%s6597_s27 + $0xa0] sm:$0xff] %v3761_v62  ;;  %v3762_v45 = vmul.f32 0.70710677, %v3730_v37  ;;  %v3731_v21 = vadd.f32 %v3681_v15, %v3476_v24  ;;  %v3478_v5 = vadd.f32 %v3477_v53, %v6585_v51 }
 0x5e6   : > { %v3481_v7 = vpop.f32.mrf.mxu0 }
 0x5e7   : > { %3794 = vst [vmem:[%s6597_s27 + $0xa8] sm:$0xff] %v3762_v45  ;;  %v3763_v16 = vmul.f32 0.70710677, %v3731_v21  ;;  %v3732_v20 = vadd.f32 %v3683_v59, %v3478_v5  ;;  %v3482_v35 = vadd.f32 %v3481_v7, %v6576_v19 }
 0x5e8   : > { %v3483_v17 = vpop.f32.mrf.mxu0 }
 0x5e9   : > { %3795 = vst [vmem:[%s6597_s27 + $0xb0] sm:$0xff] %v3763_v16  ;;  %v3764_v13 = vmul.f32 0.70710677, %v3732_v20  ;;  %v3733_v32 = vadd.f32 %v3687_v39, %v3482_v35  ;;  %v3484_v10 = vadd.f32 %v3483_v17, %v6585_v51 }
 0x5ea   : > { %v3487_v27 = vpop.f32.mrf.mxu0 }
 0x5eb   : > { %3796 = vst [vmem:[%s6597_s27 + $0xb8] sm:$0xff] %v3764_v13  ;;  %v3765_v9 = vmul.f32 0.70710677, %v3733_v32  ;;  %v3734_v58 = vadd.f32 %v3689_v46, %v3484_v10  ;;  %v3488_v55 = vadd.f32 %v3487_v27, %v6576_v19 }
 0x5ec   : > { %v3489_v28 = vpop.f32.mrf.mxu0 }
 0x5ed   : > { %3797 = vst [vmem:[%s6597_s27 + $0xc0] sm:$0xff] %v3765_v9  ;;  %v3766_v48 = vmul.f32 0.70710677, %v3734_v58  ;;  %v3735_v8 = vadd.f32 %v3693_v2, %v3488_v55  ;;  %v3490_v40 = vadd.f32 %v3489_v28, %v6585_v51 }
 0x5ee   : > { %v3493_v26 = vpop.f32.mrf.mxu0 }
 0x5ef   : > { %3798 = vst [vmem:[%s6597_s27 + $0xc8] sm:$0xff] %v3766_v48  ;;  %v3767_v47 = vmul.f32 0.70710677, %v3735_v8  ;;  %v3736_v49 = vadd.f32 %v3695_v43, %v3490_v40  ;;  %v3494_v22 = vadd.f32 %v3493_v26, %v6576_v19 }
 0x5f0   : > { %v3495_v31 = vpop.f32.mrf.mxu0 }
 0x5f1   : > { %3799 = vst [vmem:[%s6597_s27 + $0xd0] sm:$0xff] %v3767_v47  ;;  %v3768_v61 = vmul.f32 0.70710677, %v3736_v49  ;;  %v3737_v36 = vadd.f32 %v3699_v52, %v3494_v22  ;;  %v3496_v33 = vadd.f32 %v3495_v31, %v6585_v51 }
 0x5f2   : > { %v3499_v14 = vpop.f32.mrf.mxu0 }
 0x5f3   : > { %3800 = vst [vmem:[%s6597_s27 + $0xd8] sm:$0xff] %v3768_v61  ;;  %v3769_v56 = vmul.f32 0.70710677, %v3737_v36  ;;  %v3738_v1 = vadd.f32 %v3701_v25, %v3496_v33  ;;  %v3500_v34 = vadd.f32 %v3499_v14, %v6576_v19 }
 0x5f4   : > { %v3501_v18 = vpop.f32.mrf.mxu0 }
 0x5f5   : > { %3801 = vst [vmem:[%s6597_s27 + $0xe0] sm:$0xff] %v3769_v56  ;;  %v3770_v12 = vmul.f32 0.70710677, %v3738_v1  ;;  %v3739_v63 = vadd.f32 %v3705_v29, %v3500_v34  ;;  %v3502_v38 = vadd.f32 %v3501_v18, %v6585_v51 }
 0x5f7   : > { %3802 = vst [vmem:[%s6597_s27 + $0xe8] sm:$0xff] %v3770_v12  ;;  %v3771_v60 = vmul.f32 0.70710677, %v3739_v63  ;;  %v3740_v50 = vadd.f32 %v3707_v4, %v3502_v38 }
 0x5f9   : > { %3803 = vst [vmem:[%s6597_s27 + $0xf0] sm:$0xff] %v3771_v60  ;;  %v3772_v19 = vmul.f32 0.70710677, %v3740_v50 }
 0x5fb   : > { %3804 = vst [vmem:[%s6597_s27 + $0xf8] sm:$0xff] %v3772_v19 }
 0x5fc   : > { %5036 = shalt.err (!%p5033_p3)
}
 0x5fd   : > { %s5037_s23 = scalar_lea.hbm %s6713_s7, 4096  ;;  %s5041_s27 = scalar_lea.hbm %s6809_s5, 8192 }
 0x5fe   : > { %p5038_p4 = scmp.ne.s32.totalorder %s6713_s7, %s5037_s23  ;;  %p5042_p9 = scmp.lt.s32.totalorder %s6713_s7, %s6809_s5 }
 0x5ff   : > { %p5043_p2 = scmp.lt.s32.totalorder %s5041_s27, %s5037_s23 }
 0x600   : > { %p5039_p6 = pnand %p5038_p4, %p6810_p7 }
 0x601   : > { %p5044_p10 = por %p5043_p2, %p5042_p9 }
 0x602   : > { %p5040_p8 = pneg %p5039_p6 }
 0x604   : > { %p5045_p12 = pnand %p5044_p10, %p5040_p8 }
 0x606   : > { %5048 = shalt.err (!%p5045_p12)
}
 0x607   : > { %s5108_s28 = smov 256   ;;  %s5109_s29 = smov 16  }
 0x608   : > { %4530 = dma.vmem_to_hbm [thread:$0]  (%p6810_p7), %s6715_s30, 4096, %s6713_s7, %s3806_s26, %s5108_s28, %s5108_s28, %s5109_s29  }
 0x609 PF: > { %s6811_s22 = sld [smem:[#allocation16_spill]]  ;;  %p6814_p13 = scmp.ge.s32.totalorder %s5095_s21, 2 }
 0x60a   : > { %s6812_s25 = sld [smem:[#allocation17_spill]] }
 0x60f   : > { %s3835_s24 = sand.u32 1, %s6811_s22  }
 0x610   : > { %p6813_p1 = scmp.ne.s32.totalorder %s6812_s25, 0  ;;  %s3836_s23 = scalar_lea.sflag [#allocation4], %s3835_s24 }
 0x612   : > { %p4550_p0 = pnand %p6814_p13, %p6813_p1 }
 0x614   : > { %p4551_p11 = pneg %p4550_p0 }
 0x616   : > { %5078 = dma.done.wait (%p4551_p11), %s3836_s23, 4096  }
 0x617   : > { %5080 = vsyncadd (%p4551_p11), %s3836_s23, 4294963200  ;;  %s6815_s12 = sld [smem:[#allocation18_spill]]  ;;  %s6816_s17 = smov %s5290_s18 }
 0x618   : > { %p30_p5 = scmp.ge.s32.totalorder %s5290_s18, 4   ;;  %s6817_s18 = smov %s5087_s19 }
 0x619   : > { %s6818_s19 = smov %s5091_s20  ;;  %s6820_s21 = smov %s6816_s17 }
 0x61a   :  { %32 = sbr.rel (!%p30_p5) target bundleno = 14 (0xe), region = 144 }
 0x61d   : > { %s6819_s20 = smov %s6815_s12 }
 0x61f   :  { %3841 = vsyncpa [#allocation3], 1 }
 0x620   :  { %3843 = vsyncpa [#allocation3 + $0x1], 1 }
 0x621   :  { %3844 = vsyncpa [#allocation6], 1 }
 0x622   :  { %3845 = vsyncpa [#allocation9], 1 }
 0x623   :  { %3846 = vsyncpa [#allocation4], 1 }
 0x624   :  { %3848 = vsyncpa [#allocation4 + $0x1], 1 }

</bundles_post_ra>
